<compile_context>
chip_gen: v7x
topology: tpu7x:2x2x1
jax: 0.10.0
libtpu: 0.0.40
codegen_flags: <defaults>
</compile_context>

<pallas_src>
import functools
import math

import jax
import jax.numpy as jnp
from jax import lax
from jax.experimental import pallas as pl
from jax.experimental.pallas import tpu as pltpu


def _round_up(x, m):
    return (x + m - 1) // m * m


def _decoder_kernel(num_layers, input_len, *refs):
    """One (batch-block, time-step) grid point of the teacher-forced decoder.

    refs:
      emb_ref   (1, Bb, HP)        embedded token for this step
      h0_ref    (2N, Bb, HP)       initial hidden (only read at t == 0)
      per layer l: w_ref (K_l, 8*HP), b_ref (1, 8*HP)   [resident across t]
      ctx_ref   (Bb, L_PAD, HP)    encoder outputs       [resident across t]
      wattn_ref (2*HP, HP), battn_ref (1, HP)
      wout_ref  (HP, C_PAD), bout_ref (1, C_PAD)
    outputs:
      probs_ref (1, Bb, C_PAD)
      hidden_ref(2N, Bb, HP)       carried recurrent state (resident across t)
      attn_ref  (1, Bb, L_PAD)
    """
    L = input_len

    emb_ref, h0_ref = refs[0], refs[1]
    gru_refs = refs[2:2 + 2 * num_layers]
    ctx_ref, wattn_ref, battn_ref, wout_ref, bout_ref = (
        refs[2 + 2 * num_layers:2 + 2 * num_layers + 5])
    probs_ref, hidden_ref, attn_ref = refs[-3:]

    HP = emb_ref.shape[-1]          # lane-padded hidden width (multiple of 128)
    t = pl.program_id(1)

    # Initialize the carried hidden state from the encoder hidden at the first step.
    @pl.when(t == 0)
    def _():
        hidden_ref[...] = h0_ref[...]

    x = emb_ref[0]                  # (Bb, HP); pad lanes are zero

    # --- bidirectional multi-layer GRU, seq len == 1 -------------------------------
    # Per layer: 3-4 partial dots on 128-aligned row blocks of the fused weight,
    # summed in f32 (no lane concatenation of activations).
    x_f = x_b = None
    for l in range(num_layers):
        w_ref = gru_refs[2 * l]                 # (K_l, 8*HP); gate slabs [r|z|i_n|h_n] x 2 dirs
        b_ref = gru_refs[2 * l + 1]             # (1, 8*HP)
        h_f = hidden_ref[2 * l + 0]             # (Bb, HP)
        h_b = hidden_ref[2 * l + 1]

        pieces = [x, h_f, h_b] if l == 0 else [x_f, x_b, h_f, h_b]

        g = b_ref[...]                          # (1, 8*HP) -> broadcasts on first add
        for p_idx, piece in enumerate(pieces):
            g = g + jnp.dot(piece, w_ref[p_idx * HP:(p_idx + 1) * HP, :],
                            preferred_element_type=jnp.float32)

        outs = []
        for d, h_prev in ((0, h_f), (1, h_b)):
            o = 4 * HP * d
            # 128-lane-aligned, full-vreg gate slices.
            r = jax.nn.sigmoid(g[:, o:o + HP])
            z = jax.nn.sigmoid(g[:, o + HP:o + 2 * HP])
            n = jnp.tanh(g[:, o + 2 * HP:o + 3 * HP] + r * g[:, o + 3 * HP:o + 4 * HP])
            h_new = (1.0 - z) * n + z * h_prev              # pad lanes stay exactly 0
            hidden_ref[2 * l + d] = h_new                   # lane-dense store, carried to t+1
            outs.append(h_new)
        x_f, x_b = outs

    out_g = x_f + x_b                                       # (Bb, HP); module sums both dirs

    # --- attention on the MXU (f32 accumulate) -------------------------------------
    ctx = ctx_ref[...]                                      # (Bb, L_PAD, HP); pad rows/lanes zero
    s3 = jnp.einsum('bqh,blh->bql', out_g[:, None, :], ctx,
                    preferred_element_type=jnp.float32)     # (Bb, 1, L_PAD)
    lane = lax.broadcasted_iota(jnp.int32, s3.shape, 2)
    s3 = jnp.where(lane < L, s3, -1e30)                     # mask padded input positions
    s3 = s3 - jnp.max(s3, axis=-1, keepdims=True)
    e = jnp.exp(s3)
    attn3 = e * pl.reciprocal(jnp.sum(e, axis=-1, keepdims=True), approx=True)
    attn_ref[0] = attn3[:, 0, :]                            # (Bb, L_PAD) lane-dense

    mix = jnp.einsum('bql,blh->bqh', attn3, ctx,
                     preferred_element_type=jnp.float32)[:, 0, :]    # (Bb, HP)

    # linear_out(cat(mix, out_g)) -> tanh, as two 128-row-block dots (no concat).
    att = jnp.tanh(
        jnp.dot(mix, wattn_ref[0:HP, :], preferred_element_type=jnp.float32)
        + jnp.dot(out_g, wattn_ref[HP:2 * HP, :], preferred_element_type=jnp.float32)
        + battn_ref[...])

    # --- output projection (classes lane-padded) -----------------------------------
    logits = jnp.dot(att, wout_ref[...], preferred_element_type=jnp.float32) + bout_ref[...]
    probs_ref[0] = logits


def init_params(key, hidden, num_layers, num_classes):
    H = hidden
    keys = iter(jax.random.split(key, 8 * num_layers + 8))

    def rnd(shape, scale=0.1):
        return scale * jax.random.normal(next(keys), shape, dtype=jnp.float32)

    p = {"embedding": rnd((num_classes, H))}
    for l in range(num_layers):
        in_dim = H if l == 0 else 2 * H
        for d in range(2):
            p[f"w_ih_{l}_{d}"] = rnd((3 * H, in_dim))
            p[f"w_hh_{l}_{d}"] = rnd((3 * H, H))
            p[f"b_ih_{l}_{d}"] = rnd((3 * H,))
            p[f"b_hh_{l}_{d}"] = rnd((3 * H,))
    p["w_attn"] = rnd((H, 2 * H))        # Attention.linear_out weight (out=H, in=2H)
    p["b_attn"] = rnd((H,))
    p["w_out"] = rnd((num_classes, H))   # self.out weight
    p["b_out"] = rnd((num_classes,))
    return p


def pack_params(params, hidden_size, num_layers, num_classes):
    """One-time host-side packing into lane-aligned (128-padded) slabs."""
    H = hidden_size
    HP = _round_up(H, 128)
    C_PAD = _round_up(num_classes, 128)

    packed = {"embedding": params["embedding"], "w_gru": [], "b_gru": [],
              "hp": HP, "c_pad": C_PAD}
    for l in range(num_layers):
        n_pieces = 3 if l == 0 else 4                  # [x,(x_b),h_f,h_b] row blocks
        W = jnp.zeros((n_pieces * HP, 8 * HP), jnp.float32)
        b = jnp.zeros((1, 8 * HP), jnp.float32)
        for d in range(2):
            wih = params[f"w_ih_{l}_{d}"]              # (3H, in_dim)
            whh = params[f"w_hh_{l}_{d}"]              # (3H, H)
            bih = params[f"b_ih_{l}_{d}"]
            bhh = params[f"b_hh_{l}_{d}"]
            o = 4 * HP * d
            # input piece(s) -> [r | z | i_n] column slabs of direction d
            if l == 0:
                x_blocks = [(0, wih)]                              # single H-wide input
            else:
                x_blocks = [(0, wih[:, 0:H]), (HP, wih[:, H:2 * H])]  # fwd / bwd halves
            for row0, w_in in x_blocks:
                for g_idx in range(3):                             # r, z, i_n
                    W = W.at[row0:row0 + H,
                             o + g_idx * HP:o + g_idx * HP + H].set(
                        w_in[g_idx * H:(g_idx + 1) * H, :].T)
            # hidden piece of direction d -> [r | z | h_n] column slabs of direction d
            h_row0 = (1 if l == 0 else 2) * HP + d * HP
            for g_idx, col_slab in ((0, 0), (1, 1), (2, 3)):
                W = W.at[h_row0:h_row0 + H,
                         o + col_slab * HP:o + col_slab * HP + H].set(
                    whh[g_idx * H:(g_idx + 1) * H, :].T)
            # fused bias: [b_ih_r + b_hh_r | b_ih_z + b_hh_z | b_ih_n | b_hh_n]
            b = b.at[0, o + 0 * HP:o + 0 * HP + H].set(bih[0:H] + bhh[0:H])
            b = b.at[0, o + 1 * HP:o + 1 * HP + H].set(bih[H:2 * H] + bhh[H:2 * H])
            b = b.at[0, o + 2 * HP:o + 2 * HP + H].set(bih[2 * H:3 * H])
            b = b.at[0, o + 3 * HP:o + 3 * HP + H].set(bhh[2 * H:3 * H])
        packed["w_gru"].append(W)
        packed["b_gru"].append(b)

    # linear_out: rows 0:HP multiply mix, rows HP:2HP multiply out_g.
    w_attn_t = params["w_attn"].T                                  # (2H, H)
    w_attn_p = jnp.zeros((2 * HP, HP), jnp.float32)
    w_attn_p = w_attn_p.at[0:H, 0:H].set(w_attn_t[0:H])
    w_attn_p = w_attn_p.at[HP:HP + H, 0:H].set(w_attn_t[H:2 * H])
    packed["w_attn_p"] = w_attn_p
    packed["b_attn_p"] = jnp.zeros((1, HP), jnp.float32).at[0, 0:H].set(params["b_attn"])
    packed["w_out_p"] = (jnp.zeros((HP, C_PAD), jnp.float32)
                         .at[0:H, 0:num_classes].set(params["w_out"].T))
    packed["b_out_p"] = (jnp.zeros((1, C_PAD), jnp.float32)
                         .at[0, 0:num_classes].set(params["b_out"]))
    return packed


def attn_decoder_steps(packed, tokens, encoder_output, encoder_hidden,
                       hidden_size, num_layers, num_classes):
    """T teacher-forced decoder steps in a single pallas_call.

    tokens:          (T, B) int32 decoder input tokens (step t's input)
    encoder_output:  (B, L, H)
    encoder_hidden:  (B, 2*num_layers, H)
    Returns: probs (T, B, C), hidden after step T-1 (B, 2*num_layers, H), attn (T, B, 1, L).
    """
    H = hidden_size
    HP = packed["hp"]
    C_PAD = packed["c_pad"]
    T, B = tokens.shape
    L = encoder_output.shape[1]
    L_PAD = _round_up(L, 128)
    B_BLK = 8
    B_P = _round_up(B, B_BLK)
    N2 = 2 * num_layers

    # Per-call glue, amortized over all T steps.
    emb = jnp.take(packed["embedding"], tokens, axis=0)                       # (T, B, H)
    emb = jnp.pad(emb, ((0, 0), (0, B_P - B), (0, HP - H)))                   # (T, B_P, HP)
    h0 = jnp.transpose(encoder_hidden, (1, 0, 2))                             # (2N, B, H)
    h0 = jnp.pad(h0, ((0, 0), (0, B_P - B), (0, HP - H)))                     # (2N, B_P, HP)
    ctx = jnp.pad(encoder_output,
                  ((0, B_P - B), (0, L_PAD - L), (0, HP - H)))                # (B_P, L_PAD, HP)

    grid = (B_P // B_BLK, T)          # (parallel batch blocks, sequential time steps)
    const2 = lambda b, t: (0, 0)      # weights: resident in VMEM across the whole grid

    inputs = [emb, h0]
    in_specs = [
        pl.BlockSpec((1, B_BLK, HP), lambda b, t: (t, b, 0)),                 # emb[t]
        pl.BlockSpec((N2, B_BLK, HP), lambda b, t: (0, b, 0)),                # h0 (resident)
    ]
    for l in range(num_layers):
        inputs += [packed["w_gru"][l], packed["b_gru"][l]]
        in_specs += [pl.BlockSpec(packed["w_gru"][l].shape, const2),
                     pl.BlockSpec(packed["b_gru"][l].shape, const2)]
    inputs += [ctx, packed["w_attn_p"], packed["b_attn_p"],
               packed["w_out_p"], packed["b_out_p"]]
    in_specs += [
        pl.BlockSpec((B_BLK, L_PAD, HP), lambda b, t: (b, 0, 0)),             # ctx (resident)
        pl.BlockSpec(packed["w_attn_p"].shape, const2),
        pl.BlockSpec(packed["b_attn_p"].shape, const2),
        pl.BlockSpec(packed["w_out_p"].shape, const2),
        pl.BlockSpec(packed["b_out_p"].shape, const2),
    ]

    out_shapes = (
        jax.ShapeDtypeStruct((T, B_P, C_PAD), jnp.float32),
        jax.ShapeDtypeStruct((N2, B_P, HP), jnp.float32),
        jax.ShapeDtypeStruct((T, B_P, L_PAD), jnp.float32),
    )
    out_specs = (
        pl.BlockSpec((1, B_BLK, C_PAD), lambda b, t: (t, b, 0)),
        pl.BlockSpec((N2, B_BLK, HP), lambda b, t: (0, b, 0)),   # carried state (resident)
        pl.BlockSpec((1, B_BLK, L_PAD), lambda b, t: (t, b, 0)),
    )

    # VMEM budget from actual resident bytes (weights + resident blocks + 2x pipelining
    # margin for the per-step blocks), not a blanket heuristic.
    resident = (sum(int(a.size) * a.dtype.itemsize for a in inputs)
                + sum(math.prod(s.shape) * 4 for s in out_shapes))
    vmem_limit = int(min(max(16 * 1024 * 1024, 2 * resident), 100 * 1024 * 1024))

    flops_step = 0
    for l in range(num_layers):
        n_pieces = 3 if l == 0 else 4
        flops_step += 2 * B_P * HP * 8 * HP * n_pieces          # fused GRU partial dots
    flops_step += 2 * 2 * B_P * L_PAD * HP                      # attention scores + mix
    flops_step += 2 * 2 * B_P * HP * HP                         # linear_out
    flops_step += 2 * B_P * HP * C_PAD                          # output projection
    trans_step = B_P * (num_layers * 2 * 3 * HP + L_PAD + HP)

    kernel = functools.partial(_decoder_kernel, num_layers, L)

    probs_pad, hidden_pad, attn_pad = pl.pallas_call(
        kernel,
        out_shape=out_shapes,
        grid=grid,
        in_specs=in_specs,
        out_specs=out_specs,
        compiler_params=pltpu.CompilerParams(
            dimension_semantics=("parallel", "arbitrary"),
            vmem_limit_bytes=vmem_limit),
        cost_estimate=pl.CostEstimate(flops=int(T * flops_step),
                                      transcendentals=int(T * trans_step),
                                      bytes_accessed=int(resident)),
    )(*inputs)

    # Strip padding / convert layout once, at the decode-loop boundary.
    probs = probs_pad[:, :B, :num_classes]                                    # (T, B, C)
    hidden_out = jnp.transpose(hidden_pad[:, :B, :H], (1, 0, 2))              # (B, 2N, H)
    attn_out = attn_pad[:, :B, :L][:, :, None, :]                             # (T, B, 1, L)
    return probs, hidden_out, attn_out


def reference_steps(params, tokens, encoder_output, encoder_hidden,
                    hidden_size, num_layers, num_classes):
    """Pure-JAX reference: the PyTorch forward (eval mode) applied T times with
    the hidden state carried between steps (teacher forcing)."""
    H = hidden_size
    T, B = tokens.shape
    h = jnp.transpose(encoder_hidden, (1, 0, 2))          # (2N, B, H)
    probs_all, attn_all = [], []
    for t in range(T):
        x = params["embedding"][tokens[t]]                # (B, H)
        h_new_list = []
        for l in range(num_layers):
            outs = []
            for d in range(2):
                h_prev = h[2 * l + d]
                gi = x @ params[f"w_ih_{l}_{d}"].T + params[f"b_ih_{l}_{d}"]
                gh = h_prev @ params[f"w_hh_{l}_{d}"].T + params[f"b_hh_{l}_{d}"]
                i_r, i_z, i_n = jnp.split(gi, 3, axis=-1)
                h_r, h_z, h_n = jnp.split(gh, 3, axis=-1)
                r = jax.nn.sigmoid(i_r + h_r)
                z = jax.nn.sigmoid(i_z + h_z)
                n = jnp.tanh(i_n + r * h_n)
                h_nd = (1.0 - z) * n + z * h_prev
                outs.append(h_nd)
                h_new_list.append(h_nd)
            x = jnp.concatenate(outs, axis=-1)
        h = jnp.stack(h_new_list, axis=0)
        out_g = x[:, :H] + x[:, H:]
        scores = jnp.einsum("bh,blh->bl", out_g, encoder_output)
        attn_w = jax.nn.softmax(scores, axis=-1)
        mix = jnp.einsum("bl,blh->bh", attn_w, encoder_output)
        combined = jnp.concatenate([mix, out_g], axis=-1)
        att = jnp.tanh(combined @ params["w_attn"].T + params["b_attn"])
        logits = att @ params["w_out"].T + params["b_out"]
        probs_all.append(logits)
        attn_all.append(attn_w[:, None, :])
    hidden_final = jnp.transpose(h, (1, 0, 2))             # (B, 2N, H)
    return jnp.stack(probs_all, 0), hidden_final, jnp.stack(attn_all, 0)


if __name__ == "__main__":
    B, H, NUM_LAYERS, NUM_CLASSES, L, T = 2, 32, 2, 16, 8, 4

    key = jax.random.PRNGKey(0)
    kp, k1, k2, k3 = jax.random.split(key, 4)
    params = init_params(kp, H, NUM_LAYERS, NUM_CLASSES)
    packed = pack_params(params, H, NUM_LAYERS, NUM_CLASSES)   # one-time packing

    tokens = jax.random.randint(k1, (T, B), 0, NUM_CLASSES, dtype=jnp.int32)
    encoder_output = jax.random.normal(k2, (B, L, H), dtype=jnp.float32)
    encoder_hidden = jax.random.normal(k3, (B, 2 * NUM_LAYERS, H), dtype=jnp.float32)

    probs, hidden, attn = attn_decoder_steps(
        packed, tokens, encoder_output, encoder_hidden, H, NUM_LAYERS, NUM_CLASSES)
    jax.block_until_ready((probs, hidden, attn))

    r_probs, r_hidden, r_attn = reference_steps(
        params, tokens, encoder_output, encoder_hidden, H, NUM_LAYERS, NUM_CLASSES)

    assert probs.shape == (T, B, NUM_CLASSES)
    assert hidden.shape == (B, 2 * NUM_LAYERS, H)
    assert attn.shape == (T, B, 1, L)
    assert jnp.allclose(hidden, r_hidden, atol=5e-4), "hidden mismatch"
    # approx reciprocal in the softmax denominator -> slightly looser tolerance
    assert jnp.allclose(attn, r_attn, atol=5e-3), "attn mismatch"
    assert jnp.allclose(probs, r_probs, atol=5e-3), "class_probabilities mismatch"

    print("KERNEL_OK")
</pallas_src>

<mosaic_0001>
module attributes {stable_mosaic.version = 11 : i64} {
  func.func @_decoder_kernel(%arg0: i32, %arg1: i32, %arg2: memref<1x8x128xf32, #tpu.memory_space<vmem>>, %arg3: memref<4x8x128xf32, #tpu.memory_space<vmem>>, %arg4: memref<384x1024xf32, #tpu.memory_space<vmem>>, %arg5: memref<1x1024xf32, #tpu.memory_space<vmem>>, %arg6: memref<512x1024xf32, #tpu.memory_space<vmem>>, %arg7: memref<1x1024xf32, #tpu.memory_space<vmem>>, %arg8: memref<8x128x128xf32, #tpu.memory_space<vmem>>, %arg9: memref<256x128xf32, #tpu.memory_space<vmem>>, %arg10: memref<1x128xf32, #tpu.memory_space<vmem>>, %arg11: memref<128x128xf32, #tpu.memory_space<vmem>>, %arg12: memref<1x128xf32, #tpu.memory_space<vmem>>, %arg13: memref<1x8x128xf32, #tpu.memory_space<vmem>>, %arg14: memref<4x8x128xf32, #tpu.memory_space<vmem>>, %arg15: memref<1x8x128xf32, #tpu.memory_space<vmem>>) attributes {dimension_semantics = [#tpu.dimension_semantics<parallel>, #tpu.dimension_semantics<arbitrary>], iteration_bounds = array<i64: 1, 4>, scalar_prefetch = 0 : i64, scratch_operands = 0 : i64, tpu.core_type = #tpu.core_type<tc>, window_params = [{transform_indices = @transform_0, window_bounds = array<i64: 1, 8, 128>}, {transform_indices = @transform_1, window_bounds = array<i64: 4, 8, 128>}, {pipeline_mode = #tpu.pipeline_mode<synchronous>, transform_indices = @transform_2, window_bounds = array<i64: 384, 1024>}, {pipeline_mode = #tpu.pipeline_mode<synchronous>, transform_indices = @transform_3, window_bounds = array<i64: 1, 1024>}, {pipeline_mode = #tpu.pipeline_mode<synchronous>, transform_indices = @transform_4, window_bounds = array<i64: 512, 1024>}, {pipeline_mode = #tpu.pipeline_mode<synchronous>, transform_indices = @transform_5, window_bounds = array<i64: 1, 1024>}, {transform_indices = @transform_6, window_bounds = array<i64: 8, 128, 128>}, {pipeline_mode = #tpu.pipeline_mode<synchronous>, transform_indices = @transform_7, window_bounds = array<i64: 256, 128>}, {pipeline_mode = #tpu.pipeline_mode<synchronous>, transform_indices = @transform_8, window_bounds = array<i64: 1, 128>}, {pipeline_mode = #tpu.pipeline_mode<synchronous>, transform_indices = @transform_9, window_bounds = array<i64: 128, 128>}, {pipeline_mode = #tpu.pipeline_mode<synchronous>, transform_indices = @transform_10, window_bounds = array<i64: 1, 128>}, {transform_indices = @transform_11, window_bounds = array<i64: 1, 8, 128>}, {transform_indices = @transform_12, window_bounds = array<i64: 4, 8, 128>}, {transform_indices = @transform_13, window_bounds = array<i64: 1, 8, 128>}]} {
    %c0_i32 = arith.constant 0 : i32
    %0 = arith.cmpi eq, %arg1, %c0_i32 : i32
    %1 = arith.extui %0 : i1 to i32
    %c0_i32_0 = arith.constant 0 : i32
    %2 = arith.cmpi ne, %1, %c0_i32_0 : i32
    scf.if %2 {
      %c0_84 = arith.constant 0 : index
      %c0_85 = arith.constant 0 : index
      %c0_86 = arith.constant 0 : index
      %180 = vector.load %arg3[%c0_84, %c0_85, %c0_86] : memref<4x8x128xf32, #tpu.memory_space<vmem>>, vector<4x8x128xf32>
      %c0_87 = arith.constant 0 : index
      %c0_88 = arith.constant 0 : index
      %c0_89 = arith.constant 0 : index
      %181 = vector.load %arg14[%c0_87, %c0_88, %c0_89] : memref<4x8x128xf32, #tpu.memory_space<vmem>>, vector<4x8x128xf32>
      tpu.vector_store %arg14[%c0_87, %c0_88, %c0_89], %180 {strides = array<i32>} : memref<4x8x128xf32, #tpu.memory_space<vmem>>, vector<4x8x128xf32>,
    } else {
    }
    %c0 = arith.constant 0 : index
    %c0_1 = arith.constant 0 : index
    %c0_2 = arith.constant 0 : index
    %3 = vector.load %arg2[%c0, %c0_1, %c0_2] : memref<1x8x128xf32, #tpu.memory_space<vmem>>, vector<1x8x128xf32>
    %4 = vector.shape_cast %3 : vector<1x8x128xf32> to vector<8x128xf32>
    %c0_3 = arith.constant 0 : index
    %c0_4 = arith.constant 0 : index
    %c0_5 = arith.constant 0 : index
    %5 = vector.load %arg14[%c0_3, %c0_4, %c0_5] : memref<4x8x128xf32, #tpu.memory_space<vmem>>, vector<1x8x128xf32>
    %6 = vector.shape_cast %5 : vector<1x8x128xf32> to vector<8x128xf32>
    %c1 = arith.constant 1 : index
    %c0_6 = arith.constant 0 : index
    %c0_7 = arith.constant 0 : index
    %7 = vector.load %arg14[%c1, %c0_6, %c0_7] : memref<4x8x128xf32, #tpu.memory_space<vmem>>, vector<1x8x128xf32>
    %8 = vector.shape_cast %7 : vector<1x8x128xf32> to vector<8x128xf32>
    %c0_8 = arith.constant 0 : index
    %c0_9 = arith.constant 0 : index
    %9 = vector.load %arg5[%c0_8, %c0_9] : memref<1x1024xf32, #tpu.memory_space<vmem>>, vector<1x1024xf32>
    %c0_10 = arith.constant 0 : index
    %c0_11 = arith.constant 0 : index
    %10 = vector.load %arg4[%c0_10, %c0_11] : memref<384x1024xf32, #tpu.memory_space<vmem>>, vector<128x1024xf32>
    %cst = arith.constant dense<0.000000e+00> : vector<8x1024xf32>
    %11 = tpu.matmul %4, %10, %cst {dimension_numbers = #tpu.dot_dimension_numbers<[1], [0], [0], [1], [0, 0, 1, 1], [], []>} : vector<8x128xf32>, vector<128x1024xf32>, vector<8x1024xf32> -> vector<8x1024xf32>
    %12 = vector.broadcast %9 : vector<1x1024xf32> to vector<8x1024xf32>
    %13 = arith.addf %12, %11 : vector<8x1024xf32>
    %c128 = arith.constant 128 : index
    %c0_12 = arith.constant 0 : index
    %14 = vector.load %arg4[%c128, %c0_12] : memref<384x1024xf32, #tpu.memory_space<vmem>>, vector<128x1024xf32>
    %cst_13 = arith.constant dense<0.000000e+00> : vector<8x1024xf32>
    %15 = tpu.matmul %6, %14, %cst_13 {dimension_numbers = #tpu.dot_dimension_numbers<[1], [0], [0], [1], [0, 0, 1, 1], [], []>} : vector<8x128xf32>, vector<128x1024xf32>, vector<8x1024xf32> -> vector<8x1024xf32>
    %16 = arith.addf %13, %15 : vector<8x1024xf32>
    %c256 = arith.constant 256 : index
    %c0_14 = arith.constant 0 : index
    %17 = vector.load %arg4[%c256, %c0_14] : memref<384x1024xf32, #tpu.memory_space<vmem>>, vector<128x1024xf32>
    %cst_15 = arith.constant dense<0.000000e+00> : vector<8x1024xf32>
    %18 = tpu.matmul %8, %17, %cst_15 {dimension_numbers = #tpu.dot_dimension_numbers<[1], [0], [0], [1], [0, 0, 1, 1], [], []>} : vector<8x128xf32>, vector<128x1024xf32>, vector<8x1024xf32> -> vector<8x1024xf32>
    %19 = arith.addf %16, %18 : vector<8x1024xf32>
    %20 = vector.extract_strided_slice %19 {offsets = [0, 0], sizes = [8, 128], strides = [1, 1]} : vector<8x1024xf32> to vector<8x128xf32>
    %21 = arith.negf %20 : vector<8x128xf32>
    %22 = math.exp %21 : vector<8x128xf32>
    %cst_16 = arith.constant 1.000000e+00 : f32
    %23 = vector.broadcast %cst_16 : f32 to vector<8x128xf32>
    %24 = arith.addf %23, %22 : vector<8x128xf32>
    %25 = arith.divf %23, %24 : vector<8x128xf32>
    %26 = vector.extract_strided_slice %19 {offsets = [0, 128], sizes = [8, 128], strides = [1, 1]} : vector<8x1024xf32> to vector<8x128xf32>
    %27 = arith.negf %26 : vector<8x128xf32>
    %28 = math.exp %27 : vector<8x128xf32>
    %cst_17 = arith.constant 1.000000e+00 : f32
    %29 = vector.broadcast %cst_17 : f32 to vector<8x128xf32>
    %30 = arith.addf %29, %28 : vector<8x128xf32>
    %31 = arith.divf %29, %30 : vector<8x128xf32>
    %32 = vector.extract_strided_slice %19 {offsets = [0, 256], sizes = [8, 128], strides = [1, 1]} : vector<8x1024xf32> to vector<8x128xf32>
    %33 = vector.extract_strided_slice %19 {offsets = [0, 384], sizes = [8, 128], strides = [1, 1]} : vector<8x1024xf32> to vector<8x128xf32>
    %34 = arith.mulf %25, %33 : vector<8x128xf32>
    %35 = arith.addf %32, %34 : vector<8x128xf32>
    %36 = math.tanh %35 : vector<8x128xf32>
    %cst_18 = arith.constant 1.000000e+00 : f32
    %37 = vector.broadcast %cst_18 : f32 to vector<8x128xf32>
    %38 = arith.subf %37, %31 : vector<8x128xf32>
    %39 = arith.mulf %38, %36 : vector<8x128xf32>
    %40 = arith.mulf %31, %6 : vector<8x128xf32>
    %41 = arith.addf %39, %40 : vector<8x128xf32>
    %c0_19 = arith.constant 0 : index
    %c0_20 = arith.constant 0 : index
    %c0_21 = arith.constant 0 : index
    %42 = vector.load %arg14[%c0_19, %c0_20, %c0_21] : memref<4x8x128xf32, #tpu.memory_space<vmem>>, vector<1x8x128xf32>
    %43 = vector.shape_cast %42 : vector<1x8x128xf32> to vector<8x128xf32>
    %44 = vector.shape_cast %41 : vector<8x128xf32> to vector<1x8x128xf32>
    tpu.vector_store %arg14[%c0_19, %c0_20, %c0_21], %44 {strides = array<i32>} : memref<4x8x128xf32, #tpu.memory_space<vmem>>, vector<1x8x128xf32>,
    %45 = vector.extract_strided_slice %19 {offsets = [0, 512], sizes = [8, 128], strides = [1, 1]} : vector<8x1024xf32> to vector<8x128xf32>
    %46 = arith.negf %45 : vector<8x128xf32>
    %47 = math.exp %46 : vector<8x128xf32>
    %cst_22 = arith.constant 1.000000e+00 : f32
    %48 = vector.broadcast %cst_22 : f32 to vector<8x128xf32>
    %49 = arith.addf %48, %47 : vector<8x128xf32>
    %50 = arith.divf %48, %49 : vector<8x128xf32>
    %51 = vector.extract_strided_slice %19 {offsets = [0, 640], sizes = [8, 128], strides = [1, 1]} : vector<8x1024xf32> to vector<8x128xf32>
    %52 = arith.negf %51 : vector<8x128xf32>
    %53 = math.exp %52 : vector<8x128xf32>
    %cst_23 = arith.constant 1.000000e+00 : f32
    %54 = vector.broadcast %cst_23 : f32 to vector<8x128xf32>
    %55 = arith.addf %54, %53 : vector<8x128xf32>
    %56 = arith.divf %54, %55 : vector<8x128xf32>
    %57 = vector.extract_strided_slice %19 {offsets = [0, 768], sizes = [8, 128], strides = [1, 1]} : vector<8x1024xf32> to vector<8x128xf32>
    %58 = vector.extract_strided_slice %19 {offsets = [0, 896], sizes = [8, 128], strides = [1, 1]} : vector<8x1024xf32> to vector<8x128xf32>
    %59 = arith.mulf %50, %58 : vector<8x128xf32>
    %60 = arith.addf %57, %59 : vector<8x128xf32>
    %61 = math.tanh %60 : vector<8x128xf32>
    %cst_24 = arith.constant 1.000000e+00 : f32
    %62 = vector.broadcast %cst_24 : f32 to vector<8x128xf32>
    %63 = arith.subf %62, %56 : vector<8x128xf32>
    %64 = arith.mulf %63, %61 : vector<8x128xf32>
    %65 = arith.mulf %56, %8 : vector<8x128xf32>
    %66 = arith.addf %64, %65 : vector<8x128xf32>
    %c1_25 = arith.constant 1 : index
    %c0_26 = arith.constant 0 : index
    %c0_27 = arith.constant 0 : index
    %67 = vector.load %arg14[%c1_25, %c0_26, %c0_27] : memref<4x8x128xf32, #tpu.memory_space<vmem>>, vector<1x8x128xf32>
    %68 = vector.shape_cast %67 : vector<1x8x128xf32> to vector<8x128xf32>
    %69 = vector.shape_cast %66 : vector<8x128xf32> to vector<1x8x128xf32>
    tpu.vector_store %arg14[%c1_25, %c0_26, %c0_27], %69 {strides = array<i32>} : memref<4x8x128xf32, #tpu.memory_space<vmem>>, vector<1x8x128xf32>,
    %c2 = arith.constant 2 : index
    %c0_28 = arith.constant 0 : index
    %c0_29 = arith.constant 0 : index
    %70 = vector.load %arg14[%c2, %c0_28, %c0_29] : memref<4x8x128xf32, #tpu.memory_space<vmem>>, vector<1x8x128xf32>
    %71 = vector.shape_cast %70 : vector<1x8x128xf32> to vector<8x128xf32>
    %c3 = arith.constant 3 : index
    %c0_30 = arith.constant 0 : index
    %c0_31 = arith.constant 0 : index
    %72 = vector.load %arg14[%c3, %c0_30, %c0_31] : memref<4x8x128xf32, #tpu.memory_space<vmem>>, vector<1x8x128xf32>
    %73 = vector.shape_cast %72 : vector<1x8x128xf32> to vector<8x128xf32>
    %c0_32 = arith.constant 0 : index
    %c0_33 = arith.constant 0 : index
    %74 = vector.load %arg7[%c0_32, %c0_33] : memref<1x1024xf32, #tpu.memory_space<vmem>>, vector<1x1024xf32>
    %c0_34 = arith.constant 0 : index
    %c0_35 = arith.constant 0 : index
    %75 = vector.load %arg6[%c0_34, %c0_35] : memref<512x1024xf32, #tpu.memory_space<vmem>>, vector<128x1024xf32>
    %cst_36 = arith.constant dense<0.000000e+00> : vector<8x1024xf32>
    %76 = tpu.matmul %41, %75, %cst_36 {dimension_numbers = #tpu.dot_dimension_numbers<[1], [0], [0], [1], [0, 0, 1, 1], [], []>} : vector<8x128xf32>, vector<128x1024xf32>, vector<8x1024xf32> -> vector<8x1024xf32>
    %77 = vector.broadcast %74 : vector<1x1024xf32> to vector<8x1024xf32>
    %78 = arith.addf %77, %76 : vector<8x1024xf32>
    %c128_37 = arith.constant 128 : index
    %c0_38 = arith.constant 0 : index
    %79 = vector.load %arg6[%c128_37, %c0_38] : memref<512x1024xf32, #tpu.memory_space<vmem>>, vector<128x1024xf32>
    %cst_39 = arith.constant dense<0.000000e+00> : vector<8x1024xf32>
    %80 = tpu.matmul %66, %79, %cst_39 {dimension_numbers = #tpu.dot_dimension_numbers<[1], [0], [0], [1], [0, 0, 1, 1], [], []>} : vector<8x128xf32>, vector<128x1024xf32>, vector<8x1024xf32> -> vector<8x1024xf32>
    %81 = arith.addf %78, %80 : vector<8x1024xf32>
    %c256_40 = arith.constant 256 : index
    %c0_41 = arith.constant 0 : index
    %82 = vector.load %arg6[%c256_40, %c0_41] : memref<512x1024xf32, #tpu.memory_space<vmem>>, vector<128x1024xf32>
    %cst_42 = arith.constant dense<0.000000e+00> : vector<8x1024xf32>
    %83 = tpu.matmul %71, %82, %cst_42 {dimension_numbers = #tpu.dot_dimension_numbers<[1], [0], [0], [1], [0, 0, 1, 1], [], []>} : vector<8x128xf32>, vector<128x1024xf32>, vector<8x1024xf32> -> vector<8x1024xf32>
    %84 = arith.addf %81, %83 : vector<8x1024xf32>
    %c384 = arith.constant 384 : index
    %c0_43 = arith.constant 0 : index
    %85 = vector.load %arg6[%c384, %c0_43] : memref<512x1024xf32, #tpu.memory_space<vmem>>, vector<128x1024xf32>
    %cst_44 = arith.constant dense<0.000000e+00> : vector<8x1024xf32>
    %86 = tpu.matmul %73, %85, %cst_44 {dimension_numbers = #tpu.dot_dimension_numbers<[1], [0], [0], [1], [0, 0, 1, 1], [], []>} : vector<8x128xf32>, vector<128x1024xf32>, vector<8x1024xf32> -> vector<8x1024xf32>
    %87 = arith.addf %84, %86 : vector<8x1024xf32>
    %88 = vector.extract_strided_slice %87 {offsets = [0, 0], sizes = [8, 128], strides = [1, 1]} : vector<8x1024xf32> to vector<8x128xf32>
    %89 = arith.negf %88 : vector<8x128xf32>
    %90 = math.exp %89 : vector<8x128xf32>
    %cst_45 = arith.constant 1.000000e+00 : f32
    %91 = vector.broadcast %cst_45 : f32 to vector<8x128xf32>
    %92 = arith.addf %91, %90 : vector<8x128xf32>
    %93 = arith.divf %91, %92 : vector<8x128xf32>
    %94 = vector.extract_strided_slice %87 {offsets = [0, 128], sizes = [8, 128], strides = [1, 1]} : vector<8x1024xf32> to vector<8x128xf32>
    %95 = arith.negf %94 : vector<8x128xf32>
    %96 = math.exp %95 : vector<8x128xf32>
    %cst_46 = arith.constant 1.000000e+00 : f32
    %97 = vector.broadcast %cst_46 : f32 to vector<8x128xf32>
    %98 = arith.addf %97, %96 : vector<8x128xf32>
    %99 = arith.divf %97, %98 : vector<8x128xf32>
    %100 = vector.extract_strided_slice %87 {offsets = [0, 256], sizes = [8, 128], strides = [1, 1]} : vector<8x1024xf32> to vector<8x128xf32>
    %101 = vector.extract_strided_slice %87 {offsets = [0, 384], sizes = [8, 128], strides = [1, 1]} : vector<8x1024xf32> to vector<8x128xf32>
    %102 = arith.mulf %93, %101 : vector<8x128xf32>
    %103 = arith.addf %100, %102 : vector<8x128xf32>
    %104 = math.tanh %103 : vector<8x128xf32>
    %cst_47 = arith.constant 1.000000e+00 : f32
    %105 = vector.broadcast %cst_47 : f32 to vector<8x128xf32>
    %106 = arith.subf %105, %99 : vector<8x128xf32>
    %107 = arith.mulf %106, %104 : vector<8x128xf32>
    %108 = arith.mulf %99, %71 : vector<8x128xf32>
    %109 = arith.addf %107, %108 : vector<8x128xf32>
    %c2_48 = arith.constant 2 : index
    %c0_49 = arith.constant 0 : index
    %c0_50 = arith.constant 0 : index
    %110 = vector.load %arg14[%c2_48, %c0_49, %c0_50] : memref<4x8x128xf32, #tpu.memory_space<vmem>>, vector<1x8x128xf32>
    %111 = vector.shape_cast %110 : vector<1x8x128xf32> to vector<8x128xf32>
    %112 = vector.shape_cast %109 : vector<8x128xf32> to vector<1x8x128xf32>
    tpu.vector_store %arg14[%c2_48, %c0_49, %c0_50], %112 {strides = array<i32>} : memref<4x8x128xf32, #tpu.memory_space<vmem>>, vector<1x8x128xf32>,
    %113 = vector.extract_strided_slice %87 {offsets = [0, 512], sizes = [8, 128], strides = [1, 1]} : vector<8x1024xf32> to vector<8x128xf32>
    %114 = arith.negf %113 : vector<8x128xf32>
    %115 = math.exp %114 : vector<8x128xf32>
    %cst_51 = arith.constant 1.000000e+00 : f32
    %116 = vector.broadcast %cst_51 : f32 to vector<8x128xf32>
    %117 = arith.addf %116, %115 : vector<8x128xf32>
    %118 = arith.divf %116, %117 : vector<8x128xf32>
    %119 = vector.extract_strided_slice %87 {offsets = [0, 640], sizes = [8, 128], strides = [1, 1]} : vector<8x1024xf32> to vector<8x128xf32>
    %120 = arith.negf %119 : vector<8x128xf32>
    %121 = math.exp %120 : vector<8x128xf32>
    %cst_52 = arith.constant 1.000000e+00 : f32
    %122 = vector.broadcast %cst_52 : f32 to vector<8x128xf32>
    %123 = arith.addf %122, %121 : vector<8x128xf32>
    %124 = arith.divf %122, %123 : vector<8x128xf32>
    %125 = vector.extract_strided_slice %87 {offsets = [0, 768], sizes = [8, 128], strides = [1, 1]} : vector<8x1024xf32> to vector<8x128xf32>
    %126 = vector.extract_strided_slice %87 {offsets = [0, 896], sizes = [8, 128], strides = [1, 1]} : vector<8x1024xf32> to vector<8x128xf32>
    %127 = arith.mulf %118, %126 : vector<8x128xf32>
    %128 = arith.addf %125, %127 : vector<8x128xf32>
    %129 = math.tanh %128 : vector<8x128xf32>
    %cst_53 = arith.constant 1.000000e+00 : f32
    %130 = vector.broadcast %cst_53 : f32 to vector<8x128xf32>
    %131 = arith.subf %130, %124 : vector<8x128xf32>
    %132 = arith.mulf %131, %129 : vector<8x128xf32>
    %133 = arith.mulf %124, %73 : vector<8x128xf32>
    %134 = arith.addf %132, %133 : vector<8x128xf32>
    %c3_54 = arith.constant 3 : index
    %c0_55 = arith.constant 0 : index
    %c0_56 = arith.constant 0 : index
    %135 = vector.load %arg14[%c3_54, %c0_55, %c0_56] : memref<4x8x128xf32, #tpu.memory_space<vmem>>, vector<1x8x128xf32>
    %136 = vector.shape_cast %135 : vector<1x8x128xf32> to vector<8x128xf32>
    %137 = vector.shape_cast %134 : vector<8x128xf32> to vector<1x8x128xf32>
    tpu.vector_store %arg14[%c3_54, %c0_55, %c0_56], %137 {strides = array<i32>} : memref<4x8x128xf32, #tpu.memory_space<vmem>>, vector<1x8x128xf32>,
    %138 = arith.addf %109, %134 : vector<8x128xf32>
    %c0_57 = arith.constant 0 : index
    %c0_58 = arith.constant 0 : index
    %c0_59 = arith.constant 0 : index
    %139 = vector.load %arg8[%c0_57, %c0_58, %c0_59] : memref<8x128x128xf32, #tpu.memory_space<vmem>>, vector<8x128x128xf32>
    %140 = vector.shape_cast %138 : vector<8x128xf32> to vector<8x1x128xf32>
    "tpu.trace_start"() <{level = 10 : i32, message = "bqh,blh->bql"}> : () -> ()
    %cst_60 = arith.constant dense<0.000000e+00> : vector<8x1x128xf32>
    %141 = tpu.matmul %140, %139, %cst_60 {dimension_numbers = #tpu.dot_dimension_numbers<[2], [2], [1], [1], [0, 0, 0, 1, 1, 1], [0], [0]>} : vector<8x1x128xf32>, vector<8x128x128xf32>, vector<8x1x128xf32> -> vector<8x1x128xf32>
    "tpu.trace_stop"() : () -> ()
    %142 = tpu.iota {dimensions = array<i32: 2>} : vector<8x1x128xi32>
    %c8_i32 = arith.constant 8 : i32
    %143 = vector.broadcast %c8_i32 : i32 to vector<8x1x128xi32>
    %144 = arith.cmpi slt, %142, %143 : vector<8x1x128xi32>
    %cst_61 = arith.constant -1.000000e+30 : f32
    %145 = vector.broadcast %cst_61 : f32 to vector<8x1x128xf32>
    %146 = arith.select %144, %141, %145 : vector<8x1x128xi1>, vector<8x1x128xf32>
    %cst_62 = arith.constant dense<0xFF800000> : vector<8x1xf32>
    %147 = vector.multi_reduction <maximumf>, %146, %cst_62 [2] : vector<8x1x128xf32> to vector<8x1xf32>
    %148 = vector.shape_cast %147 : vector<8x1xf32> to vector<8x1x1xf32>
    %149 = vector.broadcast %148 : vector<8x1x1xf32> to vector<8x1x128xf32>
    %150 = arith.subf %146, %149 : vector<8x1x128xf32>
    %151 = math.exp %150 : vector<8x1x128xf32>
    %cst_63 = arith.constant dense<0.000000e+00> : vector<8x1xf32>
    %152 = vector.multi_reduction <add>, %151, %cst_63 [2] : vector<8x1x128xf32> to vector<8x1xf32>
    %153 = vector.shape_cast %152 : vector<8x1xf32> to vector<8x1x1xf32>
    %154 = tpu.reciprocal %153 {approx = true} : vector<8x1x1xf32> -> vector<8x1x1xf32>
    %155 = vector.broadcast %154 : vector<8x1x1xf32> to vector<8x1x128xf32>
    %156 = arith.mulf %151, %155 : vector<8x1x128xf32>
    %157 = vector.shape_cast %156 : vector<8x1x128xf32> to vector<8x128xf32>
    %c0_64 = arith.constant 0 : index
    %c0_65 = arith.constant 0 : index
    %c0_66 = arith.constant 0 : index
    %158 = vector.load %arg15[%c0_64, %c0_65, %c0_66] : memref<1x8x128xf32, #tpu.memory_space<vmem>>, vector<1x8x128xf32>
    %159 = vector.shape_cast %158 : vector<1x8x128xf32> to vector<8x128xf32>
    %160 = vector.shape_cast %157 : vector<8x128xf32> to vector<1x8x128xf32>
    tpu.vector_store %arg15[%c0_64, %c0_65, %c0_66], %160 {strides = array<i32>} : memref<1x8x128xf32, #tpu.memory_space<vmem>>, vector<1x8x128xf32>,
    "tpu.trace_start"() <{level = 10 : i32, message = "bql,blh->bqh"}> : () -> ()
    %cst_67 = arith.constant dense<0.000000e+00> : vector<8x1x128xf32>
    %161 = tpu.matmul %156, %139, %cst_67 {dimension_numbers = #tpu.dot_dimension_numbers<[2], [1], [1], [2], [0, 0, 0, 1, 1, 2], [0], [0]>} : vector<8x1x128xf32>, vector<8x128x128xf32>, vector<8x1x128xf32> -> vector<8x1x128xf32>
    "tpu.trace_stop"() : () -> ()
    %162 = vector.shape_cast %161 : vector<8x1x128xf32> to vector<8x128xf32>
    %c0_68 = arith.constant 0 : index
    %c0_69 = arith.constant 0 : index
    %163 = vector.load %arg9[%c0_68, %c0_69] : memref<256x128xf32, #tpu.memory_space<vmem>>, vector<128x128xf32>
    %cst_70 = arith.constant dense<0.000000e+00> : vector<8x128xf32>
    %164 = tpu.matmul %162, %163, %cst_70 {dimension_numbers = #tpu.dot_dimension_numbers<[1], [0], [0], [1], [0, 0, 1, 1], [], []>} : vector<8x128xf32>, vector<128x128xf32>, vector<8x128xf32> -> vector<8x128xf32>
    %c128_71 = arith.constant 128 : index
    %c0_72 = arith.constant 0 : index
    %165 = vector.load %arg9[%c128_71, %c0_72] : memref<256x128xf32, #tpu.memory_space<vmem>>, vector<128x128xf32>
    %cst_73 = arith.constant dense<0.000000e+00> : vector<8x128xf32>
    %166 = tpu.matmul %138, %165, %cst_73 {dimension_numbers = #tpu.dot_dimension_numbers<[1], [0], [0], [1], [0, 0, 1, 1], [], []>} : vector<8x128xf32>, vector<128x128xf32>, vector<8x128xf32> -> vector<8x128xf32>
    %167 = arith.addf %164, %166 : vector<8x128xf32>
    %c0_74 = arith.constant 0 : index
    %c0_75 = arith.constant 0 : index
    %168 = vector.load %arg10[%c0_74, %c0_75] : memref<1x128xf32, #tpu.memory_space<vmem>>, vector<1x128xf32>
    %169 = vector.broadcast %168 : vector<1x128xf32> to vector<8x128xf32>
    %170 = arith.addf %167, %169 : vector<8x128xf32>
    %171 = math.tanh %170 : vector<8x128xf32>
    %c0_76 = arith.constant 0 : index
    %c0_77 = arith.constant 0 : index
    %172 = vector.load %arg11[%c0_76, %c0_77] : memref<128x128xf32, #tpu.memory_space<vmem>>, vector<128x128xf32>
    %cst_78 = arith.constant dense<0.000000e+00> : vector<8x128xf32>
    %173 = tpu.matmul %171, %172, %cst_78 {dimension_numbers = #tpu.dot_dimension_numbers<[1], [0], [0], [1], [0, 0, 1, 1], [], []>} : vector<8x128xf32>, vector<128x128xf32>, vector<8x128xf32> -> vector<8x128xf32>
    %c0_79 = arith.constant 0 : index
    %c0_80 = arith.constant 0 : index
    %174 = vector.load %arg12[%c0_79, %c0_80] : memref<1x128xf32, #tpu.memory_space<vmem>>, vector<1x128xf32>
    %175 = vector.broadcast %174 : vector<1x128xf32> to vector<8x128xf32>
    %176 = arith.addf %173, %175 : vector<8x128xf32>
    %c0_81 = arith.constant 0 : index
    %c0_82 = arith.constant 0 : index
    %c0_83 = arith.constant 0 : index
    %177 = vector.load %arg13[%c0_81, %c0_82, %c0_83] : memref<1x8x128xf32, #tpu.memory_space<vmem>>, vector<1x8x128xf32>
    %178 = vector.shape_cast %177 : vector<1x8x128xf32> to vector<8x128xf32>
    %179 = vector.shape_cast %176 : vector<8x128xf32> to vector<1x8x128xf32>
    tpu.vector_store %arg13[%c0_81, %c0_82, %c0_83], %179 {strides = array<i32>} : memref<1x8x128xf32, #tpu.memory_space<vmem>>, vector<1x8x128xf32>,
    return
  }
  func.func @transform_0(%arg0: i32, %arg1: i32) -> (i32, i32, i32) {
    %c0_i32 = arith.constant 0 : i32
    %c0_i32_0 = arith.constant 0 : i32
    return %arg1, %arg0, %c0_i32 : i32, i32, i32
  }
  func.func @transform_1(%arg0: i32, %arg1: i32) -> (i32, i32, i32) {
    %c0_i32 = arith.constant 0 : i32
    %c0_i32_0 = arith.constant 0 : i32
    %c0_i32_1 = arith.constant 0 : i32
    return %c0_i32, %arg0, %c0_i32_0 : i32, i32, i32
  }
  func.func @transform_2(%arg0: i32, %arg1: i32) -> (i32, i32) {
    %c0_i32 = arith.constant 0 : i32
    %c0_i32_0 = arith.constant 0 : i32
    %c0_i32_1 = arith.constant 0 : i32
    return %c0_i32, %c0_i32_0 : i32, i32
  }
  func.func @transform_3(%arg0: i32, %arg1: i32) -> (i32, i32) {
    %c0_i32 = arith.constant 0 : i32
    %c0_i32_0 = arith.constant 0 : i32
    %c0_i32_1 = arith.constant 0 : i32
    return %c0_i32, %c0_i32_0 : i32, i32
  }
  func.func @transform_4(%arg0: i32, %arg1: i32) -> (i32, i32) {
    %c0_i32 = arith.constant 0 : i32
    %c0_i32_0 = arith.constant 0 : i32
    %c0_i32_1 = arith.constant 0 : i32
    return %c0_i32, %c0_i32_0 : i32, i32
  }
  func.func @transform_5(%arg0: i32, %arg1: i32) -> (i32, i32) {
    %c0_i32 = arith.constant 0 : i32
    %c0_i32_0 = arith.constant 0 : i32
    %c0_i32_1 = arith.constant 0 : i32
    return %c0_i32, %c0_i32_0 : i32, i32
  }
  func.func @transform_6(%arg0: i32, %arg1: i32) -> (i32, i32, i32) {
    %c0_i32 = arith.constant 0 : i32
    %c0_i32_0 = arith.constant 0 : i32
    %c0_i32_1 = arith.constant 0 : i32
    return %arg0, %c0_i32, %c0_i32_0 : i32, i32, i32
  }
  func.func @transform_7(%arg0: i32, %arg1: i32) -> (i32, i32) {
    %c0_i32 = arith.constant 0 : i32
    %c0_i32_0 = arith.constant 0 : i32
    %c0_i32_1 = arith.constant 0 : i32
    return %c0_i32, %c0_i32_0 : i32, i32
  }
  func.func @transform_8(%arg0: i32, %arg1: i32) -> (i32, i32) {
    %c0_i32 = arith.constant 0 : i32
    %c0_i32_0 = arith.constant 0 : i32
    %c0_i32_1 = arith.constant 0 : i32
    return %c0_i32, %c0_i32_0 : i32, i32
  }
  func.func @transform_9(%arg0: i32, %arg1: i32) -> (i32, i32) {
    %c0_i32 = arith.constant 0 : i32
    %c0_i32_0 = arith.constant 0 : i32
    %c0_i32_1 = arith.constant 0 : i32
    return %c0_i32, %c0_i32_0 : i32, i32
  }
  func.func @transform_10(%arg0: i32, %arg1: i32) -> (i32, i32) {
    %c0_i32 = arith.constant 0 : i32
    %c0_i32_0 = arith.constant 0 : i32
    %c0_i32_1 = arith.constant 0 : i32
    return %c0_i32, %c0_i32_0 : i32, i32
  }
  func.func @transform_11(%arg0: i32, %arg1: i32) -> (i32, i32, i32) {
    %c0_i32 = arith.constant 0 : i32
    %c0_i32_0 = arith.constant 0 : i32
    return %arg1, %arg0, %c0_i32 : i32, i32, i32
  }
  func.func @transform_12(%arg0: i32, %arg1: i32) -> (i32, i32, i32) {
    %c0_i32 = arith.constant 0 : i32
    %c0_i32_0 = arith.constant 0 : i32
    %c0_i32_1 = arith.constant 0 : i32
    return %c0_i32, %arg0, %c0_i32_0 : i32, i32, i32
  }
  func.func @transform_13(%arg0: i32, %arg1: i32) -> (i32, i32, i32) {
    %c0_i32 = arith.constant 0 : i32
    %c0_i32_0 = arith.constant 0 : i32
    return %arg1, %arg0, %c0_i32 : i32, i32, i32
  }
}

</mosaic_0001>

<bundles_post_ra>
// kernel: tpu_custom_call.1
= control target key start
LH: loop header
LB: loop body
LE: loop exit
PB: predicated region body
PF: predicated region fallthrough
CT: control target
= control target key end

     0   :  { %s10246_s0 = inlined_call_operand.hbm [shape: f32[4,8,128], index: 0, kind: input, shape index: {}]   ;;  %s10247_s1 = inlined_call_operand.hbm [shape: f32[4,8,128], index: 1, kind: input, shape index: {}]   ;;  %s10248_s2 = inlined_call_operand.hbm [shape: f32[384,1024], index: 2, kind: input, shape index: {}]   ;;  %s10249_s3 = inlined_call_operand.hbm [shape: f32[1,1024], index: 3, kind: input, shape index: {}]   ;;  %s10250_s4 = inlined_call_operand.hbm [shape: f32[512,1024], index: 4, kind: input, shape index: {}]   ;;  %s10251_s5 = inlined_call_operand.hbm [shape: f32[1,1024], index: 5, kind: input, shape index: {}]   ;;  %s10252_s6 = inlined_call_operand.hbm [shape: f32[8,128,128], index: 6, kind: input, shape index: {}]   ;;  %s10253_s7 = inlined_call_operand.hbm [shape: f32[256,128], index: 7, kind: input, shape index: {}]   ;;  %s10254_s8 = inlined_call_operand.hbm [shape: f32[1,128], index: 8, kind: input, shape index: {}]   ;;  %s10255_s9 = inlined_call_operand.hbm [shape: f32[128,128], index: 9, kind: input, shape index: {}]   ;;  %s10256_s10 = inlined_call_operand.hbm [shape: f32[1,128], index: 10, kind: input, shape index: {}]   ;;  %s10257_s11 = inlined_call_operand.hbm [shape: f32[4,8,128], index: 11, kind: output, shape index: {0}]   ;;  %s10258_s12 = inlined_call_operand.hbm [shape: f32[4,8,128], index: 12, kind: output, shape index: {1}]   ;;  %s10259_s13 = inlined_call_operand.hbm [shape: f32[4,8,128], index: 13, kind: output, shape index: {2}]  }
   0x1   :  { %10293 = sst [smem:[#allocation47_spill]] %s10246_s0 }
   0x2   :  { %10294 = sst [smem:[#allocation48_spill]] %s10247_s1 }
   0x3   :  { %10295 = sst [smem:[#allocation49_spill]] %s10248_s2 }
   0x4   :  { %10296 = sst [smem:[#allocation50_spill]] %s10249_s3 }
   0x5   :  { %10297 = sst [smem:[#allocation51_spill]] %s10250_s4 }
   0x6   :  { %10298 = sst [smem:[#allocation52_spill]] %s10251_s5 }
   0x7   :  { %10299 = sst [smem:[#allocation53_spill]] %s10252_s6 }
   0x8   :  { %10300 = sst [smem:[#allocation54_spill]] %s10253_s7 }
   0x9   :  { %10301 = sst [smem:[#allocation55_spill]] %s10257_s11 }
   0xa   :  { %10302 = sst [smem:[#allocation56_spill]] %s10258_s12 }
   0xb   :  { %10303 = sst [smem:[#allocation57_spill]] %s10259_s13 }
   0xc   :  { %19 = vsyncpa [#allocation3], 0 }
   0xd   :  { %21 = vsyncpa [#allocation3 + $0x1], 0 }
   0xe   :  { %22 = vsyncpa [#allocation6], 0 }
   0xf   :  { %23 = vsyncpa [#allocation9], 0 }
  0x10   :  { %24 = vsyncpa [#allocation12], 0 }
  0x11   :  { %25 = vsyncpa [#allocation15], 0 }
  0x12   :  { %26 = vsyncpa [#allocation18], 0 }
  0x13   :  { %27 = vsyncpa [#allocation4], 0 }
  0x14   :  { %29 = vsyncpa [#allocation4 + $0x1], 0 }
  0x15   :  { %30 = vsyncpa [#allocation22], 0  ;;  %s9043_s25 = smov 0   ;;  %s9045_s26 = smov 0  }
  0x16   :  { %s9047_s27 = smov 0   ;;  %s9049_s28 = smov 0  }
  0x17   :  { %s9051_s29 = smov 0   ;;  %s9053_s30 = smov 0  }
  0x18 LB: > { %10304 = sst [smem:[#allocation32_spill]] %s8939_s28  ;;  %s9074_s14 = sadd.s32 4294967295, %s8947_s30   ;;  %s8947_s30 = sphi %s9053_s30, %s36_s30   ;;  %s8943_s29 = sphi %s9051_s29, %s10388_s29   ;;  %s8939_s28 = sphi %s9049_s28, %s10387_s28   ;;  %s8935_s27 = sphi %s9047_s27, %s10386_s27   ;;  %s8931_s26 = sphi %s9045_s26, %s10385_s26   ;;  %s8927_s25 = sphi %s9043_s25, %s10384_s25  }
  0x19   : > { %10305 = sst [smem:[#allocation33_spill]] %s9074_s14  ;;  %p5773_p0 = scmp.ge.s32.totalorder %s8947_s30, 1 }
  0x1a   : > { %p10269_p1 = scmp.eq.s32.totalorder %s9074_s14, 0  ;;  %p383_p2 = scmp.lt.s32.totalorder %s8947_s30, 5 }
  0x1b   : > { %s8949_s16 = smov [#allocation5]   ;;  %s8950_s19 = smov [#allocation8]  }
  0x1c   : > { %p9079_p3 = pnand %p5773_p0, %p383_p2  ;;  %s397_s17 = sshll.u32 %s8949_s16, 4  ;;  %s9083_s17 = int_to_ptr.vmem [resolvable:$true] %s397_s17 }
  0x1d   : > { %s424_s20 = sshll.u32 %s8950_s19, 4  ;;  %s8951_s21 = smov [#allocation11]   ;;  %s9093_s20 = int_to_ptr.vmem [resolvable:$true] %s424_s20 }
  0x1e   : > { %s10306_s15 = scalar_select %p9079_p3, 1, 0 }
  0x1f   : > { %p8266_p4 = pneg %p9079_p3  ;;  %s9095_s22 = sshll.u32 %s8951_s21, 4  ;;  %s449_s22 = int_to_ptr.vmem [resolvable:$true] %s9095_s22 }
  0x20   : > { %10307 = sst [smem:[#allocation34_spill]] %s10306_s15  ;;  %s10309_s1 = sld [smem:[#allocation48_spill]] }
  0x21   : > { %p9089_p5 = pnand %p8266_p4, %p10269_p1 }
  0x23   : > { %p9105_p7 = pneg %p9089_p5 }
  0x26   : > { %s8477_s16 = scalar_lea.hbm %s10309_s1, 512 }
  0x27   : > { %p8478_p6 = scmp.ne.s32.totalorder %s10309_s1, %s8477_s16  ;;  %p8484_p10 = scmp.lt.u32.totalorder %s8477_s16, %s10309_s1 }
  0x29   : > { %p8480_p8 = pnand %p9105_p7, %p8478_p6 }
  0x2b   : > { %p8481_p9 = pneg %p8480_p8 }
  0x2d   : > { %p8486_p11 = pnand %p8484_p10, %p8481_p9 }
  0x2f   : > { %8489 = shalt.err (!%p8486_p11)
}
  0x30   : > { %s8490_s11 = scalar_lea.vmem %s9083_s17, 512  ;;  %p8498_p2 = scmp.lt.s32.totalorder %s9083_s17, %s9083_s17 }
  0x31   : > { %p8491_p12 = scmp.ne.s32.totalorder %s9083_s17, %s8490_s11  ;;  %p8499_p4 = scmp.lt.s32.totalorder %s8490_s11, %s8490_s11 }
  0x33   : > { %p8493_p13 = pnand %p8491_p12, %p9105_p7  ;;  %p8500_p6 = por %p8499_p4, %p8498_p2 }
  0x35   : > { %p8494_p0 = pneg %p8493_p13 }
  0x37   : > { %p8501_p8 = pnand %p8500_p6, %p8494_p0 }
  0x39   : > { %8504 = shalt.err (!%p8501_p8)
}
  0x3a   : > { %s10271_s13 = smov 128   ;;  %s10273_s23 = smov 8  }
  0x3b   : > { %8269 = dma.hbm_to_vmem [thread:$0]  (!%p9089_p5), %s10309_s1, 512, %s9083_s17, [#allocation6], %s10271_s13, %s10271_s13, %s10273_s23  }
  0x3c   : > { %s10311_s3 = sld [smem:[#allocation50_spill]] }
  0x42   : > { %s8505_s11 = scalar_lea.hbm %s10311_s3, 128 }
  0x43   : > { %p8506_p9 = scmp.ne.s32.totalorder %s10311_s3, %s8505_s11  ;;  %p8512_p12 = scmp.lt.u32.totalorder %s8505_s11, %s10311_s3 }
  0x45   : > { %p8508_p10 = pnand %p8506_p9, %p9105_p7 }
  0x47   : > { %p8509_p11 = pneg %p8508_p10 }
  0x49   : > { %p8514_p13 = pnand %p8512_p12, %p8509_p11 }
  0x4b   : > { %8517 = shalt.err (!%p8514_p13)
}
  0x4c   : > { %s8518_s17 = scalar_lea.vmem %s9093_s20, 128  ;;  %p8526_p6 = scmp.lt.s32.totalorder %s9093_s20, %s9093_s20 }
  0x4d   : > { %p8519_p0 = scmp.ne.s32.totalorder %s9093_s20, %s8518_s17  ;;  %p8527_p8 = scmp.lt.s32.totalorder %s8518_s17, %s8518_s17 }
  0x4f   : > { %p8521_p2 = pnand %p8519_p0, %p9105_p7  ;;  %p8528_p9 = por %p8527_p8, %p8526_p6 }
  0x51   : > { %p8522_p4 = pneg %p8521_p2 }
  0x53   : > { %p8529_p10 = pnand %p8528_p9, %p8522_p4 }
  0x55   : > { %8532 = shalt.err (!%p8529_p10)
}
  0x56   : > { %8275 = dma.hbm_to_vmem [thread:$0]  (!%p9089_p5), %s10311_s3, 128, %s9093_s20, [#allocation9]  }
  0x57   : > { %s10312_s5 = sld [smem:[#allocation52_spill]] }
  0x5d   : > { %s8533_s24 = scalar_lea.hbm %s10312_s5, 128 }
  0x5e   : > { %p8534_p11 = scmp.ne.s32.totalorder %s10312_s5, %s8533_s24  ;;  %p8540_p0 = scmp.lt.u32.totalorder %s8533_s24, %s10312_s5 }
  0x60   : > { %p8536_p12 = pnand %p8534_p11, %p9105_p7 }
  0x62   : > { %p8537_p13 = pneg %p8536_p12 }
  0x64   : > { %p8542_p2 = pnand %p8540_p0, %p8537_p13 }
  0x66   : > { %8545 = shalt.err (!%p8542_p2)
}
  0x67   : > { %s8546_s17 = scalar_lea.vmem %s449_s22, 128  ;;  %p8554_p9 = scmp.lt.s32.totalorder %s449_s22, %s449_s22 }
  0x68   : > { %p8547_p4 = scmp.ne.s32.totalorder %s449_s22, %s8546_s17  ;;  %p8555_p10 = scmp.lt.s32.totalorder %s8546_s17, %s8546_s17 }
  0x6a   : > { %p8549_p6 = pnand %p8547_p4, %p9105_p7  ;;  %p8556_p1 = por %p8555_p10, %p8554_p9 }
  0x6c   : > { %p8550_p8 = pneg %p8549_p6 }
  0x6e   : > { %p8557_p3 = pnand %p8556_p1, %p8550_p8 }
  0x70   : > { %8560 = shalt.err (!%p8557_p3)
}
  0x71   : > { %8281 = dma.hbm_to_vmem [thread:$0]  (!%p9089_p5), %s10312_s5, 128, %s449_s22, [#allocation12]  }
  0x72   : > { %s8954_s28 = smov [#allocation14]   ;;  %s8955_s15 = smov [#allocation17]  }
  0x73   : > { %s475_s14 = sshll.u32 %s8954_s28, 4  ;;  %s499_s24 = sshll.u32 %s8955_s15, 4  ;;  %s476_s14 = int_to_ptr.vmem [resolvable:$true] %s475_s14  ;;  %s500_s24 = int_to_ptr.vmem [resolvable:$true] %s499_s24 }
  0x74   : > { %s10313_s7 = sld [smem:[#allocation54_spill]] }
  0x7a   : > { %s8561_s21 = scalar_lea.hbm %s10313_s7, 4096 }
  0x7b   : > { %p8562_p1 = scmp.ne.s32.totalorder %s10313_s7, %s8561_s21  ;;  %p8568_p12 = scmp.lt.u32.totalorder %s8561_s21, %s10313_s7 }
  0x7d   : > { %p8564_p3 = pnand %p8562_p1, %p9105_p7 }
  0x7f   : > { %p8565_p11 = pneg %p8564_p3 }
  0x81   : > { %p8570_p13 = pnand %p8568_p12, %p8565_p11 }
  0x83   : > { %8573 = shalt.err (!%p8570_p13)
}
  0x84   : > { %s8574_s22 = scalar_lea.vmem %s476_s14, 4096  ;;  %p8582_p6 = scmp.lt.s32.totalorder %s476_s14, %s476_s14 }
  0x85   : > { %p8575_p0 = scmp.ne.s32.totalorder %s476_s14, %s8574_s22  ;;  %p8583_p8 = scmp.lt.s32.totalorder %s8574_s22, %s8574_s22 }
  0x87   : > { %p8577_p2 = pnand %p8575_p0, %p9105_p7  ;;  %p8584_p9 = por %p8583_p8, %p8582_p6 }
  0x89   : > { %p8578_p4 = pneg %p8577_p2 }
  0x8b   : > { %p8585_p10 = pnand %p8584_p9, %p8578_p4 }
  0x8d   : > { %8588 = shalt.err (!%p8585_p10)
}
  0x8e   : > { %s10314_s0 = smov 128   ;;  %s8589_s19 = scalar_lea.hbm %s10255_s9, 2048 }
  0x8f   : > { %8287 = dma.hbm_to_vmem [thread:$0]  (!%p9089_p5), %s10313_s7, 4096, %s476_s14, [#allocation15], %s10314_s0, %s10314_s0, %s10273_s23  }
  0x90   : > { %p8590_p1 = scmp.ne.s32.totalorder %s10255_s9, %s8589_s19  ;;  %p8596_p12 = scmp.lt.u32.totalorder %s8589_s19, %s10255_s9 }
  0x92   : > { %p8592_p3 = pnand %p8590_p1, %p9105_p7 }
  0x94   : > { %p8593_p11 = pneg %p8592_p3 }
  0x96   : > { %p8598_p13 = pnand %p8596_p12, %p8593_p11 }
  0x98   : > { %8601 = shalt.err (!%p8598_p13)
}
  0x99   : > { %s8602_s22 = scalar_lea.vmem %s500_s24, 2048  ;;  %p8610_p6 = scmp.lt.s32.totalorder %s500_s24, %s500_s24 }
  0x9a   : > { %p8603_p0 = scmp.ne.s32.totalorder %s500_s24, %s8602_s22  ;;  %p8611_p8 = scmp.lt.s32.totalorder %s8602_s22, %s8602_s22 }
  0x9c   : > { %p8605_p2 = pnand %p8603_p0, %p9105_p7  ;;  %p8612_p9 = por %p8611_p8, %p8610_p6 }
  0x9e   : > { %p8606_p4 = pneg %p8605_p2 }
  0xa0   : > { %p8613_p10 = pnand %p8612_p9, %p8606_p4 }
  0xa2   : > { %8616 = shalt.err (!%p8613_p10)
}
  0xa3   : > { %8293 = dma.hbm_to_vmem [thread:$0]  (!%p9089_p5), %s10255_s9, 2048, %s500_s24, [#allocation18], %s10314_s0, %s10314_s0, %s10273_s23  }
  0xa4   : > { %s8956_s28 = smov [#allocation7]   ;;  %s10315_s2 = sld [smem:[#allocation49_spill]] }
  0xa5   : > { %s410_s15 = sshll.u32 %s8956_s28, 4  ;;  %s411_s15 = int_to_ptr.vmem [resolvable:$true] %s410_s15 }
  0xaa   : > { %s8617_s21 = scalar_lea.hbm %s10315_s2, 49152 }
  0xab   : > { %p8618_p1 = scmp.ne.s32.totalorder %s10315_s2, %s8617_s21  ;;  %p8624_p12 = scmp.lt.u32.totalorder %s8617_s21, %s10315_s2 }
  0xad   : > { %p8620_p3 = pnand %p8618_p1, %p9105_p7 }
  0xaf   : > { %p8621_p11 = pneg %p8620_p3 }
  0xb1   : > { %p8626_p13 = pnand %p8624_p12, %p8621_p11 }
  0xb3   : > { %8629 = shalt.err (!%p8626_p13)
}
  0xb4   : > { %s8630_s24 = scalar_lea.vmem %s411_s15, 49152  ;;  %p8638_p6 = scmp.lt.s32.totalorder %s411_s15, %s411_s15 }
  0xb5   : > { %p8631_p0 = scmp.ne.s32.totalorder %s411_s15, %s8630_s24  ;;  %p8639_p8 = scmp.lt.s32.totalorder %s8630_s24, %s8630_s24 }
  0xb7   : > { %p8633_p2 = pnand %p8631_p0, %p9105_p7  ;;  %p8640_p9 = por %p8639_p8, %p8638_p6 }
  0xb9   : > { %p8634_p4 = pneg %p8633_p2 }
  0xbb   : > { %p8641_p10 = pnand %p8640_p9, %p8634_p4 }
  0xbd   : > { %8644 = shalt.err (!%p8641_p10)
}
  0xbe   : > { %s8957_s14 = smov 1024   ;;  %s8958_s13 = smov 64  }
  0xbf   : > { %8272 = dma.hbm_to_vmem [thread:$0]  (!%p9089_p5), %s10315_s2, 49152, %s411_s15, [#allocation6], %s8957_s14, %s8957_s14, %s8958_s13  }
  0xc0   : > { %s8959_s19 = smov [#allocation10]   ;;  %s8960_s11 = smov [#allocation13]  }
  0xc1   : > { %s434_s21 = sshll.u32 %s8959_s19, 4  ;;  %s462_s17 = sshll.u32 %s8960_s11, 4  ;;  %s435_s21 = int_to_ptr.vmem [resolvable:$true] %s434_s21  ;;  %s9231_s17 = int_to_ptr.vmem [resolvable:$true] %s462_s17 }
  0xc2   : > { %s10316_s4 = sld [smem:[#allocation51_spill]] }
  0xc8   : > { %s8645_s24 = scalar_lea.hbm %s10316_s4, 65536 }
  0xc9   : > { %p8646_p1 = scmp.ne.s32.totalorder %s10316_s4, %s8645_s24  ;;  %p8652_p12 = scmp.lt.u32.totalorder %s8645_s24, %s10316_s4 }
  0xcb   : > { %p8648_p3 = pnand %p8646_p1, %p9105_p7 }
  0xcd   : > { %p8649_p11 = pneg %p8648_p3 }
  0xcf   : > { %p8654_p13 = pnand %p8652_p12, %p8649_p11 }
  0xd1   : > { %8657 = shalt.err (!%p8654_p13)
}
  0xd2   : > { %s8658_s16 = scalar_lea.vmem %s435_s21, 65536  ;;  %p8666_p6 = scmp.lt.s32.totalorder %s435_s21, %s435_s21 }
  0xd3   : > { %p8659_p0 = scmp.ne.s32.totalorder %s435_s21, %s8658_s16  ;;  %p8667_p8 = scmp.lt.s32.totalorder %s8658_s16, %s8658_s16 }
  0xd5   : > { %p8661_p2 = pnand %p8659_p0, %p9105_p7  ;;  %p8668_p9 = por %p8667_p8, %p8666_p6 }
  0xd7   : > { %p8662_p4 = pneg %p8661_p2 }
  0xd9   : > { %p8669_p10 = pnand %p8668_p9, %p8662_p4 }
  0xdb   : > { %8672 = shalt.err (!%p8669_p10)
}
  0xdc   : > { %8278 = dma.hbm_to_vmem [thread:$0]  (!%p9089_p5), %s10316_s4, 65536, %s435_s21, [#allocation9], %s8957_s14, %s8957_s14, %s8958_s13  }
  0xdd   : > { %s10317_s6 = sld [smem:[#allocation53_spill]] }
  0xe3   : > { %s8673_s20 = scalar_lea.hbm %s10317_s6, 16384 }
  0xe4   : > { %p8674_p1 = scmp.ne.s32.totalorder %s10317_s6, %s8673_s20  ;;  %p8680_p12 = scmp.lt.u32.totalorder %s8673_s20, %s10317_s6 }
  0xe6   : > { %p8676_p3 = pnand %p8674_p1, %p9105_p7 }
  0xe8   : > { %p8677_p11 = pneg %p8676_p3 }
  0xea   : > { %p8682_p13 = pnand %p8680_p12, %p8677_p11 }
  0xec   : > { %8685 = shalt.err (!%p8682_p13)
}
  0xed   : > { %s8686_s14 = scalar_lea.vmem %s9231_s17, 16384  ;;  %p8694_p6 = scmp.lt.s32.totalorder %s9231_s17, %s9231_s17 }
  0xee   : > { %p8687_p0 = scmp.ne.s32.totalorder %s9231_s17, %s8686_s14  ;;  %p8695_p8 = scmp.lt.s32.totalorder %s8686_s14, %s8686_s14 }
  0xf0   : > { %p8689_p2 = pnand %p8687_p0, %p9105_p7  ;;  %p8696_p9 = por %p8695_p8, %p8694_p6 }
  0xf2   : > { %p8690_p4 = pneg %p8689_p2 }
  0xf4   : > { %p8697_p10 = pnand %p8696_p9, %p8690_p4 }
  0xf6   : > { %8700 = shalt.err (!%p8697_p10)
}
  0xf7   : > { %s10318_s13 = smov 8   ;;  %s8961_s1 = smov [#allocation16]  }
  0xf8   : > { %8284 = dma.hbm_to_vmem [thread:$0]  (!%p9089_p5), %s10317_s6, 16384, %s9231_s17, [#allocation12], %s10314_s0, %s10314_s0, %s10318_s13  }
  0xf9   : > { %s489_s23 = sshll.u32 %s8961_s1, 4  ;;  %s8962_s19 = smov [#allocation19]   ;;  %s490_s23 = int_to_ptr.vmem [resolvable:$true] %s489_s23 }
  0xfa   : > { %s513_s11 = sshll.u32 %s8962_s19, 4  ;;  %s8701_s24 = scalar_lea.hbm %s10254_s8, 16  ;;  %s9277_s11 = int_to_ptr.vmem [resolvable:$true] %s513_s11 }
  0xfb   : > { %p8702_p1 = scmp.ne.s32.totalorder %s10254_s8, %s8701_s24  ;;  %p8708_p12 = scmp.lt.u32.totalorder %s8701_s24, %s10254_s8 }
  0xfd   : > { %p8704_p3 = pnand %p8702_p1, %p9105_p7 }
  0xff   : > { %p8705_p11 = pneg %p8704_p3 }
 0x101   : > { %p8710_p13 = pnand %p8708_p12, %p8705_p11 }
 0x103   : > { %8713 = shalt.err (!%p8710_p13)
}
 0x104   : > { %s8714_s17 = scalar_lea.vmem %s490_s23, 16  ;;  %s8721_s13 = scalar_lea.vmem %s490_s23, 32 }
 0x105   : > { %p8715_p0 = scmp.ne.s32.totalorder %s490_s23, %s8714_s17  ;;  %p8722_p6 = scmp.lt.s32.totalorder %s490_s23, %s490_s23 }
 0x106   : > { %p8723_p8 = scmp.lt.s32.totalorder %s8721_s13, %s8714_s17 }
 0x107   : > { %p8717_p2 = pnand %p8715_p0, %p9105_p7 }
 0x108   : > { %p8724_p9 = por %p8723_p8, %p8722_p6 }
 0x109   : > { %p8718_p4 = pneg %p8717_p2 }
 0x10b   : > { %p8725_p10 = pnand %p8724_p9, %p8718_p4 }
 0x10d   : > { %8728 = shalt.err (!%p8725_p10)
}
 0x10e   : > { %8290 = dma.hbm_to_vmem [thread:$0]  (!%p9089_p5), %s10254_s8, 16, %s490_s23, [#allocation15]  }
 0x10f   : > { %s8729_s20 = scalar_lea.hbm %s10256_s10, 16 }
 0x110   : > { %p8730_p1 = scmp.ne.s32.totalorder %s10256_s10, %s8729_s20  ;;  %p8736_p12 = scmp.lt.u32.totalorder %s8729_s20, %s10256_s10 }
 0x112   : > { %p8732_p3 = pnand %p8730_p1, %p9105_p7 }
 0x114   : > { %p8733_p11 = pneg %p8732_p3 }
 0x116   : > { %p8738_p13 = pnand %p8736_p12, %p8733_p11 }
 0x118   : > { %8741 = shalt.err (!%p8738_p13)
}
 0x119   : > { %s8742_s23 = scalar_lea.vmem %s9277_s11, 16  ;;  %s8749_s14 = scalar_lea.vmem %s9277_s11, 32 }
 0x11a   : > { %p8743_p0 = scmp.ne.s32.totalorder %s9277_s11, %s8742_s23  ;;  %p8750_p6 = scmp.lt.s32.totalorder %s9277_s11, %s9277_s11 }
 0x11b   : > { %p8751_p8 = scmp.lt.s32.totalorder %s8749_s14, %s8742_s23 }
 0x11c   : > { %p8745_p2 = pnand %p8743_p0, %p9105_p7 }
 0x11d   : > { %p8752_p9 = por %p8751_p8, %p8750_p6 }
 0x11e   : > { %p8746_p4 = pneg %p8745_p2 }
 0x120   : > { %p8753_p10 = pnand %p8752_p9, %p8746_p4 }
 0x122   : > { %8756 = shalt.err (!%p8753_p10)
}
 0x123   : > { %s10319_s12 = sld [smem:[#allocation33_spill]]  ;;  %s10274_s18 = sadd.s32 4294967294, %s8947_s30  }
 0x124   : > { %8296 = dma.hbm_to_vmem [thread:$0]  (!%p9089_p5), %s10256_s10, 16, %s9277_s11, [#allocation18]  }
 0x125   : > { %s45_s13 = sadd.s32 1, %s8943_s29  ;;  %s57_s21 = sadd.s32 1, %s8935_s27 }
 0x126   : > { %p46_p7 = scmp.ge.s32.totalorder %s45_s13, 4  ;;  %p64_p1 = scmp.ne.s32.totalorder %s8935_s27, %s8931_s26 }
 0x127   : > { %p65_p3 = scmp.eq.s32.totalorder %s8947_s30, 0  ;;  %p70_p12 = scmp.ne.s32.totalorder %s8931_s26, %s8927_s25 }
 0x128   : > { %s10390_s13 = smov (%p46_p7, %s45_s13), 0  ;;  %p322_p6 = scmp.eq.s32.totalorder %s10274_s18, 3 }
 0x129   : > { %p9329_p11 = por %p65_p3, %p64_p1  ;;  %s52_s11 = ssub.s32 %s8943_s29, %s10390_s13 }
 0x12a   : > { %p10275_p5 = scmp.eq.s32.totalorder %s10319_s12, 3  ;;  %p55_p13 = scmp.eq.s32.totalorder %s52_s11, 0 }
 0x12b   : > { %p10321_p0 = scmp.eq.s32.totalorder %s10319_s12, 0  ;;  %p9355_p8 = por %p322_p6, %p70_p12 }
 0x12c   : > { %p9346_p4 = por %p10275_p5, %p64_p1  ;;  %p8318_p9 = scmp.lt.s32.totalorder %s8947_s30, 4 }
 0x12d   : > { %p9340_p2 = por %p10321_p0, %p70_p12  ;;  %s524_s22 = sand.u32 1, %s8935_s27  }
 0x12e   : > { %s10323_s19 = scalar_select %p9346_p4, 1, 0 }
 0x12f   : > { %s9353_s20 = scalar_select %p55_p13, %s8935_s27, %s57_s21  }
 0x130   : > { %s10324_s25 = scalar_select %p9355_p8, 1, 0 }
 0x131   : > { %s5786_s24 = sshll.u32 %s8943_s29, 7  ;;  %s5785_s28 = sshll.u32 %s524_s22, 3 }
 0x132   : > { %s10325_s14 = sld [smem:[#allocation47_spill]]  ;;  %s528_s17 = scalar_lea.vmem [#allocation2], %s5785_s28 }
 0x133   : > { %s536_s12 = sshll.u32 %s528_s17, 4  ;;  %p9369_p10 = pnand %p8318_p9, %p9329_p11  ;;  %s9373_s12 = int_to_ptr.vmem [resolvable:$true] %s536_s12 }
 0x134   : > { %s525_s11 = scalar_lea.sflag [#allocation3], %s524_s22 }
 0x135   : > { %p8759_p1 = pneg %p9369_p10 }
 0x138   : > { %s9365_s0 = scalar_lea.hbm %s10325_s14, %s5786_s24  ;;  %s8762_s16 = scalar_lea.hbm %s10325_s14, 512 }
 0x139   : > { %s8757_s18 = scalar_lea.hbm %s9365_s0, 128  ;;  %p8763_p11 = scmp.lt.u32.totalorder %s9365_s0, %s10325_s14 }
 0x13a   : > { %p8758_p7 = scmp.ne.s32.totalorder %s9365_s0, %s8757_s18  ;;  %p8764_p13 = scmp.lt.u32.totalorder %s8762_s16, %s8757_s18 }
 0x13b   : > { %p8766_p6 = scmp.lt.u32.totalorder %s8757_s18, %s9365_s0 }
 0x13c   : > { %p8760_p3 = pnand %p8759_p1, %p8758_p7  ;;  %p8765_p0 = por %p8764_p13, %p8763_p11 }
 0x13e   : > { %p8761_p12 = pneg %p8760_p3  ;;  %p8767_p9 = por %p8766_p6, %p8765_p0 }
 0x140   : > { %p8768_p5 = pnand %p8767_p9, %p8761_p12 }
 0x142   : > { %8771 = shalt.err (!%p8768_p5)
}
 0x143   : > { %s8772_s22 = scalar_lea.vmem %s9373_s12, 128  ;;  %s8963_s17 = smov [#allocation2]  }
 0x144   : > { %p8773_p7 = scmp.ne.s32.totalorder %s9373_s12, %s8772_s22  ;;  %s8777_s24 = sshll.u32 %s8963_s17, 4  ;;  %s8778_s24 = int_to_ptr.vmem [resolvable:$false] %s8777_s24 }
 0x145   : > { %s8779_s28 = scalar_lea.vmem %s8778_s24, 256  ;;  %p8780_p4 = scmp.lt.s32.totalorder %s9373_s12, %s8778_s24 }
 0x146   : > { %p8775_p3 = pnand %p8773_p7, %p8759_p1  ;;  %p8781_p11 = scmp.lt.s32.totalorder %s8779_s28, %s8772_s22 }
 0x148   : > { %p8776_p8 = pneg %p8775_p3  ;;  %p8782_p13 = por %p8781_p11, %p8780_p4 }
 0x14a   : > { %p8783_p0 = pnand %p8782_p13, %p8776_p8 }
 0x14c   : > { %8786 = shalt.err (!%p8783_p0)
}
 0x14d   : > { %8300 = dma.hbm_to_vmem [thread:$0]  (!%p9369_p10), %s9365_s0, 128, %s9373_s12, %s525_s11  }
 0x14e   : > { %s10327_s18 = sld [smem:[#allocation34_spill]] }
 0x154   : > { %p10328_p5 = scmp.ne.s32.totalorder %s10327_s18, 0 }
 0x156   : > { %545 = sbr.rel (%p10328_p5) target bundleno = 2720 (0xaa0), region = 64 }
 0x15d   : > { %s547_s16 = sand.u32 1, %s8931_s26  }
 0x15e   : > { %s9403_s15 = sshll.u32 %s547_s16, 3  ;;  %s548_s23 = scalar_lea.sflag [#allocation3], %s547_s16 }
 0x15f   : > { %s551_s17 = scalar_lea.vmem [#allocation2], %s9403_s15 }
 0x160   : > { %8894 = dma.done.wait (%p9340_p2), %s548_s23, 128  }
 0x161   : > { %8896 = vsyncadd (%p9340_p2), %s548_s23, 4294967168  ;;  %s10329_s21 = sld [smem:[#allocation33_spill]] }
 0x167   : > { %p10330_p4 = scmp.eq.s32.totalorder %s10329_s21, 0 }
 0x169   : > { %8898 = dma.done.wait (%p10330_p4), [#allocation6], 49664   ;;  %p10331_p8 = pmov %p10330_p4 }
 0x16a   : > { %p10332_p10 = pmov %p10330_p4 }
 0x16b   : > { %8900 = vsyncadd (%p10331_p8), [#allocation6], 4294917632 }
 0x16c   : > { %8902 = dma.done.wait (%p10332_p10), [#allocation9], 65664   ;;  %p10333_p1 = pmov %p10330_p4 }
 0x16e   : > { %8904 = vsyncadd (%p10333_p1), [#allocation9], 4294901632  ;;  %p10334_p12 = pmov %p10333_p1 }
 0x16f   : > { %p10335_p6 = pmov %p10333_p1 }
 0x170   : > { %8906 = dma.done.wait (%p10334_p12), [#allocation12], 16512  }
 0x171   : > { %8908 = vsyncadd (%p10335_p6), [#allocation12], 4294950784  ;;  %p10336_p2 = pmov %p10333_p1 }
 0x172   : > { %p10337_p9 = pmov %p10333_p1 }
 0x173   : > { %8910 = dma.done.wait (%p10336_p2), [#allocation15], 4112  }
 0x174   : > { %8912 = vsyncadd (%p10337_p9), [#allocation15], 4294963184  ;;  %p10338_p7 = pmov %p10333_p1 }
 0x175   : > { %p10339_p3 = pmov %p10333_p1 }
 0x176   : > { %8914 = dma.done.wait (%p10338_p7), [#allocation18], 2064  }
 0x177   : > { %8916 = vsyncadd (%p10339_p3), [#allocation18], 4294965232  ;;  %s10292_s0 = scalar_lea.vmem [#allocation23], %s9403_s15  ;;  %s10340_s12 = sld [smem:[#allocation32_spill]] }
 0x17d   : > { %p5801_p11 = scmp.ne.s32.totalorder %s10340_s12, 0 }
 0x17e   : > { %v644_v0 = vld [vmem:[#allocation5] sm:$0xff] (!%p5801_p11)  ;;  %v645_v1 = vld [vmem:[#allocation5 + $0x8] sm:$0xff] (!%p5801_p11)  ;;  %v646_v2 = vld [vmem:[#allocation5 + $0x10] sm:$0xff] (!%p5801_p11) }
 0x17f   : > { %643 = sbr.rel (%p5801_p11) target bundleno = 390 (0x186), region = 112  ;;  %648 = vst [vmem:[#allocation21] sm:$0xff] (!%p5801_p11), %v644_v0  ;;  %649 = vst [vmem:[#allocation21 + $0x8] sm:$0xff] (!%p5801_p11), %v645_v1  ;;  %v647_v3 = vld [vmem:[#allocation5 + $0x18] sm:$0xff] (!%p5801_p11) }
 0x180   : > { %650 = vst [vmem:[#allocation21 + $0x10] sm:$0xff] (!%p5801_p11), %v646_v2  ;;  %651 = vst [vmem:[#allocation21 + $0x18] sm:$0xff] (!%p5801_p11), %v647_v3 }
 0x186 PF: > { %v658_v4 = vld [vmem:[#allocation7 + $0x8] sm:$0xff]  ;;  %v660_v6 = vld [vmem:[#allocation7 + $0x18] sm:$0xff]  ;;  %v657_v9 = vld [vmem:[#allocation7] sm:$0xff]  ;;  %v10278_v11 = vmov 0.0   ;;  %vm8966_vm0 = vmmov 0   ;;  %vm4522_vm2 = vcmask 1040384  }
 0x187   : > { %v666_v5 = vld [vmem:[#allocation7 + $0x48] sm:$0xff]  ;;  %v668_v8 = vld [vmem:[#allocation7 + $0x58] sm:$0xff]  ;;  %v665_v10 = vld [vmem:[#allocation7 + $0x40] sm:$0xff]  ;;  %849 = vmatprep.mubr.f32.mxu0 %v10278_v11  ;;  %920 = vmatprep.mubr.f32.mxu1 %v10278_v11  ;;  %vm4620_vm3 = vcmask 1041409   ;;  %vm4623_vm4 = vcmask 1042434   ;;  %vm4626_vm5 = vcmask 1043459  }
 0x188   : > { %v6808_v7 = vpack.c.bf16 %v666_v5, %v658_v4  ;;  %v6840_v12 = vpack.c.bf16 %v668_v8, %v660_v6  ;;  %v6810_v13 = vpack.c.bf16 %v665_v10, %v657_v9  ;;  %v659_v14 = vld [vmem:[#allocation7 + $0x10] sm:$0xff]  ;;  %v674_v16 = vld [vmem:[#allocation7 + $0x88] sm:$0xff]  ;;  %v676_v19 = vld [vmem:[#allocation7 + $0x98] sm:$0xff]  ;;  %vm4629_vm6 = vcmask 1044484   ;;  %s10367_s11 = sld [smem:[#allocation33_spill]]  ;;  %s8968_s22 = smov [#allocation21]  }
 0x189   : > { %v667_v15 = vld [vmem:[#allocation7 + $0x50] sm:$0xff]  ;;  %v682_v18 = vld [vmem:[#allocation7 + $0xc8] sm:$0xff]  ;;  %v684_v20 = vld [vmem:[#allocation7 + $0xd8] sm:$0xff]  ;;  %vm4632_vm7 = vcmask 1045509   ;;  %vm4635_vm8 = vcmask 1046534   ;;  %vm4638_vm9 = vcmask 1047559  }
 0x18a   : > { %6809 = vmatprep.subr.bf16.mxu0 %v6808_v7  ;;  %v6842_v17 = vpack.c.bf16 %v667_v15, %v659_v14  ;;  %6841 = vmatprep.subr.bf16.mxu1 %v6840_v12  ;;  %v6812_v21 = vpack.c.bf16 %v682_v18, %v674_v16  ;;  %v6844_v22 = vpack.c.bf16 %v684_v20, %v676_v19  ;;  %v673_v23 = vld [vmem:[#allocation7 + $0x80] sm:$0xff]  ;;  %v675_v25 = vld [vmem:[#allocation7 + $0x90] sm:$0xff]  ;;  %v690_v28 = vld [vmem:[#allocation7 + $0x108] sm:$0xff]  ;;  %s5532_s24 = sshll.u32 %s8968_s22, 4  ;;  %s5533_s24 = int_to_ptr.vmem [resolvable:$true] %s5532_s24 }
 0x18b   : > { %6811 = vmatpush1.bf16.msra.mxu0 %v6810_v13  ;;  %v681_v24 = vld [vmem:[#allocation7 + $0xc0] sm:$0xff]  ;;  %v683_v27 = vld [vmem:[#allocation7 + $0xd0] sm:$0xff]  ;;  %v698_v29 = vld [vmem:[#allocation7 + $0x148] sm:$0xff]  ;;  %s8787_s28 = scalar_lea.vmem %s5533_s24, 512  ;;  %p8794_p8 = scmp.lt.s32.totalorder %s5533_s24, %s5533_s24 }
 0x18c   : > { %6843 = vmatpush1.bf16.msra.mxu1 %v6842_v17  ;;  %v6814_v26 = vpack.c.bf16 %v681_v24, %v673_v23  ;;  %6813 = vmatprep.subr.bf16.mxu0 %v6812_v21  ;;  %v6846_v30 = vpack.c.bf16 %v683_v27, %v675_v25  ;;  %v6816_v31 = vpack.c.bf16 %v698_v29, %v690_v28  ;;  %v692_v32 = vld [vmem:[#allocation7 + $0x118] sm:$0xff]  ;;  %v689_v34 = vld [vmem:[#allocation7 + $0x100] sm:$0xff]  ;;  %v691_v37 = vld [vmem:[#allocation7 + $0x110] sm:$0xff]  ;;  %p8788_p13 = scmp.ne.s32.totalorder %s5533_s24, %s8787_s28  ;;  %p8795_p10 = scmp.lt.s32.totalorder %s8787_s28, %s8787_s28 }
 0x18d   : > { %6845 = vmatprep.subr.bf16.mxu1 %v6844_v22  ;;  %v700_v33 = vld [vmem:[#allocation7 + $0x158] sm:$0xff]  ;;  %v697_v36 = vld [vmem:[#allocation7 + $0x140] sm:$0xff]  ;;  %v699_v38 = vld [vmem:[#allocation7 + $0x150] sm:$0xff] }
 0x18e   : > { %v6848_v35 = vpack.c.bf16 %v700_v33, %v692_v32  ;;  %v6818_v39 = vpack.c.bf16 %v697_v36, %v689_v34  ;;  %v706_v40 = vld [vmem:[#allocation7 + $0x188] sm:$0xff]  ;;  %v708_v42 = vld [vmem:[#allocation7 + $0x198] sm:$0xff]  ;;  %v6850_v43 = vpack.c.bf16 %v699_v38, %v691_v37  ;;  %v705_v46 = vld [vmem:[#allocation7 + $0x180] sm:$0xff]  ;;  %p10368_p0 = scmp.eq.s32.totalorder %s10367_s11, 3  ;;  %p8796_p1 = por %p8795_p10, %p8794_p8 }
 0x18f   : > { %6815 = vmatpush1.bf16.msra.mxu0 %v6814_v26  ;;  %v714_v41 = vld [vmem:[#allocation7 + $0x1c8] sm:$0xff]  ;;  %v716_v45 = vld [vmem:[#allocation7 + $0x1d8] sm:$0xff]  ;;  %v713_v47 = vld [vmem:[#allocation7 + $0x1c0] sm:$0xff] }
 0x190   : > { %6847 = vmatpush1.bf16.msra.mxu1 %v6846_v30  ;;  %6817 = vmatprep.subr.bf16.mxu0 %v6816_v31  ;;  %v6820_v44 = vpack.c.bf16 %v714_v41, %v706_v40  ;;  %v6852_v48 = vpack.c.bf16 %v716_v45, %v708_v42  ;;  %v707_v49 = vld [vmem:[#allocation7 + $0x190] sm:$0xff]  ;;  %v722_v51 = vld [vmem:[#allocation7 + $0x208] sm:$0xff]  ;;  %v724_v53 = vld [vmem:[#allocation7 + $0x218] sm:$0xff]  ;;  %v6822_v55 = vpack.c.bf16 %v713_v47, %v705_v46  ;;  %p8789_p5 = pnand %p8788_p13, %p10368_p0 }
 0x191   : > { %6849 = vmatprep.subr.bf16.mxu1 %v6848_v35  ;;  %v715_v50 = vld [vmem:[#allocation7 + $0x1d0] sm:$0xff]  ;;  %v730_v52 = vld [vmem:[#allocation7 + $0x248] sm:$0xff]  ;;  %v732_v54 = vld [vmem:[#allocation7 + $0x258] sm:$0xff] }
 0x192   : > { %v6854_v56 = vpack.c.bf16 %v715_v50, %v707_v49  ;;  %v6824_v57 = vpack.c.bf16 %v730_v52, %v722_v51  ;;  %v721_v58 = vld [vmem:[#allocation7 + $0x200] sm:$0xff]  ;;  %v723_v60 = vld [vmem:[#allocation7 + $0x210] sm:$0xff]  ;;  %v6856_v61 = vpack.c.bf16 %v732_v54, %v724_v53  ;;  %v738_v63 = vld [vmem:[#allocation7 + $0x288] sm:$0xff]  ;;  %p8790_p4 = pneg %p8789_p5 }
 0x193   : > { %6819 = vmatpush1.bf16.msra.mxu0 %v6818_v39  ;;  %v729_v59 = vld [vmem:[#allocation7 + $0x240] sm:$0xff]  ;;  %v731_v62 = vld [vmem:[#allocation7 + $0x250] sm:$0xff]  ;;  %v746_v0 = vld [vmem:[#allocation7 + $0x2c8] sm:$0xff] }
 0x194   : > { %6851 = vmatpush1.bf16.msra.mxu1 %v6850_v43  ;;  %6821 = vmatprep.subr.bf16.mxu0 %v6820_v44  ;;  %v740_v1 = vld [vmem:[#allocation7 + $0x298] sm:$0xff]  ;;  %v6826_v3 = vpack.c.bf16 %v729_v59, %v721_v58  ;;  %v6858_v4 = vpack.c.bf16 %v731_v62, %v723_v60  ;;  %v6828_v5 = vpack.c.bf16 %v746_v0, %v738_v63  ;;  %v737_v6 = vld [vmem:[#allocation7 + $0x280] sm:$0xff]  ;;  %v739_v8 = vld [vmem:[#allocation7 + $0x290] sm:$0xff]  ;;  %p8797_p12 = pnand %p8796_p1, %p8790_p4 }
 0x195   : > { %6853 = vmatprep.subr.bf16.mxu1 %v6852_v48  ;;  %v748_v2 = vld [vmem:[#allocation7 + $0x2d8] sm:$0xff]  ;;  %v745_v7 = vld [vmem:[#allocation7 + $0x2c0] sm:$0xff]  ;;  %v747_v10 = vld [vmem:[#allocation7 + $0x2d0] sm:$0xff] }
 0x196   : > { %v6860_v9 = vpack.c.bf16 %v748_v2, %v740_v1  ;;  %v754_v12 = vld [vmem:[#allocation7 + $0x308] sm:$0xff]  ;;  %v756_v14 = vld [vmem:[#allocation7 + $0x318] sm:$0xff]  ;;  %v6830_v16 = vpack.c.bf16 %v745_v7, %v737_v6  ;;  %v6862_v17 = vpack.c.bf16 %v747_v10, %v739_v8  ;;  %v753_v19 = vld [vmem:[#allocation7 + $0x300] sm:$0xff] }
 0x197   : > { %6823 = vmatpush1.bf16.msra.mxu0 %v6822_v55  ;;  %v762_v13 = vld [vmem:[#allocation7 + $0x348] sm:$0xff]  ;;  %v764_v15 = vld [vmem:[#allocation7 + $0x358] sm:$0xff]  ;;  %v761_v20 = vld [vmem:[#allocation7 + $0x340] sm:$0xff] }
 0x198   : > { %6855 = vmatpush1.bf16.msra.mxu1 %v6854_v56  ;;  %6825 = vmatprep.subr.bf16.mxu0 %v6824_v57  ;;  %v6832_v18 = vpack.c.bf16 %v762_v13, %v754_v12  ;;  %v755_v21 = vld [vmem:[#allocation7 + $0x310] sm:$0xff]  ;;  %v6864_v22 = vpack.c.bf16 %v764_v15, %v756_v14  ;;  %v770_v24 = vld [vmem:[#allocation7 + $0x388] sm:$0xff]  ;;  %v772_v26 = vld [vmem:[#allocation7 + $0x398] sm:$0xff]  ;;  %v6834_v28 = vpack.c.bf16 %v761_v20, %v753_v19 }
 0x199   : > { %6857 = vmatprep.subr.bf16.mxu1 %v6856_v61  ;;  %v763_v23 = vld [vmem:[#allocation7 + $0x350] sm:$0xff]  ;;  %v778_v25 = vld [vmem:[#allocation7 + $0x3c8] sm:$0xff]  ;;  %v780_v27 = vld [vmem:[#allocation7 + $0x3d8] sm:$0xff] }
 0x19a   : > { %v6866_v29 = vpack.c.bf16 %v763_v23, %v755_v21  ;;  %v6836_v30 = vpack.c.bf16 %v778_v25, %v770_v24  ;;  %v769_v31 = vld [vmem:[#allocation7 + $0x380] sm:$0xff]  ;;  %v771_v33 = vld [vmem:[#allocation7 + $0x390] sm:$0xff]  ;;  %v6868_v34 = vpack.c.bf16 %v780_v27, %v772_v26  ;;  %v662_v36 = vld [vmem:[#allocation7 + $0x28] sm:$0xff] }
 0x19b   : > { %6827 = vmatpush1.bf16.msra.mxu0 %v6826_v3  ;;  %v777_v32 = vld [vmem:[#allocation7 + $0x3c0] sm:$0xff]  ;;  %v779_v35 = vld [vmem:[#allocation7 + $0x3d0] sm:$0xff]  ;;  %v670_v37 = vld [vmem:[#allocation7 + $0x68] sm:$0xff] }
 0x19c   : > { %6859 = vmatpush1.bf16.msra.mxu1 %v6858_v4  ;;  %6829 = vmatprep.subr.bf16.mxu0 %v6828_v5  ;;  %v664_v38 = vld [vmem:[#allocation7 + $0x38] sm:$0xff]  ;;  %v6838_v40 = vpack.c.bf16 %v777_v32, %v769_v31  ;;  %v6870_v41 = vpack.c.bf16 %v779_v35, %v771_v33  ;;  %v6872_v42 = vpack.c.bf16 %v670_v37, %v662_v36  ;;  %v661_v43 = vld [vmem:[#allocation7 + $0x20] sm:$0xff]  ;;  %v663_v45 = vld [vmem:[#allocation7 + $0x30] sm:$0xff] }
 0x19d   : > { %6861 = vmatprep.subr.bf16.mxu1 %v6860_v9  ;;  %v672_v39 = vld [vmem:[#allocation7 + $0x78] sm:$0xff]  ;;  %v669_v44 = vld [vmem:[#allocation7 + $0x60] sm:$0xff]  ;;  %v671_v47 = vld [vmem:[#allocation7 + $0x70] sm:$0xff] }
 0x19e   : > { %v6904_v46 = vpack.c.bf16 %v672_v39, %v664_v38  ;;  %v678_v48 = vld [vmem:[#allocation7 + $0xa8] sm:$0xff]  ;;  %v680_v50 = vld [vmem:[#allocation7 + $0xb8] sm:$0xff]  ;;  %v6874_v53 = vpack.c.bf16 %v669_v44, %v661_v43  ;;  %v6906_v54 = vpack.c.bf16 %v671_v47, %v663_v45  ;;  %v677_v56 = vld [vmem:[#allocation7 + $0xa0] sm:$0xff] }
 0x19f   : > { %6831 = vmatpush1.bf16.msra.mxu0 %v6830_v16  ;;  %v686_v49 = vld [vmem:[#allocation7 + $0xe8] sm:$0xff]  ;;  %v688_v51 = vld [vmem:[#allocation7 + $0xf8] sm:$0xff]  ;;  %v685_v57 = vld [vmem:[#allocation7 + $0xe0] sm:$0xff] }
 0x1a0   : > { %6863 = vmatpush1.bf16.msra.mxu1 %v6862_v17  ;;  %6833 = vmatprep.subr.bf16.mxu0 %v6832_v18  ;;  %v9437_v52 = vld [vmem:[%s551_s17] sm:$0xff]  ;;  %v6876_v55 = vpack.c.bf16 %v686_v49, %v678_v48  ;;  %v6908_v59 = vpack.c.bf16 %v688_v51, %v680_v50  ;;  %v694_v61 = vld [vmem:[#allocation7 + $0x128] sm:$0xff]  ;;  %v6878_v1 = vpack.c.bf16 %v685_v57, %v677_v56  ;;  %v693_v4 = vld [vmem:[#allocation7 + $0x120] sm:$0xff] }
 0x1a1   : > { %6865 = vmatprep.subr.bf16.mxu1 %v6864_v22  ;;  %v679_v58 = vld [vmem:[#allocation7 + $0xb0] sm:$0xff]  ;;  %v702_v62 = vld [vmem:[#allocation7 + $0x168] sm:$0xff]  ;;  %v696_v63 = vld [vmem:[#allocation7 + $0x138] sm:$0xff] }
 0x1a2   : > { %v687_v60 = vld [vmem:[#allocation7 + $0xf0] sm:$0xff]  ;;  %v704_v0 = vld [vmem:[#allocation7 + $0x178] sm:$0xff]  ;;  %v6880_v3 = vpack.c.bf16 %v702_v62, %v694_v61  ;;  %v701_v5 = vld [vmem:[#allocation7 + $0x160] sm:$0xff] }
 0x1a3   : > { %6835 = vmatpush1.bf16.msra.mxu0 %v6834_v28  ;;  %v6910_v2 = vpack.c.bf16 %v687_v60, %v679_v58  ;;  %v695_v6 = vld [vmem:[#allocation7 + $0x130] sm:$0xff]  ;;  %v6912_v7 = vpack.c.bf16 %v704_v0, %v696_v63  ;;  %v710_v9 = vld [vmem:[#allocation7 + $0x1a8] sm:$0xff]  ;;  %v712_v12 = vld [vmem:[#allocation7 + $0x1b8] sm:$0xff]  ;;  %v6882_v14 = vpack.c.bf16 %v701_v5, %v693_v4 }
 0x1a4   : > { %6867 = vmatpush1.bf16.msra.mxu1 %v6866_v29  ;;  %6837 = vmatprep.subr.bf16.mxu0 %v6836_v30  ;;  %v703_v8 = vld [vmem:[#allocation7 + $0x170] sm:$0xff]  ;;  %v718_v10 = vld [vmem:[#allocation7 + $0x1e8] sm:$0xff]  ;;  %v720_v13 = vld [vmem:[#allocation7 + $0x1f8] sm:$0xff] }
 0x1a5   : > { %6869 = vmatprep.subr.bf16.mxu1 %v6868_v34  ;;  %v6914_v15 = vpack.c.bf16 %v703_v8, %v695_v6  ;;  %v6884_v16 = vpack.c.bf16 %v718_v10, %v710_v9  ;;  %v709_v17 = vld [vmem:[#allocation7 + $0x1a0] sm:$0xff]  ;;  %v711_v19 = vld [vmem:[#allocation7 + $0x1b0] sm:$0xff]  ;;  %v6916_v20 = vpack.c.bf16 %v720_v13, %v712_v12  ;;  %v726_v22 = vld [vmem:[#allocation7 + $0x228] sm:$0xff] }
 0x1a6   : > { %v717_v18 = vld [vmem:[#allocation7 + $0x1e0] sm:$0xff]  ;;  %v719_v21 = vld [vmem:[#allocation7 + $0x1f0] sm:$0xff]  ;;  %v734_v23 = vld [vmem:[#allocation7 + $0x268] sm:$0xff] }
 0x1a7   : > { %6839 = vmatpush1.bf16.msra.mxu0 %v6838_v40  ;;  %v728_v24 = vld [vmem:[#allocation7 + $0x238] sm:$0xff]  ;;  %v6886_v26 = vpack.c.bf16 %v717_v18, %v709_v17  ;;  %v6918_v27 = vpack.c.bf16 %v719_v21, %v711_v19  ;;  %v6888_v28 = vpack.c.bf16 %v734_v23, %v726_v22  ;;  %v725_v29 = vld [vmem:[#allocation7 + $0x220] sm:$0xff]  ;;  %v727_v31 = vld [vmem:[#allocation7 + $0x230] sm:$0xff] }
 0x1a8   : > { %6871 = vmatpush1.bf16.msra.mxu1 %v6870_v41  ;;  %6873 = vmatprep.subr.bf16.mxu0 %v6872_v42  ;;  %v736_v25 = vld [vmem:[#allocation7 + $0x278] sm:$0xff]  ;;  %v733_v30 = vld [vmem:[#allocation7 + $0x260] sm:$0xff]  ;;  %v735_v33 = vld [vmem:[#allocation7 + $0x270] sm:$0xff] }
 0x1a9   : > { %6905 = vmatprep.subr.bf16.mxu1 %v6904_v46  ;;  %v6920_v32 = vpack.c.bf16 %v736_v25, %v728_v24  ;;  %v742_v34 = vld [vmem:[#allocation7 + $0x2a8] sm:$0xff]  ;;  %v744_v36 = vld [vmem:[#allocation7 + $0x2b8] sm:$0xff]  ;;  %v6890_v38 = vpack.c.bf16 %v733_v30, %v725_v29  ;;  %v6922_v39 = vpack.c.bf16 %v735_v33, %v727_v31  ;;  %v741_v41 = vld [vmem:[#allocation7 + $0x2a0] sm:$0xff] }
 0x1aa   : > { %850 = vmatmul.mubr.f32.vlgmr.msra.gmra.mrb[0].mxu0 %v9437_v52  ;;  %v750_v35 = vld [vmem:[#allocation7 + $0x2e8] sm:$0xff]  ;;  %v752_v37 = vld [vmem:[#allocation7 + $0x2f8] sm:$0xff]  ;;  %v749_v42 = vld [vmem:[#allocation7 + $0x2e0] sm:$0xff] }
 0x1ab   : > { %921 = vmatmul.mubr.f32.vlgmr.msra.gmra.mrb[0].mxu1 %v9437_v52  ;;  %6875 = vmatpush1.bf16.msra.mxu0 %v6874_v53  ;;  %v6892_v40 = vpack.c.bf16 %v750_v35, %v742_v34  ;;  %v743_v43 = vld [vmem:[#allocation7 + $0x2b0] sm:$0xff]  ;;  %v6924_v44 = vpack.c.bf16 %v752_v37, %v744_v36  ;;  %v758_v46 = vld [vmem:[#allocation7 + $0x328] sm:$0xff]  ;;  %v760_v48 = vld [vmem:[#allocation7 + $0x338] sm:$0xff]  ;;  %v6894_v50 = vpack.c.bf16 %v749_v42, %v741_v41 }
 0x1ac   : > { %6907 = vmatpush1.bf16.msra.mxu1 %v6906_v54  ;;  %6877 = vmatprep.subr.bf16.mxu0 %v6876_v55  ;;  %v751_v45 = vld [vmem:[#allocation7 + $0x2f0] sm:$0xff]  ;;  %v766_v47 = vld [vmem:[#allocation7 + $0x368] sm:$0xff]  ;;  %v768_v49 = vld [vmem:[#allocation7 + $0x378] sm:$0xff] }
 0x1ad   : > { %6909 = vmatprep.subr.bf16.mxu1 %v6908_v59  ;;  %991 = vmatprep.mubr.f32.mxu0 %v10278_v11  ;;  %v6926_v51 = vpack.c.bf16 %v751_v45, %v743_v43  ;;  %v6896_v53 = vpack.c.bf16 %v766_v47, %v758_v46  ;;  %v757_v54 = vld [vmem:[#allocation7 + $0x320] sm:$0xff]  ;;  %v759_v56 = vld [vmem:[#allocation7 + $0x330] sm:$0xff]  ;;  %v6928_v57 = vpack.c.bf16 %v768_v49, %v760_v48  ;;  %v774_v59 = vld [vmem:[#allocation7 + $0x3a8] sm:$0xff] }
 0x1ae   : > { %1062 = vmatprep.mubr.f32.mxu1 %v10278_v11  ;;  %v765_v55 = vld [vmem:[#allocation7 + $0x360] sm:$0xff]  ;;  %v767_v58 = vld [vmem:[#allocation7 + $0x370] sm:$0xff]  ;;  %v782_v60 = vld [vmem:[#allocation7 + $0x3e8] sm:$0xff] }
 0x1af   : > { %6879 = vmatpush1.bf16.msra.mxu0 %v6878_v1  ;;  %v776_v61 = vld [vmem:[#allocation7 + $0x3b8] sm:$0xff]  ;;  %v6898_v63 = vpack.c.bf16 %v765_v55, %v757_v54  ;;  %v6930_v0 = vpack.c.bf16 %v767_v58, %v759_v56  ;;  %v6900_v1 = vpack.c.bf16 %v782_v60, %v774_v59  ;;  %v775_v4 = vld [vmem:[#allocation7 + $0x3b0] sm:$0xff]  ;;  %v1127_v8 = vld [vmem:[#allocation7 + $0x448] sm:$0xff] }
 0x1b0   : > { %6911 = vmatpush1.bf16.msra.mxu1 %v6910_v2  ;;  %6881 = vmatprep.subr.bf16.mxu0 %v6880_v3  ;;  %v784_v62 = vld [vmem:[#allocation7 + $0x3f8] sm:$0xff]  ;;  %v773_v2 = vld [vmem:[#allocation7 + $0x3a0] sm:$0xff]  ;;  %v783_v6 = vld [vmem:[#allocation7 + $0x3f0] sm:$0xff] }
 0x1b1   : > { %6913 = vmatprep.subr.bf16.mxu1 %v6912_v7  ;;  %v781_v3 = vld [vmem:[#allocation7 + $0x3e0] sm:$0xff]  ;;  %v6932_v5 = vpack.c.bf16 %v784_v62, %v776_v61  ;;  %v1119_v7 = vld [vmem:[#allocation7 + $0x408] sm:$0xff]  ;;  %v1121_v9 = vld [vmem:[#allocation7 + $0x418] sm:$0xff]  ;;  %v6934_v13 = vpack.c.bf16 %v783_v6, %v775_v4 }
 0x1b2   : > { %v1129_v10 = vld [vmem:[#allocation7 + $0x458] sm:$0xff]  ;;  %v6902_v12 = vpack.c.bf16 %v781_v3, %v773_v2  ;;  %v1120_v17 = vld [vmem:[#allocation7 + $0x410] sm:$0xff]  ;;  %v1143_v21 = vld [vmem:[#allocation7 + $0x4c8] sm:$0xff] }
 0x1b3   : > { %6883 = vmatpush1.bf16.msra.mxu0 %v6882_v14  ;;  %v6936_v14 = vpack.c.bf16 %v1127_v8, %v1119_v7  ;;  %v6968_v18 = vpack.c.bf16 %v1129_v10, %v1121_v9  ;;  %v1128_v19 = vld [vmem:[#allocation7 + $0x450] sm:$0xff]  ;;  %v1137_v22 = vld [vmem:[#allocation7 + $0x498] sm:$0xff]  ;;  %v1159_v33 = vld [vmem:[#allocation7 + $0x548] sm:$0xff] }
 0x1b4   : > { %6915 = vmatpush1.bf16.msra.mxu1 %v6914_v15  ;;  %6885 = vmatprep.subr.bf16.mxu0 %v6884_v16  ;;  %v1118_v15 = vld [vmem:[#allocation7 + $0x400] sm:$0xff]  ;;  %v1145_v23 = vld [vmem:[#allocation7 + $0x4d8] sm:$0xff]  ;;  %v6970_v25 = vpack.c.bf16 %v1128_v19, %v1120_v17  ;;  %v1136_v29 = vld [vmem:[#allocation7 + $0x490] sm:$0xff] }
 0x1b5   : > { %6917 = vmatprep.subr.bf16.mxu1 %v6916_v20  ;;  %v1126_v16 = vld [vmem:[#allocation7 + $0x440] sm:$0xff]  ;;  %v1135_v20 = vld [vmem:[#allocation7 + $0x488] sm:$0xff]  ;;  %v6972_v30 = vpack.c.bf16 %v1145_v23, %v1137_v22  ;;  %v1144_v31 = vld [vmem:[#allocation7 + $0x4d0] sm:$0xff] }
 0x1b6   : > { %v6938_v24 = vpack.c.bf16 %v1126_v16, %v1118_v15  ;;  %v1153_v34 = vld [vmem:[#allocation7 + $0x518] sm:$0xff]  ;;  %v6974_v37 = vpack.c.bf16 %v1144_v31, %v1136_v29  ;;  %v1152_v41 = vld [vmem:[#allocation7 + $0x510] sm:$0xff]  ;;  %v1175_v45 = vld [vmem:[#allocation7 + $0x5c8] sm:$0xff] }
 0x1b7   : > { %6887 = vmatpush1.bf16.msra.mxu0 %v6886_v26  ;;  %v6940_v26 = vpack.c.bf16 %v1143_v21, %v1135_v20  ;;  %v1161_v35 = vld [vmem:[#allocation7 + $0x558] sm:$0xff]  ;;  %v1160_v43 = vld [vmem:[#allocation7 + $0x550] sm:$0xff]  ;;  %v1183_v56 = vld [vmem:[#allocation7 + $0x608] sm:$0xff] }
 0x1b8   : > { %6919 = vmatpush1.bf16.msra.mxu1 %v6918_v27  ;;  %6889 = vmatprep.subr.bf16.mxu0 %v6888_v28  ;;  %v1134_v27 = vld [vmem:[#allocation7 + $0x480] sm:$0xff]  ;;  %v6976_v42 = vpack.c.bf16 %v1161_v35, %v1153_v34  ;;  %v1169_v46 = vld [vmem:[#allocation7 + $0x598] sm:$0xff]  ;;  %v6978_v48 = vpack.c.bf16 %v1160_v43, %v1152_v41  ;;  %v1176_v55 = vld [vmem:[#allocation7 + $0x5d0] sm:$0xff] }
 0x1b9   : > { %6921 = vmatprep.subr.bf16.mxu1 %v6920_v32  ;;  %v1142_v28 = vld [vmem:[#allocation7 + $0x4c0] sm:$0xff]  ;;  %v1151_v32 = vld [vmem:[#allocation7 + $0x508] sm:$0xff]  ;;  %v1177_v47 = vld [vmem:[#allocation7 + $0x5d8] sm:$0xff] }
 0x1ba   : > { %v6942_v36 = vpack.c.bf16 %v1142_v28, %v1134_v27  ;;  %v6980_v54 = vpack.c.bf16 %v1177_v47, %v1169_v46  ;;  %v1185_v58 = vld [vmem:[#allocation7 + $0x618] sm:$0xff]  ;;  %v1192_v3 = vld [vmem:[#allocation7 + $0x650] sm:$0xff]  ;;  %v1199_v4 = vld [vmem:[#allocation7 + $0x688] sm:$0xff] }
 0x1bb   : > { %6891 = vmatpush1.bf16.msra.mxu0 %v6890_v38  ;;  %v6944_v38 = vpack.c.bf16 %v1159_v33, %v1151_v32  ;;  %v1193_v59 = vld [vmem:[#allocation7 + $0x658] sm:$0xff]  ;;  %v1208_v16 = vld [vmem:[#allocation7 + $0x6d0] sm:$0xff]  ;;  %v1215_v17 = vld [vmem:[#allocation7 + $0x708] sm:$0xff] }
 0x1bc   : > { %6923 = vmatpush1.bf16.msra.mxu1 %v6922_v39  ;;  %6893 = vmatprep.subr.bf16.mxu0 %v6892_v40  ;;  %v1150_v39 = vld [vmem:[#allocation7 + $0x500] sm:$0xff]  ;;  %v6984_v2 = vpack.c.bf16 %v1193_v59, %v1185_v58  ;;  %v1201_v6 = vld [vmem:[#allocation7 + $0x698] sm:$0xff]  ;;  %v1224_v28 = vld [vmem:[#allocation7 + $0x750] sm:$0xff] }
 0x1bd   : > { %6925 = vmatprep.subr.bf16.mxu1 %v6924_v44  ;;  %v1158_v40 = vld [vmem:[#allocation7 + $0x540] sm:$0xff]  ;;  %v1167_v44 = vld [vmem:[#allocation7 + $0x588] sm:$0xff]  ;;  %v1209_v7 = vld [vmem:[#allocation7 + $0x6d8] sm:$0xff] }
 0x1be   : > { %v6948_v49 = vpack.c.bf16 %v1175_v45, %v1167_v44  ;;  %v6988_v15 = vpack.c.bf16 %v1209_v7, %v1201_v6  ;;  %v1217_v19 = vld [vmem:[#allocation7 + $0x718] sm:$0xff]  ;;  %v1231_v29 = vld [vmem:[#allocation7 + $0x788] sm:$0xff] }
 0x1bf   : > { %6895 = vmatpush1.bf16.msra.mxu0 %v6894_v50  ;;  %v1166_v50 = vld [vmem:[#allocation7 + $0x580] sm:$0xff]  ;;  %v1225_v20 = vld [vmem:[#allocation7 + $0x758] sm:$0xff]  ;;  %v1123_v41 = vld [vmem:[#allocation7 + $0x428] sm:$0xff] }
 0x1c0   : > { %6927 = vmatpush1.bf16.msra.mxu1 %v6926_v51  ;;  %6897 = vmatprep.subr.bf16.mxu0 %v6896_v53  ;;  %v1174_v51 = vld [vmem:[#allocation7 + $0x5c0] sm:$0xff]  ;;  %v1168_v53 = vld [vmem:[#allocation7 + $0x590] sm:$0xff]  ;;  %v6992_v27 = vpack.c.bf16 %v1225_v20, %v1217_v19  ;;  %v1233_v31 = vld [vmem:[#allocation7 + $0x798] sm:$0xff] }
 0x1c1   : > { %6929 = vmatprep.subr.bf16.mxu1 %v6928_v57  ;;  %v1191_v57 = vld [vmem:[#allocation7 + $0x648] sm:$0xff]  ;;  %v6950_v60 = vpack.c.bf16 %v1174_v51, %v1166_v50  ;;  %v6982_v61 = vpack.c.bf16 %v1176_v55, %v1168_v53  ;;  %v1241_v32 = vld [vmem:[#allocation7 + $0x7d8] sm:$0xff]  ;;  %v1132_v51 = vld [vmem:[#allocation7 + $0x470] sm:$0xff] }
 0x1c2   : > { %v6952_v62 = vpack.c.bf16 %v1191_v57, %v1183_v56  ;;  %v1125_v43 = vld [vmem:[#allocation7 + $0x438] sm:$0xff]  ;;  %v1139_v53 = vld [vmem:[#allocation7 + $0x4a8] sm:$0xff] }
 0x1c3   : > { %6899 = vmatpush1.bf16.msra.mxu0 %v6898_v63  ;;  %v1182_v63 = vld [vmem:[#allocation7 + $0x600] sm:$0xff]  ;;  %v1133_v44 = vld [vmem:[#allocation7 + $0x478] sm:$0xff] }
 0x1c4   : > { %6931 = vmatpush1.bf16.msra.mxu1 %v6930_v0  ;;  %6901 = vmatprep.subr.bf16.mxu0 %v6900_v1  ;;  %v1190_v0 = vld [vmem:[#allocation7 + $0x640] sm:$0xff]  ;;  %v1184_v1 = vld [vmem:[#allocation7 + $0x610] sm:$0xff]  ;;  %v7032_v50 = vpack.c.bf16 %v1133_v44, %v1125_v43  ;;  %v1141_v55 = vld [vmem:[#allocation7 + $0x4b8] sm:$0xff] }
 0x1c5   : > { %6933 = vmatprep.subr.bf16.mxu1 %v6932_v5  ;;  %v1207_v5 = vld [vmem:[#allocation7 + $0x6c8] sm:$0xff]  ;;  %v6954_v8 = vpack.c.bf16 %v1190_v0, %v1182_v63  ;;  %v6986_v9 = vpack.c.bf16 %v1192_v3, %v1184_v1  ;;  %v1149_v56 = vld [vmem:[#allocation7 + $0x4f8] sm:$0xff]  ;;  %v1140_v63 = vld [vmem:[#allocation7 + $0x4b0] sm:$0xff] }
 0x1c6   : > { %v6956_v10 = vpack.c.bf16 %v1207_v5, %v1199_v4  ;;  %v9447_v57 = vld [vmem:[#allocation21] sm:$0xff]  ;;  %v7036_v0 = vpack.c.bf16 %v1149_v56, %v1141_v55  ;;  %v1148_v1 = vld [vmem:[#allocation7 + $0x4f0] sm:$0xff]  ;;  %v1157_v4 = vld [vmem:[#allocation7 + $0x538] sm:$0xff] }
 0x1c7   : > { %6903 = vmatpush1.bf16.msra.mxu0 %v6902_v12  ;;  %v1198_v12 = vld [vmem:[#allocation7 + $0x680] sm:$0xff]  ;;  %v1163_v3 = vld [vmem:[#allocation7 + $0x568] sm:$0xff]  ;;  %v1165_v5 = vld [vmem:[#allocation7 + $0x578] sm:$0xff]  ;;  %v7038_v7 = vpack.c.bf16 %v1148_v1, %v1140_v63 }
 0x1c8   : > { %6935 = vmatpush1.bf16.msra.mxu1 %v6934_v13  ;;  %6937 = vmatprep.subr.bf16.mxu0 %v6936_v14  ;;  %v1206_v13 = vld [vmem:[#allocation7 + $0x6c0] sm:$0xff]  ;;  %v1200_v14 = vld [vmem:[#allocation7 + $0x690] sm:$0xff]  ;;  %v1243_v1 = vld [vmem:[#allocation7 + $0x7e8] sm:$0xff] }
 0x1c9   : > { %6969 = vmatprep.subr.bf16.mxu1 %v6968_v18  ;;  %v1223_v18 = vld [vmem:[#allocation7 + $0x748] sm:$0xff]  ;;  %v6958_v21 = vpack.c.bf16 %v1206_v13, %v1198_v12  ;;  %v6990_v22 = vpack.c.bf16 %v1208_v16, %v1200_v14  ;;  %v1156_v12 = vld [vmem:[#allocation7 + $0x530] sm:$0xff]  ;;  %v7040_v13 = vpack.c.bf16 %v1165_v5, %v1157_v4 }
 0x1ca   : > { %992 = vmatmul.mubr.f32.vlgmr.msra.gmra.mrb[2].mxu0 %v9437_v52  ;;  %v6960_v23 = vpack.c.bf16 %v1223_v18, %v1215_v17  ;;  %v1164_v14 = vld [vmem:[#allocation7 + $0x570] sm:$0xff]  ;;  %v1179_v16 = vld [vmem:[#allocation7 + $0x5e8] sm:$0xff]  ;;  %v1173_v17 = vld [vmem:[#allocation7 + $0x5b8] sm:$0xff] }
 0x1cb   : > { %1063 = vmatmul.mubr.f32.vlgmr.msra.gmra.mrb[2].mxu1 %v9437_v52  ;;  %6939 = vmatpush1.bf16.msra.mxu0 %v6938_v24  ;;  %v6946_v52 = vpack.c.bf16 %v1158_v40, %v1150_v39  ;;  %v1214_v24 = vld [vmem:[#allocation7 + $0x700] sm:$0xff]  ;;  %v6996_v39 = vpack.c.bf16 %v1241_v32, %v1233_v31  ;;  %v1240_v40 = vld [vmem:[#allocation7 + $0x7d0] sm:$0xff]  ;;  %v1181_v18 = vld [vmem:[#allocation7 + $0x5f8] sm:$0xff]  ;;  %v7042_v20 = vpack.c.bf16 %v1164_v14, %v1156_v12 }
 0x1cc   : > { %6971 = vmatpush1.bf16.msra.mxu1 %v6970_v25  ;;  %6941 = vmatprep.subr.bf16.mxu0 %v6940_v26  ;;  %v1222_v25 = vld [vmem:[#allocation7 + $0x740] sm:$0xff]  ;;  %v1216_v26 = vld [vmem:[#allocation7 + $0x710] sm:$0xff]  ;;  %v1547_v14 = vld [vmem:[#allocation7 + $0x848] sm:$0xff] }
 0x1cd   : > { %6973 = vmatprep.subr.bf16.mxu1 %v6972_v30  ;;  %1310 = vmatprep.mubr.f32.mxu0 %v10278_v11  ;;  %v1239_v30 = vld [vmem:[#allocation7 + $0x7c8] sm:$0xff]  ;;  %v6962_v33 = vpack.c.bf16 %v1222_v25, %v1214_v24  ;;  %v6994_v34 = vpack.c.bf16 %v1224_v28, %v1216_v26  ;;  %v1172_v24 = vld [vmem:[#allocation7 + $0x5b0] sm:$0xff]  ;;  %v7044_v25 = vpack.c.bf16 %v1181_v18, %v1173_v17 }
 0x1ce   : > { %1381 = vmatprep.mubr.f32.mxu1 %v10278_v11  ;;  %v6964_v35 = vpack.c.bf16 %v1239_v30, %v1231_v29  ;;  %v1180_v26 = vld [vmem:[#allocation7 + $0x5f0] sm:$0xff]  ;;  %v1195_v28 = vld [vmem:[#allocation7 + $0x668] sm:$0xff]  ;;  %v1189_v29 = vld [vmem:[#allocation7 + $0x638] sm:$0xff] }
 0x1cf   : > { %6943 = vmatpush1.bf16.msra.mxu0 %v6942_v36  ;;  %v1230_v36 = vld [vmem:[#allocation7 + $0x780] sm:$0xff]  ;;  %v1197_v30 = vld [vmem:[#allocation7 + $0x678] sm:$0xff]  ;;  %v7046_v32 = vpack.c.bf16 %v1180_v26, %v1172_v24  ;;  %v1228_v63 = vld [vmem:[#allocation7 + $0x770] sm:$0xff] }
 0x1d0   : > { %6975 = vmatpush1.bf16.msra.mxu1 %v6974_v37  ;;  %6945 = vmatprep.subr.bf16.mxu0 %v6944_v38  ;;  %v1238_v37 = vld [vmem:[#allocation7 + $0x7c0] sm:$0xff]  ;;  %v1232_v38 = vld [vmem:[#allocation7 + $0x790] sm:$0xff]  ;;  %v1563_v26 = vld [vmem:[#allocation7 + $0x8c8] sm:$0xff] }
 0x1d1   : > { %6977 = vmatprep.subr.bf16.mxu1 %v6976_v42  ;;  %v1131_v42 = vld [vmem:[#allocation7 + $0x468] sm:$0xff]  ;;  %v6966_v45 = vpack.c.bf16 %v1238_v37, %v1230_v36  ;;  %v6998_v46 = vpack.c.bf16 %v1240_v40, %v1232_v38  ;;  %v1188_v36 = vld [vmem:[#allocation7 + $0x630] sm:$0xff]  ;;  %v7048_v37 = vpack.c.bf16 %v1197_v30, %v1189_v29 }
 0x1d2   : > { %v7000_v47 = vpack.c.bf16 %v1131_v42, %v1123_v41  ;;  %v1196_v38 = vld [vmem:[#allocation7 + $0x670] sm:$0xff]  ;;  %v1211_v40 = vld [vmem:[#allocation7 + $0x6e8] sm:$0xff]  ;;  %v1205_v41 = vld [vmem:[#allocation7 + $0x6b8] sm:$0xff] }
 0x1d3   : > { %6947 = vmatpush1.bf16.msra.mxu0 %v6946_v52  ;;  %v1122_v52 = vld [vmem:[#allocation7 + $0x420] sm:$0xff]  ;;  %v1213_v42 = vld [vmem:[#allocation7 + $0x6f8] sm:$0xff]  ;;  %v7050_v44 = vpack.c.bf16 %v1196_v38, %v1188_v36  ;;  %v1244_v12 = vld [vmem:[#allocation7 + $0x7f0] sm:$0xff] }
 0x1d4   : > { %6979 = vmatpush1.bf16.msra.mxu1 %v6978_v48  ;;  %6949 = vmatprep.subr.bf16.mxu0 %v6948_v49  ;;  %v1130_v48 = vld [vmem:[#allocation7 + $0x460] sm:$0xff]  ;;  %v1124_v49 = vld [vmem:[#allocation7 + $0x430] sm:$0xff]  ;;  %v1579_v38 = vld [vmem:[#allocation7 + $0x948] sm:$0xff] }
 0x1d5   : > { %6981 = vmatprep.subr.bf16.mxu1 %v6980_v54  ;;  %v1147_v54 = vld [vmem:[#allocation7 + $0x4e8] sm:$0xff]  ;;  %v7002_v58 = vpack.c.bf16 %v1130_v48, %v1122_v52  ;;  %v7034_v59 = vpack.c.bf16 %v1132_v51, %v1124_v49  ;;  %v1204_v52 = vld [vmem:[#allocation7 + $0x6b0] sm:$0xff]  ;;  %v7052_v48 = vpack.c.bf16 %v1213_v42, %v1205_v41 }
 0x1d6   : > { %v1212_v49 = vld [vmem:[#allocation7 + $0x6f0] sm:$0xff]  ;;  %v1227_v51 = vld [vmem:[#allocation7 + $0x768] sm:$0xff] }
 0x1d7   : > { %6951 = vmatpush1.bf16.msra.mxu0 %v6950_v60  ;;  %v7004_v60 = vpack.c.bf16 %v1147_v54, %v1139_v53  ;;  %v1221_v53 = vld [vmem:[#allocation7 + $0x738] sm:$0xff]  ;;  %v7054_v56 = vpack.c.bf16 %v1212_v49, %v1204_v52  ;;  %v1548_v24 = vld [vmem:[#allocation7 + $0x850] sm:$0xff]  ;;  %v1595_v49 = vld [vmem:[#allocation7 + $0x9c8] sm:$0xff] }
 0x1d8   : > { %6983 = vmatpush1.bf16.msra.mxu1 %v6982_v61  ;;  %6953 = vmatprep.subr.bf16.mxu0 %v6952_v62  ;;  %v1138_v61 = vld [vmem:[#allocation7 + $0x4a0] sm:$0xff]  ;;  %v1229_v54 = vld [vmem:[#allocation7 + $0x778] sm:$0xff]  ;;  %v1564_v36 = vld [vmem:[#allocation7 + $0x8d0] sm:$0xff] }
 0x1d9   : > { %6985 = vmatprep.subr.bf16.mxu1 %v6984_v2  ;;  %v1146_v62 = vld [vmem:[#allocation7 + $0x4e0] sm:$0xff]  ;;  %v1155_v2 = vld [vmem:[#allocation7 + $0x528] sm:$0xff]  ;;  %v1580_v52 = vld [vmem:[#allocation7 + $0x950] sm:$0xff] }
 0x1da   : > { %v7006_v6 = vpack.c.bf16 %v1146_v62, %v1138_v61  ;;  %v1220_v61 = vld [vmem:[#allocation7 + $0x730] sm:$0xff]  ;;  %v7056_v62 = vpack.c.bf16 %v1229_v54, %v1221_v53 }
 0x1db   : > { %6955 = vmatpush1.bf16.msra.mxu0 %v6954_v8  ;;  %v7008_v8 = vpack.c.bf16 %v1163_v3, %v1155_v2  ;;  %v1237_v2 = vld [vmem:[#allocation7 + $0x7b8] sm:$0xff]  ;;  %v7058_v5 = vpack.c.bf16 %v1228_v63, %v1220_v61  ;;  %v1603_v61 = vld [vmem:[#allocation7 + $0xa08] sm:$0xff] }
 0x1dc   : > { %6987 = vmatpush1.bf16.msra.mxu1 %v6986_v9  ;;  %6957 = vmatprep.subr.bf16.mxu0 %v6956_v10  ;;  %v1154_v9 = vld [vmem:[#allocation7 + $0x520] sm:$0xff]  ;;  %v1245_v3 = vld [vmem:[#allocation7 + $0x7f8] sm:$0xff] }
 0x1dd   : > { %6989 = vmatprep.subr.bf16.mxu1 %v6988_v15  ;;  %v1162_v10 = vld [vmem:[#allocation7 + $0x560] sm:$0xff]  ;;  %v1171_v15 = vld [vmem:[#allocation7 + $0x5a8] sm:$0xff]  ;;  %v1605_v63 = vld [vmem:[#allocation7 + $0xa18] sm:$0xff] }
 0x1de   : > { %v7010_v19 = vpack.c.bf16 %v1162_v10, %v1154_v9  ;;  %v1236_v9 = vld [vmem:[#allocation7 + $0x7b0] sm:$0xff]  ;;  %v7060_v10 = vpack.c.bf16 %v1245_v3, %v1237_v2 }
 0x1df   : > { %6959 = vmatpush1.bf16.msra.mxu0 %v6958_v21  ;;  %v7012_v21 = vpack.c.bf16 %v1179_v16, %v1171_v15  ;;  %v1541_v15 = vld [vmem:[#allocation7 + $0x818] sm:$0xff]  ;;  %v7062_v18 = vpack.c.bf16 %v1244_v12, %v1236_v9  ;;  %v1619_v9 = vld [vmem:[#allocation7 + $0xa88] sm:$0xff] }
 0x1e0   : > { %6991 = vmatpush1.bf16.msra.mxu1 %v6990_v22  ;;  %6961 = vmatprep.subr.bf16.mxu0 %v6960_v23  ;;  %v1170_v22 = vld [vmem:[#allocation7 + $0x5a0] sm:$0xff]  ;;  %v1549_v16 = vld [vmem:[#allocation7 + $0x858] sm:$0xff] }
 0x1e1   : > { %6993 = vmatprep.subr.bf16.mxu1 %v6992_v27  ;;  %v1178_v23 = vld [vmem:[#allocation7 + $0x5e0] sm:$0xff]  ;;  %v1187_v27 = vld [vmem:[#allocation7 + $0x628] sm:$0xff]  ;;  %v1621_v12 = vld [vmem:[#allocation7 + $0xa98] sm:$0xff] }
 0x1e2   : > { %v7014_v31 = vpack.c.bf16 %v1178_v23, %v1170_v22  ;;  %v1540_v22 = vld [vmem:[#allocation7 + $0x810] sm:$0xff]  ;;  %v7096_v23 = vpack.c.bf16 %v1549_v16, %v1541_v15 }
 0x1e3   : > { %6963 = vmatpush1.bf16.msra.mxu0 %v6962_v33  ;;  %v7016_v33 = vpack.c.bf16 %v1195_v28, %v1187_v27  ;;  %v1557_v27 = vld [vmem:[#allocation7 + $0x898] sm:$0xff]  ;;  %v7098_v30 = vpack.c.bf16 %v1548_v24, %v1540_v22  ;;  %v1635_v22 = vld [vmem:[#allocation7 + $0xb08] sm:$0xff] }
 0x1e4   : > { %6995 = vmatpush1.bf16.msra.mxu1 %v6994_v34  ;;  %6965 = vmatprep.subr.bf16.mxu0 %v6964_v35  ;;  %v1186_v34 = vld [vmem:[#allocation7 + $0x620] sm:$0xff]  ;;  %v1565_v28 = vld [vmem:[#allocation7 + $0x8d8] sm:$0xff] }
 0x1e5   : > { %6997 = vmatprep.subr.bf16.mxu1 %v6996_v39  ;;  %v1194_v35 = vld [vmem:[#allocation7 + $0x660] sm:$0xff]  ;;  %v1203_v39 = vld [vmem:[#allocation7 + $0x6a8] sm:$0xff]  ;;  %v1637_v24 = vld [vmem:[#allocation7 + $0xb18] sm:$0xff] }
 0x1e6   : > { %v7018_v43 = vpack.c.bf16 %v1194_v35, %v1186_v34  ;;  %v1556_v34 = vld [vmem:[#allocation7 + $0x890] sm:$0xff]  ;;  %v7100_v35 = vpack.c.bf16 %v1565_v28, %v1557_v27 }
 0x1e7   : > { %6967 = vmatpush1.bf16.msra.mxu0 %v6966_v45  ;;  %v7020_v45 = vpack.c.bf16 %v1211_v40, %v1203_v39  ;;  %v1573_v39 = vld [vmem:[#allocation7 + $0x918] sm:$0xff]  ;;  %v7102_v42 = vpack.c.bf16 %v1564_v36, %v1556_v34  ;;  %v1651_v34 = vld [vmem:[#allocation7 + $0xb88] sm:$0xff] }
 0x1e8   : > { %6999 = vmatpush1.bf16.msra.mxu1 %v6998_v46  ;;  %7001 = vmatprep.subr.bf16.mxu0 %v7000_v47  ;;  %v1202_v46 = vld [vmem:[#allocation7 + $0x6a0] sm:$0xff]  ;;  %v1581_v40 = vld [vmem:[#allocation7 + $0x958] sm:$0xff] }
 0x1e9   : > { %7033 = vmatprep.subr.bf16.mxu1 %v7032_v50  ;;  %v1210_v47 = vld [vmem:[#allocation7 + $0x6e0] sm:$0xff]  ;;  %v1219_v50 = vld [vmem:[#allocation7 + $0x728] sm:$0xff]  ;;  %v1653_v36 = vld [vmem:[#allocation7 + $0xb98] sm:$0xff] }
 0x1ea   : > { %1311 = vmatmul.mubr.f32.vlgmr.msra.gmra.mrb[0].mxu0 %v9447_v57  ;;  %v7022_v55 = vpack.c.bf16 %v1210_v47, %v1202_v46  ;;  %v1572_v46 = vld [vmem:[#allocation7 + $0x910] sm:$0xff]  ;;  %v7104_v47 = vpack.c.bf16 %v1581_v40, %v1573_v39 }
 0x1eb   : > { %1382 = vmatmul.mubr.f32.vlgmr.msra.gmra.mrb[0].mxu1 %v9447_v57  ;;  %7003 = vmatpush1.bf16.msra.mxu0 %v7002_v58  ;;  %v7024_v58 = vpack.c.bf16 %v1227_v51, %v1219_v50  ;;  %v1589_v50 = vld [vmem:[#allocation7 + $0x998] sm:$0xff]  ;;  %v7106_v53 = vpack.c.bf16 %v1580_v52, %v1572_v46  ;;  %v1543_v46 = vld [vmem:[#allocation7 + $0x828] sm:$0xff] }
 0x1ec   : > { %7035 = vmatpush1.bf16.msra.mxu1 %v7034_v59  ;;  %7005 = vmatprep.subr.bf16.mxu0 %v7004_v60  ;;  %v1218_v59 = vld [vmem:[#allocation7 + $0x720] sm:$0xff]  ;;  %v1597_v51 = vld [vmem:[#allocation7 + $0x9d8] sm:$0xff] }
 0x1ed   : > { %7037 = vmatprep.subr.bf16.mxu1 %v7036_v0  ;;  %1452 = vmatprep.mubr.f32.mxu0 %v10278_v11  ;;  %v1226_v60 = vld [vmem:[#allocation7 + $0x760] sm:$0xff]  ;;  %v1235_v0 = vld [vmem:[#allocation7 + $0x7a8] sm:$0xff]  ;;  %v1545_v52 = vld [vmem:[#allocation7 + $0x838] sm:$0xff] }
 0x1ee   : > { %1523 = vmatprep.mubr.f32.mxu1 %v10278_v11  ;;  %v7026_v4 = vpack.c.bf16 %v1226_v60, %v1218_v59  ;;  %v7108_v59 = vpack.c.bf16 %v1597_v51, %v1589_v50  ;;  %v1596_v60 = vld [vmem:[#allocation7 + $0x9d0] sm:$0xff] }
 0x1ef   : > { %7007 = vmatpush1.bf16.msra.mxu0 %v7006_v6  ;;  %v7028_v6 = vpack.c.bf16 %v1243_v1, %v1235_v0  ;;  %v1613_v0 = vld [vmem:[#allocation7 + $0xa58] sm:$0xff] }
 0x1f0   : > { %7039 = vmatpush1.bf16.msra.mxu1 %v7038_v7  ;;  %7009 = vmatprep.subr.bf16.mxu0 %v7008_v8  ;;  %v1234_v7 = vld [vmem:[#allocation7 + $0x7a0] sm:$0xff] }
 0x1f1   : > { %7041 = vmatprep.subr.bf16.mxu1 %v7040_v13  ;;  %v1242_v8 = vld [vmem:[#allocation7 + $0x7e0] sm:$0xff]  ;;  %v1539_v13 = vld [vmem:[#allocation7 + $0x808] sm:$0xff] }
 0x1f2   : > { %v7030_v17 = vpack.c.bf16 %v1242_v8, %v1234_v7  ;;  %v7112_v7 = vpack.c.bf16 %v1613_v0, %v1605_v63  ;;  %v1612_v8 = vld [vmem:[#allocation7 + $0xa50] sm:$0xff] }
 0x1f3   : > { %7011 = vmatpush1.bf16.msra.mxu0 %v7010_v19  ;;  %v7064_v19 = vpack.c.bf16 %v1547_v14, %v1539_v13  ;;  %v1629_v13 = vld [vmem:[#allocation7 + $0xad8] sm:$0xff] }
 0x1f4   : > { %7043 = vmatpush1.bf16.msra.mxu1 %v7042_v20  ;;  %7013 = vmatprep.subr.bf16.mxu0 %v7012_v21  ;;  %v1538_v20 = vld [vmem:[#allocation7 + $0x800] sm:$0xff] }
 0x1f5   : > { %7045 = vmatprep.subr.bf16.mxu1 %v7044_v25  ;;  %v1546_v21 = vld [vmem:[#allocation7 + $0x840] sm:$0xff]  ;;  %v1555_v25 = vld [vmem:[#allocation7 + $0x888] sm:$0xff] }
 0x1f6   : > { %v7066_v29 = vpack.c.bf16 %v1546_v21, %v1538_v20  ;;  %v7116_v20 = vpack.c.bf16 %v1629_v13, %v1621_v12  ;;  %v1628_v21 = vld [vmem:[#allocation7 + $0xad0] sm:$0xff] }
 0x1f7   : > { %7015 = vmatpush1.bf16.msra.mxu0 %v7014_v31  ;;  %v7068_v31 = vpack.c.bf16 %v1563_v26, %v1555_v25  ;;  %v1645_v25 = vld [vmem:[#allocation7 + $0xb58] sm:$0xff] }
 0x1f8   : > { %7047 = vmatpush1.bf16.msra.mxu1 %v7046_v32  ;;  %7017 = vmatprep.subr.bf16.mxu0 %v7016_v33  ;;  %v1554_v32 = vld [vmem:[#allocation7 + $0x880] sm:$0xff] }
 0x1f9   : > { %7049 = vmatprep.subr.bf16.mxu1 %v7048_v37  ;;  %v1562_v33 = vld [vmem:[#allocation7 + $0x8c0] sm:$0xff]  ;;  %v1571_v37 = vld [vmem:[#allocation7 + $0x908] sm:$0xff] }
 0x1fa   : > { %v7070_v41 = vpack.c.bf16 %v1562_v33, %v1554_v32  ;;  %v7120_v32 = vpack.c.bf16 %v1645_v25, %v1637_v24  ;;  %v1644_v33 = vld [vmem:[#allocation7 + $0xb50] sm:$0xff] }
 0x1fb   : > { %7019 = vmatpush1.bf16.msra.mxu0 %v7018_v43  ;;  %v7072_v43 = vpack.c.bf16 %v1579_v38, %v1571_v37  ;;  %v1661_v37 = vld [vmem:[#allocation7 + $0xbd8] sm:$0xff] }
 0x1fc   : > { %7051 = vmatpush1.bf16.msra.mxu1 %v7050_v44  ;;  %7021 = vmatprep.subr.bf16.mxu0 %v7020_v45  ;;  %v1570_v44 = vld [vmem:[#allocation7 + $0x900] sm:$0xff] }
 0x1fd   : > { %7053 = vmatprep.subr.bf16.mxu1 %v7052_v48  ;;  %v1578_v45 = vld [vmem:[#allocation7 + $0x940] sm:$0xff]  ;;  %v1587_v48 = vld [vmem:[#allocation7 + $0x988] sm:$0xff] }
 0x1fe   : > { %v7076_v54 = vpack.c.bf16 %v1595_v49, %v1587_v48  ;;  %v1553_v48 = vld [vmem:[#allocation7 + $0x878] sm:$0xff] }
 0x1ff   : > { %7023 = vmatpush1.bf16.msra.mxu0 %v7022_v55  ;;  %v1586_v55 = vld [vmem:[#allocation7 + $0x980] sm:$0xff] }
 0x200   : > { %7055 = vmatpush1.bf16.msra.mxu1 %v7054_v56  ;;  %7025 = vmatprep.subr.bf16.mxu0 %v7024_v58  ;;  %v1594_v56 = vld [vmem:[#allocation7 + $0x9c0] sm:$0xff]  ;;  %v1588_v58 = vld [vmem:[#allocation7 + $0x990] sm:$0xff] }
 0x201   : > { %7057 = vmatprep.subr.bf16.mxu1 %v7056_v62  ;;  %v1611_v62 = vld [vmem:[#allocation7 + $0xa48] sm:$0xff]  ;;  %v7078_v1 = vpack.c.bf16 %v1594_v56, %v1586_v55  ;;  %v7110_v2 = vpack.c.bf16 %v1596_v60, %v1588_v58  ;;  %v7160_v55 = vpack.c.bf16 %v1553_v48, %v1545_v52  ;;  %v1552_v56 = vld [vmem:[#allocation7 + $0x870] sm:$0xff]  ;;  %v1561_v60 = vld [vmem:[#allocation7 + $0x8b8] sm:$0xff] }
 0x202   : > { %v7080_v3 = vpack.c.bf16 %v1611_v62, %v1603_v61  ;;  %v1559_v58 = vld [vmem:[#allocation7 + $0x8a8] sm:$0xff]  ;;  %v1569_v61 = vld [vmem:[#allocation7 + $0x8f8] sm:$0xff] }
 0x203   : > { %7027 = vmatpush1.bf16.msra.mxu0 %v7026_v4  ;;  %v1602_v4 = vld [vmem:[#allocation7 + $0xa00] sm:$0xff]  ;;  %v9457_v62 = vld [vmem:[#allocation21 + $0x8] sm:$0xff] }
 0x204   : > { %7059 = vmatpush1.bf16.msra.mxu1 %v7058_v5  ;;  %7029 = vmatprep.subr.bf16.mxu0 %v7028_v6  ;;  %v1610_v5 = vld [vmem:[#allocation7 + $0xa40] sm:$0xff]  ;;  %v1604_v6 = vld [vmem:[#allocation7 + $0xa10] sm:$0xff] }
 0x205   : > { %7061 = vmatprep.subr.bf16.mxu1 %v7060_v10  ;;  %v1627_v10 = vld [vmem:[#allocation7 + $0xac8] sm:$0xff]  ;;  %v7082_v14 = vpack.c.bf16 %v1610_v5, %v1602_v4  ;;  %v7114_v15 = vpack.c.bf16 %v1612_v8, %v1604_v6  ;;  %v1560_v4 = vld [vmem:[#allocation7 + $0x8b0] sm:$0xff]  ;;  %v7164_v5 = vpack.c.bf16 %v1569_v61, %v1561_v60 }
 0x206   : > { %v7084_v16 = vpack.c.bf16 %v1627_v10, %v1619_v9  ;;  %v1568_v6 = vld [vmem:[#allocation7 + $0x8f0] sm:$0xff]  ;;  %v1583_v8 = vld [vmem:[#allocation7 + $0x968] sm:$0xff]  ;;  %v1577_v9 = vld [vmem:[#allocation7 + $0x938] sm:$0xff] }
 0x207   : > { %7031 = vmatpush1.bf16.msra.mxu0 %v7030_v17  ;;  %v1618_v17 = vld [vmem:[#allocation7 + $0xa80] sm:$0xff]  ;;  %v1585_v10 = vld [vmem:[#allocation7 + $0x978] sm:$0xff]  ;;  %v7166_v13 = vpack.c.bf16 %v1568_v6, %v1560_v4  ;;  %v1648_v4 = vld [vmem:[#allocation7 + $0xb70] sm:$0xff] }
 0x208   : > { %7063 = vmatpush1.bf16.msra.mxu1 %v7062_v18  ;;  %7065 = vmatprep.subr.bf16.mxu0 %v7064_v19  ;;  %v1626_v18 = vld [vmem:[#allocation7 + $0xac0] sm:$0xff]  ;;  %v1620_v19 = vld [vmem:[#allocation7 + $0xa90] sm:$0xff]  ;;  %v1663_v6 = vld [vmem:[#allocation7 + $0xbe8] sm:$0xff] }
 0x209   : > { %7097 = vmatprep.subr.bf16.mxu1 %v7096_v23  ;;  %v1643_v23 = vld [vmem:[#allocation7 + $0xb48] sm:$0xff]  ;;  %v7086_v26 = vpack.c.bf16 %v1626_v18, %v1618_v17  ;;  %v7118_v27 = vpack.c.bf16 %v1628_v21, %v1620_v19  ;;  %v1576_v17 = vld [vmem:[#allocation7 + $0x930] sm:$0xff]  ;;  %v7168_v18 = vpack.c.bf16 %v1585_v10, %v1577_v9 }
 0x20a   : > { %1453 = vmatmul.mubr.f32.vlgmr.msra.gmra.mrb[2].mxu0 %v9447_v57  ;;  %v7088_v28 = vpack.c.bf16 %v1643_v23, %v1635_v22  ;;  %v1584_v19 = vld [vmem:[#allocation7 + $0x970] sm:$0xff]  ;;  %v1599_v21 = vld [vmem:[#allocation7 + $0x9e8] sm:$0xff]  ;;  %v1593_v22 = vld [vmem:[#allocation7 + $0x9b8] sm:$0xff] }
 0x20b   : > { %1524 = vmatmul.mubr.f32.vlgmr.msra.gmra.mrb[2].mxu1 %v9447_v57  ;;  %7067 = vmatpush1.bf16.msra.mxu0 %v7066_v29  ;;  %v7074_v57 = vpack.c.bf16 %v1578_v45, %v1570_v44  ;;  %v1634_v29 = vld [vmem:[#allocation7 + $0xb00] sm:$0xff]  ;;  %v7124_v44 = vpack.c.bf16 %v1661_v37, %v1653_v36  ;;  %v1660_v45 = vld [vmem:[#allocation7 + $0xbd0] sm:$0xff]  ;;  %v1601_v23 = vld [vmem:[#allocation7 + $0x9f8] sm:$0xff]  ;;  %v7170_v25 = vpack.c.bf16 %v1584_v19, %v1576_v17 }
 0x20c   : > { %7099 = vmatpush1.bf16.msra.mxu1 %v7098_v30  ;;  %7069 = vmatprep.subr.bf16.mxu0 %v7068_v31  ;;  %v1642_v30 = vld [vmem:[#allocation7 + $0xb40] sm:$0xff]  ;;  %v1636_v31 = vld [vmem:[#allocation7 + $0xb10] sm:$0xff] }
 0x20d   : > { %7101 = vmatprep.subr.bf16.mxu1 %v7100_v35  ;;  %1730 = vmatprep.mubr.f32.mxu0 %v10278_v11  ;;  %v1659_v35 = vld [vmem:[#allocation7 + $0xbc8] sm:$0xff]  ;;  %v7090_v38 = vpack.c.bf16 %v1642_v30, %v1634_v29  ;;  %v7122_v39 = vpack.c.bf16 %v1644_v33, %v1636_v31  ;;  %v1592_v29 = vld [vmem:[#allocation7 + $0x9b0] sm:$0xff]  ;;  %v7172_v30 = vpack.c.bf16 %v1601_v23, %v1593_v22  ;;  %v2006_v22 = vld [vmem:[#allocation10 + $0x18] sm:$0xff] }
 0x20e   : > { %1801 = vmatprep.mubr.f32.mxu1 %v10278_v11  ;;  %v7092_v40 = vpack.c.bf16 %v1659_v35, %v1651_v34  ;;  %v1600_v31 = vld [vmem:[#allocation7 + $0x9f0] sm:$0xff]  ;;  %v1615_v33 = vld [vmem:[#allocation7 + $0xa68] sm:$0xff]  ;;  %v1609_v34 = vld [vmem:[#allocation7 + $0xa38] sm:$0xff] }
 0x20f   : > { %7071 = vmatpush1.bf16.msra.mxu0 %v7070_v41  ;;  %v1650_v41 = vld [vmem:[#allocation7 + $0xb80] sm:$0xff]  ;;  %v1617_v35 = vld [vmem:[#allocation7 + $0xa78] sm:$0xff]  ;;  %v7174_v37 = vpack.c.bf16 %v1600_v31, %v1592_v29  ;;  %v1664_v17 = vld [vmem:[#allocation7 + $0xbf0] sm:$0xff] }
 0x210   : > { %7103 = vmatpush1.bf16.msra.mxu1 %v7102_v42  ;;  %7073 = vmatprep.subr.bf16.mxu0 %v7072_v43  ;;  %v1658_v42 = vld [vmem:[#allocation7 + $0xbc0] sm:$0xff]  ;;  %v1652_v43 = vld [vmem:[#allocation7 + $0xb90] sm:$0xff]  ;;  %v2005_v29 = vld [vmem:[#allocation10 + $0x10] sm:$0xff] }
 0x211   : > { %7105 = vmatprep.subr.bf16.mxu1 %v7104_v47  ;;  %v1551_v47 = vld [vmem:[#allocation7 + $0x868] sm:$0xff]  ;;  %v7094_v49 = vpack.c.bf16 %v1658_v42, %v1650_v41  ;;  %v7126_v50 = vpack.c.bf16 %v1660_v45, %v1652_v43  ;;  %v1608_v41 = vld [vmem:[#allocation7 + $0xa30] sm:$0xff]  ;;  %v7176_v42 = vpack.c.bf16 %v1617_v35, %v1609_v34  ;;  %v2022_v34 = vld [vmem:[#allocation10 + $0x98] sm:$0xff] }
 0x212   : > { %v7128_v51 = vpack.c.bf16 %v1551_v47, %v1543_v46  ;;  %v1616_v43 = vld [vmem:[#allocation7 + $0xa70] sm:$0xff]  ;;  %v1631_v45 = vld [vmem:[#allocation7 + $0xae8] sm:$0xff]  ;;  %v1625_v46 = vld [vmem:[#allocation7 + $0xab8] sm:$0xff] }
 0x213   : > { %7075 = vmatpush1.bf16.msra.mxu0 %v7074_v57  ;;  %v1542_v57 = vld [vmem:[#allocation7 + $0x820] sm:$0xff]  ;;  %v1633_v47 = vld [vmem:[#allocation7 + $0xaf8] sm:$0xff]  ;;  %v7178_v48 = vpack.c.bf16 %v1616_v43, %v1608_v41 }
 0x214   : > { %7107 = vmatpush1.bf16.msra.mxu1 %v7106_v53  ;;  %7077 = vmatprep.subr.bf16.mxu0 %v7076_v54  ;;  %v1550_v53 = vld [vmem:[#allocation7 + $0x860] sm:$0xff]  ;;  %v1544_v54 = vld [vmem:[#allocation7 + $0x830] sm:$0xff]  ;;  %v2021_v41 = vld [vmem:[#allocation10 + $0x90] sm:$0xff] }
 0x215   : > { %7109 = vmatprep.subr.bf16.mxu1 %v7108_v59  ;;  %v1567_v59 = vld [vmem:[#allocation7 + $0x8e8] sm:$0xff]  ;;  %v7130_v63 = vpack.c.bf16 %v1550_v53, %v1542_v57  ;;  %v7162_v0 = vpack.c.bf16 %v1552_v56, %v1544_v54  ;;  %v1624_v57 = vld [vmem:[#allocation7 + $0xab0] sm:$0xff]  ;;  %v7180_v53 = vpack.c.bf16 %v1633_v47, %v1625_v46  ;;  %v2038_v46 = vld [vmem:[#allocation10 + $0x118] sm:$0xff] }
 0x216   : > { %v1632_v54 = vld [vmem:[#allocation7 + $0xaf0] sm:$0xff]  ;;  %v1647_v56 = vld [vmem:[#allocation7 + $0xb68] sm:$0xff] }
 0x217   : > { %7079 = vmatpush1.bf16.msra.mxu0 %v7078_v1  ;;  %v7132_v1 = vpack.c.bf16 %v1567_v59, %v1559_v58  ;;  %v1641_v58 = vld [vmem:[#allocation7 + $0xb38] sm:$0xff]  ;;  %v7182_v61 = vpack.c.bf16 %v1632_v54, %v1624_v57 }
 0x218   : > { %7111 = vmatpush1.bf16.msra.mxu1 %v7110_v2  ;;  %7081 = vmatprep.subr.bf16.mxu0 %v7080_v3  ;;  %v1558_v2 = vld [vmem:[#allocation7 + $0x8a0] sm:$0xff]  ;;  %v1649_v59 = vld [vmem:[#allocation7 + $0xb78] sm:$0xff] }
 0x219   : > { %7113 = vmatprep.subr.bf16.mxu1 %v7112_v7  ;;  %v1566_v3 = vld [vmem:[#allocation7 + $0x8e0] sm:$0xff]  ;;  %v1575_v7 = vld [vmem:[#allocation7 + $0x928] sm:$0xff]  ;;  %v2037_v57 = vld [vmem:[#allocation10 + $0x110] sm:$0xff] }
 0x21a   : > { %v7134_v12 = vpack.c.bf16 %v1566_v3, %v1558_v2  ;;  %v1640_v2 = vld [vmem:[#allocation7 + $0xb30] sm:$0xff]  ;;  %v7184_v3 = vpack.c.bf16 %v1649_v59, %v1641_v58  ;;  %v2054_v58 = vld [vmem:[#allocation10 + $0x198] sm:$0xff] }
 0x21b   : > { %7083 = vmatpush1.bf16.msra.mxu0 %v7082_v14  ;;  %v7136_v14 = vpack.c.bf16 %v1583_v8, %v1575_v7  ;;  %v1657_v7 = vld [vmem:[#allocation7 + $0xbb8] sm:$0xff]  ;;  %v7186_v10 = vpack.c.bf16 %v1648_v4, %v1640_v2 }
 0x21c   : > { %7115 = vmatpush1.bf16.msra.mxu1 %v7114_v15  ;;  %7085 = vmatprep.subr.bf16.mxu0 %v7084_v16  ;;  %v1574_v15 = vld [vmem:[#allocation7 + $0x920] sm:$0xff]  ;;  %v1665_v8 = vld [vmem:[#allocation7 + $0xbf8] sm:$0xff] }
 0x21d   : > { %7117 = vmatprep.subr.bf16.mxu1 %v7116_v20  ;;  %v1582_v16 = vld [vmem:[#allocation7 + $0x960] sm:$0xff]  ;;  %v1591_v20 = vld [vmem:[#allocation7 + $0x9a8] sm:$0xff]  ;;  %v2053_v2 = vld [vmem:[#allocation10 + $0x190] sm:$0xff] }
 0x21e   : > { %v7138_v24 = vpack.c.bf16 %v1582_v16, %v1574_v15  ;;  %v7188_v15 = vpack.c.bf16 %v1665_v8, %v1657_v7  ;;  %v1656_v16 = vld [vmem:[#allocation7 + $0xbb0] sm:$0xff]  ;;  %v2070_v7 = vld [vmem:[#allocation10 + $0x218] sm:$0xff] }
 0x21f   : > { %7087 = vmatpush1.bf16.msra.mxu0 %v7086_v26  ;;  %v7140_v26 = vpack.c.bf16 %v1599_v21, %v1591_v20  ;;  %v7190_v19 = vpack.c.bf16 %v1664_v17, %v1656_v16  ;;  %v2004_v20 = vld [vmem:[#allocation10 + $0x8] sm:$0xff]  ;;  %v2077_v16 = vld [vmem:[#allocation10 + $0x250] sm:$0xff] }
 0x220   : > { %7119 = vmatpush1.bf16.msra.mxu1 %v7118_v27  ;;  %7089 = vmatprep.subr.bf16.mxu0 %v7088_v28  ;;  %v1590_v27 = vld [vmem:[#allocation7 + $0x9a0] sm:$0xff]  ;;  %v2012_v21 = vld [vmem:[#allocation10 + $0x48] sm:$0xff] }
 0x221   : > { %7121 = vmatprep.subr.bf16.mxu1 %v7120_v32  ;;  %v1598_v28 = vld [vmem:[#allocation7 + $0x9e0] sm:$0xff]  ;;  %v1607_v32 = vld [vmem:[#allocation7 + $0xa28] sm:$0xff]  ;;  %v7192_v23 = vpack.c.bf16 %v2012_v21, %v2004_v20 }
 0x222   : > { %v7142_v36 = vpack.c.bf16 %v1598_v28, %v1590_v27  ;;  %v2086_v20 = vld [vmem:[#allocation10 + $0x298] sm:$0xff] }
 0x223   : > { %7091 = vmatpush1.bf16.msra.mxu0 %v7090_v38  ;;  %v7144_v38 = vpack.c.bf16 %v1615_v33, %v1607_v32  ;;  %v2020_v32 = vld [vmem:[#allocation10 + $0x88] sm:$0xff] }
 0x224   : > { %7123 = vmatpush1.bf16.msra.mxu1 %v7122_v39  ;;  %7093 = vmatprep.subr.bf16.mxu0 %v7092_v40  ;;  %v1606_v39 = vld [vmem:[#allocation7 + $0xa20] sm:$0xff]  ;;  %v2028_v33 = vld [vmem:[#allocation10 + $0xc8] sm:$0xff] }
 0x225   : > { %7125 = vmatprep.subr.bf16.mxu1 %v7124_v44  ;;  %v1614_v40 = vld [vmem:[#allocation7 + $0xa60] sm:$0xff]  ;;  %v1623_v44 = vld [vmem:[#allocation7 + $0xaa8] sm:$0xff]  ;;  %v7196_v35 = vpack.c.bf16 %v2028_v33, %v2020_v32 }
 0x226   : > { %v7146_v52 = vpack.c.bf16 %v1614_v40, %v1606_v39  ;;  %v2102_v32 = vld [vmem:[#allocation10 + $0x318] sm:$0xff] }
 0x227   : > { %7095 = vmatpush1.bf16.msra.mxu0 %v7094_v49  ;;  %v7148_v49 = vpack.c.bf16 %v1631_v45, %v1623_v44  ;;  %v2036_v44 = vld [vmem:[#allocation10 + $0x108] sm:$0xff] }
 0x228   : > { %7127 = vmatpush1.bf16.msra.mxu1 %v7126_v50  ;;  %7129 = vmatprep.subr.bf16.mxu0 %v7128_v51  ;;  %v1622_v50 = vld [vmem:[#allocation7 + $0xaa0] sm:$0xff]  ;;  %v2044_v45 = vld [vmem:[#allocation10 + $0x148] sm:$0xff] }
 0x229   : > { %7161 = vmatprep.subr.bf16.mxu1 %v7160_v55  ;;  %v1630_v51 = vld [vmem:[#allocation7 + $0xae0] sm:$0xff]  ;;  %v1639_v55 = vld [vmem:[#allocation7 + $0xb28] sm:$0xff]  ;;  %v7200_v47 = vpack.c.bf16 %v2044_v45, %v2036_v44 }
 0x22a   : > { %1731 = vmatmul.mubr.f32.vlgmr.msra.gmra.mrb[0].mxu0 %v9457_v62  ;;  %v7150_v60 = vpack.c.bf16 %v1630_v51, %v1622_v50  ;;  %v2118_v44 = vld [vmem:[#allocation10 + $0x398] sm:$0xff] }
 0x22b   : > { %1802 = vmatmul.mubr.f32.vlgmr.msra.gmra.mrb[0].mxu1 %v9457_v62  ;;  %7131 = vmatpush1.bf16.msra.mxu0 %v7130_v63  ;;  %v7152_v63 = vpack.c.bf16 %v1647_v56, %v1639_v55  ;;  %v2052_v55 = vld [vmem:[#allocation10 + $0x188] sm:$0xff] }
 0x22c   : > { %7163 = vmatpush1.bf16.msra.mxu1 %v7162_v0  ;;  %7133 = vmatprep.subr.bf16.mxu0 %v7132_v1  ;;  %v1638_v0 = vld [vmem:[#allocation7 + $0xb20] sm:$0xff]  ;;  %v2060_v56 = vld [vmem:[#allocation10 + $0x1c8] sm:$0xff] }
 0x22d   : > { %7165 = vmatprep.subr.bf16.mxu1 %v7164_v5  ;;  %1872 = vmatprep.mubr.f32.mxu0 %v10278_v11  ;;  %v1646_v1 = vld [vmem:[#allocation7 + $0xb60] sm:$0xff]  ;;  %v1655_v5 = vld [vmem:[#allocation7 + $0xba8] sm:$0xff]  ;;  %v7204_v59 = vpack.c.bf16 %v2060_v56, %v2052_v55 }
 0x22e   : > { %1943 = vmatprep.mubr.f32.mxu1 %v10278_v11  ;;  %v7154_v9 = vpack.c.bf16 %v1646_v1, %v1638_v0  ;;  %v2010_v55 = vld [vmem:[#allocation10 + $0x38] sm:$0xff] }
 0x22f   : > { %7135 = vmatpush1.bf16.msra.mxu0 %v7134_v12  ;;  %v7156_v12 = vpack.c.bf16 %v1663_v6, %v1655_v5  ;;  %v2068_v5 = vld [vmem:[#allocation10 + $0x208] sm:$0xff] }
 0x230   : > { %7167 = vmatpush1.bf16.msra.mxu1 %v7166_v13  ;;  %7137 = vmatprep.subr.bf16.mxu0 %v7136_v14  ;;  %v1654_v13 = vld [vmem:[#allocation7 + $0xba0] sm:$0xff]  ;;  %v2076_v6 = vld [vmem:[#allocation10 + $0x248] sm:$0xff] }
 0x231   : > { %7169 = vmatprep.subr.bf16.mxu1 %v7168_v18  ;;  %v1662_v14 = vld [vmem:[#allocation7 + $0xbe0] sm:$0xff]  ;;  %v7208_v8 = vpack.c.bf16 %v2076_v6, %v2068_v5 }
 0x232   : > { %v7158_v18 = vpack.c.bf16 %v1662_v14, %v1654_v13 }
 0x233   : > { %7139 = vmatpush1.bf16.msra.mxu0 %v7138_v24  ;;  %v2014_v24 = vld [vmem:[#allocation10 + $0x58] sm:$0xff] }
 0x234   : > { %7171 = vmatpush1.bf16.msra.mxu1 %v7170_v25  ;;  %7141 = vmatprep.subr.bf16.mxu0 %v7140_v26  ;;  %v2003_v25 = vld [vmem:[#allocation10] sm:$0xff]  ;;  %v7224_v27 = vpack.c.bf16 %v2014_v24, %v2006_v22  ;;  %v2094_v22 = vld [vmem:[#allocation10 + $0x2d8] sm:$0xff] }
 0x235   : > { %7173 = vmatprep.subr.bf16.mxu1 %v7172_v30  ;;  %v2011_v26 = vld [vmem:[#allocation10 + $0x40] sm:$0xff]  ;;  %v2013_v30 = vld [vmem:[#allocation10 + $0x50] sm:$0xff] }
 0x236   : > { %v7194_v28 = vpack.c.bf16 %v2011_v26, %v2003_v25  ;;  %v7226_v31 = vpack.c.bf16 %v2013_v30, %v2005_v29  ;;  %v2091_v24 = vld [vmem:[#allocation10 + $0x2c0] sm:$0xff]  ;;  %v7244_v25 = vpack.c.bf16 %v2094_v22, %v2086_v20  ;;  %v2100_v30 = vld [vmem:[#allocation10 + $0x308] sm:$0xff] }
 0x237   : > { %7143 = vmatpush1.bf16.msra.mxu0 %v7142_v36  ;;  %v2030_v36 = vld [vmem:[#allocation10 + $0xd8] sm:$0xff] }
 0x238   : > { %7175 = vmatpush1.bf16.msra.mxu1 %v7174_v37  ;;  %7145 = vmatprep.subr.bf16.mxu0 %v7144_v38  ;;  %v2019_v37 = vld [vmem:[#allocation10 + $0x80] sm:$0xff]  ;;  %v7228_v39 = vpack.c.bf16 %v2030_v36, %v2022_v34  ;;  %v2110_v34 = vld [vmem:[#allocation10 + $0x358] sm:$0xff] }
 0x239   : > { %7177 = vmatprep.subr.bf16.mxu1 %v7176_v42  ;;  %v2027_v38 = vld [vmem:[#allocation10 + $0xc0] sm:$0xff]  ;;  %v2029_v42 = vld [vmem:[#allocation10 + $0xd0] sm:$0xff] }
 0x23a   : > { %v7198_v40 = vpack.c.bf16 %v2027_v38, %v2019_v37  ;;  %v7230_v43 = vpack.c.bf16 %v2029_v42, %v2021_v41  ;;  %v2107_v36 = vld [vmem:[#allocation10 + $0x340] sm:$0xff]  ;;  %v7248_v37 = vpack.c.bf16 %v2110_v34, %v2102_v32  ;;  %v2116_v42 = vld [vmem:[#allocation10 + $0x388] sm:$0xff] }
 0x23b   : > { %7147 = vmatpush1.bf16.msra.mxu0 %v7146_v52  ;;  %v2046_v52 = vld [vmem:[#allocation10 + $0x158] sm:$0xff] }
 0x23c   : > { %7179 = vmatpush1.bf16.msra.mxu1 %v7178_v48  ;;  %7149 = vmatprep.subr.bf16.mxu0 %v7148_v49  ;;  %v2035_v48 = vld [vmem:[#allocation10 + $0x100] sm:$0xff]  ;;  %v7232_v50 = vpack.c.bf16 %v2046_v52, %v2038_v46  ;;  %v2126_v46 = vld [vmem:[#allocation10 + $0x3d8] sm:$0xff] }
 0x23d   : > { %7181 = vmatprep.subr.bf16.mxu1 %v7180_v53  ;;  %v2043_v49 = vld [vmem:[#allocation10 + $0x140] sm:$0xff]  ;;  %v2045_v53 = vld [vmem:[#allocation10 + $0x150] sm:$0xff] }
 0x23e   : > { %v7202_v51 = vpack.c.bf16 %v2043_v49, %v2035_v48  ;;  %v7234_v54 = vpack.c.bf16 %v2045_v53, %v2037_v57  ;;  %v2123_v52 = vld [vmem:[#allocation10 + $0x3c0] sm:$0xff]  ;;  %v7252_v48 = vpack.c.bf16 %v2126_v46, %v2118_v44  ;;  %v2008_v53 = vld [vmem:[#allocation10 + $0x28] sm:$0xff] }
 0x23f   : > { %7151 = vmatpush1.bf16.msra.mxu0 %v7150_v60  ;;  %v2062_v60 = vld [vmem:[#allocation10 + $0x1d8] sm:$0xff]  ;;  %v2024_v44 = vld [vmem:[#allocation10 + $0xa8] sm:$0xff] }
 0x240   : > { %7183 = vmatpush1.bf16.msra.mxu1 %v7182_v61  ;;  %7153 = vmatprep.subr.bf16.mxu0 %v7152_v63  ;;  %v2051_v61 = vld [vmem:[#allocation10 + $0x180] sm:$0xff]  ;;  %v7236_v0 = vpack.c.bf16 %v2062_v60, %v2054_v58  ;;  %v2018_v58 = vld [vmem:[#allocation10 + $0x78] sm:$0xff]  ;;  %v10277_v60 = vlaneseq  ;;  %v2032_v46 = vld [vmem:[#allocation10 + $0xe8] sm:$0xff] }
 0x241   : > { %7185 = vmatprep.subr.bf16.mxu1 %v7184_v3  ;;  %v2059_v63 = vld [vmem:[#allocation10 + $0x1c0] sm:$0xff]  ;;  %v2061_v3 = vld [vmem:[#allocation10 + $0x1d0] sm:$0xff] }
 0x242   : > { %v7206_v1 = vpack.c.bf16 %v2059_v63, %v2051_v61  ;;  %v7238_v4 = vpack.c.bf16 %v2061_v3, %v2053_v2  ;;  %v9468_v61 = vshrl.u32 %v10277_v60, 7 }
 0x243   : > { %7155 = vmatpush1.bf16.msra.mxu0 %v7154_v9  ;;  %v2078_v9 = vld [vmem:[#allocation10 + $0x258] sm:$0xff] }
 0x244   : > { %7187 = vmatpush1.bf16.msra.mxu1 %v7186_v10  ;;  %7157 = vmatprep.subr.bf16.mxu0 %v7156_v12  ;;  %v2067_v10 = vld [vmem:[#allocation10 + $0x200] sm:$0xff]  ;;  %v7240_v13 = vpack.c.bf16 %v2078_v9, %v2070_v7  ;;  %v1072_v63 = vsub.s32 0, %v9468_v61 }
 0x245   : > { %7189 = vmatprep.subr.bf16.mxu1 %v7188_v15  ;;  %v2075_v12 = vld [vmem:[#allocation10 + $0x240] sm:$0xff]  ;;  %v2069_v15 = vld [vmem:[#allocation10 + $0x210] sm:$0xff] }
 0x246   : > { %v7210_v14 = vpack.c.bf16 %v2075_v12, %v2067_v10  ;;  %v7242_v17 = vpack.c.bf16 %v2077_v16, %v2069_v15  ;;  %v1084_v15 = vsub.s32 3, %v9468_v61  ;;  %v1080_v16 = vsub.s32 2, %v9468_v61 }
 0x247   : > { %7159 = vmatpush1.bf16.msra.mxu0 %v7158_v18  ;;  %v2084_v18 = vld [vmem:[#allocation10 + $0x288] sm:$0xff] }
 0x248   : > { %7191 = vmatpush1.bf16.msra.mxu1 %v7190_v19  ;;  %7193 = vmatprep.subr.bf16.mxu0 %v7192_v23  ;;  %v2092_v19 = vld [vmem:[#allocation10 + $0x2c8] sm:$0xff]  ;;  %v2083_v23 = vld [vmem:[#allocation10 + $0x280] sm:$0xff] }
 0x249   : > { %7225 = vmatprep.subr.bf16.mxu1 %v7224_v27  ;;  %v7212_v21 = vpack.c.bf16 %v2092_v19, %v2084_v18  ;;  %v7214_v26 = vpack.c.bf16 %v2091_v24, %v2083_v23  ;;  %v2085_v27 = vld [vmem:[#allocation10 + $0x290] sm:$0xff]  ;;  %v1092_v24 = vsub.s32 5, %v9468_v61 }
 0x24a   : > { %1873 = vmatmul.mubr.f32.vlgmr.msra.gmra.mrb[2].mxu0 %v9457_v62 }
 0x24b   : > { %1944 = vmatmul.mubr.f32.vlgmr.msra.gmra.mrb[2].mxu1 %v9457_v62  ;;  %2195 = vmatprep.mubr.f32.mxu0 %v10278_v11 }
 0x24c   : > { %2266 = vmatprep.mubr.f32.mxu1 %v10278_v11  ;;  %7195 = vmatpush1.bf16.msra.mxu0 %v7194_v28  ;;  %v2093_v28 = vld [vmem:[#allocation10 + $0x2d0] sm:$0xff] }
 0x24d   : > { %7227 = vmatpush1.bf16.msra.mxu1 %v7226_v31  ;;  %7197 = vmatprep.subr.bf16.mxu0 %v7196_v35  ;;  %v7246_v29 = vpack.c.bf16 %v2093_v28, %v2085_v27  ;;  %v2108_v31 = vld [vmem:[#allocation10 + $0x348] sm:$0xff]  ;;  %v2099_v35 = vld [vmem:[#allocation10 + $0x300] sm:$0xff] }
 0x24e   : > { %7229 = vmatprep.subr.bf16.mxu1 %v7228_v39  ;;  %v7216_v33 = vpack.c.bf16 %v2108_v31, %v2100_v30  ;;  %v7218_v38 = vpack.c.bf16 %v2107_v36, %v2099_v35  ;;  %v2101_v39 = vld [vmem:[#allocation10 + $0x310] sm:$0xff] }
 0x250   : > { %7199 = vmatpush1.bf16.msra.mxu0 %v7198_v40  ;;  %v2109_v40 = vld [vmem:[#allocation10 + $0x350] sm:$0xff] }
 0x251   : > { %7231 = vmatpush1.bf16.msra.mxu1 %v7230_v43  ;;  %7201 = vmatprep.subr.bf16.mxu0 %v7200_v47  ;;  %v7250_v41 = vpack.c.bf16 %v2109_v40, %v2101_v39  ;;  %v2124_v43 = vld [vmem:[#allocation10 + $0x3c8] sm:$0xff]  ;;  %v2115_v47 = vld [vmem:[#allocation10 + $0x380] sm:$0xff] }
 0x252   : > { %7233 = vmatprep.subr.bf16.mxu1 %v7232_v50  ;;  %v7220_v45 = vpack.c.bf16 %v2124_v43, %v2116_v42  ;;  %v7222_v49 = vpack.c.bf16 %v2123_v52, %v2115_v47  ;;  %v2117_v50 = vld [vmem:[#allocation10 + $0x390] sm:$0xff]  ;;  %v2007_v39 = vld [vmem:[#allocation10 + $0x20] sm:$0xff]  ;;  %v2026_v47 = vld [vmem:[#allocation10 + $0xb8] sm:$0xff] }
 0x253   : > { %v2015_v40 = vld [vmem:[#allocation10 + $0x60] sm:$0xff]  ;;  %v2009_v42 = vld [vmem:[#allocation10 + $0x30] sm:$0xff]  ;;  %v2034_v52 = vld [vmem:[#allocation10 + $0xf8] sm:$0xff] }
 0x254   : > { %7203 = vmatpush1.bf16.msra.mxu0 %v7202_v51  ;;  %v2125_v51 = vld [vmem:[#allocation10 + $0x3d0] sm:$0xff] }
 0x255   : > { %7235 = vmatpush1.bf16.msra.mxu1 %v7234_v54  ;;  %7205 = vmatprep.subr.bf16.mxu0 %v7204_v59  ;;  %v7254_v57 = vpack.c.bf16 %v2125_v51, %v2117_v50  ;;  %v2016_v54 = vld [vmem:[#allocation10 + $0x68] sm:$0xff]  ;;  %v7288_v59 = vpack.c.bf16 %v2018_v58, %v2010_v55  ;;  %v2017_v43 = vld [vmem:[#allocation10 + $0x70] sm:$0xff]  ;;  %v7258_v51 = vpack.c.bf16 %v2015_v40, %v2007_v39 }
 0x256   : > { %7237 = vmatprep.subr.bf16.mxu1 %v7236_v0  ;;  %v7256_v56 = vpack.c.bf16 %v2016_v54, %v2008_v53  ;;  %v9471_v0 = vld [vmem:[#allocation8] sm:$0xff]  ;;  %v2023_v53 = vld [vmem:[#allocation10 + $0xa0] sm:$0xff]  ;;  %v7292_v58 = vpack.c.bf16 %v2034_v52, %v2026_v47  ;;  %v2072_v39 = vld [vmem:[#allocation10 + $0x228] sm:$0xff] }
 0x257   : > { %v1073_v2 = vrot.slane %v9471_v0, %v1072_v63  ;;  %v1085_v18 = vrot.slane %v9471_v0, %v1084_v15  ;;  %v1081_v19 = vrot.slane %v9471_v0, %v1080_v16  ;;  %v1093_v30 = vrot.slane %v9471_v0, %v1092_v24  ;;  %v2031_v54 = vld [vmem:[#allocation10 + $0xe0] sm:$0xff] }
 0x258   : > { %7207 = vmatpush1.bf16.msra.mxu0 %v7206_v1  ;;  %v1076_v1 = vsub.s32 1, %v9468_v61  ;;  %v2071_v52 = vld [vmem:[#allocation10 + $0x220] sm:$0xff] }
 0x259   : > { %7239 = vmatpush1.bf16.msra.mxu1 %v7238_v4  ;;  %7209 = vmatprep.subr.bf16.mxu0 %v7208_v8 }
 0x25a   : > { %7241 = vmatprep.subr.bf16.mxu1 %v7240_v13  ;;  %v1077_v4 = vrot.slane %v9471_v0, %v1076_v1 }
 0x25c   : > { %7211 = vmatpush1.bf16.msra.mxu0 %v7210_v14 }
 0x25d   : > { %7243 = vmatpush1.bf16.msra.mxu1 %v7242_v17  ;;  %7213 = vmatprep.subr.bf16.mxu0 %v7212_v21  ;;  %v1088_v21 = vsub.s32 4, %v9468_v61 }
 0x25e   : > { %7245 = vmatprep.subr.bf16.mxu1 %v7244_v25 }
 0x25f   : > { %v1089_v27 = vrot.slane %v9471_v0, %v1088_v21 }
 0x260   : > { %7215 = vmatpush1.bf16.msra.mxu0 %v7214_v26 }
 0x261   : > { %7247 = vmatpush1.bf16.msra.mxu1 %v7246_v29  ;;  %7217 = vmatprep.subr.bf16.mxu0 %v7216_v33 }
 0x262   : > { %7249 = vmatprep.subr.bf16.mxu1 %v7248_v37 }
 0x264   : > { %7219 = vmatpush1.bf16.msra.mxu0 %v7218_v38 }
 0x265   : > { %7251 = vmatpush1.bf16.msra.mxu1 %v7250_v41  ;;  %7221 = vmatprep.subr.bf16.mxu0 %v7220_v45 }
 0x266   : > { %7253 = vmatprep.subr.bf16.mxu1 %v7252_v48 }
 0x268   : > { %7223 = vmatpush1.bf16.msra.mxu0 %v7222_v49  ;;  %v8475_v49 = vld [vmem:[#allocation21] sm:$0xff] }
 0x269   : > { %7255 = vmatpush1.bf16.msra.mxu1 %v7254_v57  ;;  %7257 = vmatprep.subr.bf16.mxu0 %v7256_v56  ;;  %v7290_v57 = vpack.c.bf16 %v2017_v43, %v2009_v42  ;;  %v7260_v56 = vpack.c.bf16 %v2032_v46, %v2024_v44  ;;  %v2074_v42 = vld [vmem:[#allocation10 + $0x238] sm:$0xff] }
 0x26a   : > { %7289 = vmatprep.subr.bf16.mxu1 %v7288_v59  ;;  %v2025_v59 = vld [vmem:[#allocation10 + $0xb0] sm:$0xff]  ;;  %v2082_v43 = vld [vmem:[#allocation10 + $0x278] sm:$0xff] }
 0x2fd   : > { %v1732_v3 = vpop.f32.mrb[0].mxu0 }
 0x2fe   : > { %v8160_v5 = vadd.f32 %v1732_v3, %v1073_v2  ;;  %v1803_v6 = vpop.f32.mrb[0].mxu1  ;;  %v1734_v7 = vpop.f32.mrb[1].mxu0  ;;  %v2033_v2 = vld [vmem:[#allocation10 + $0xf0] sm:$0xff]  ;;  %v2040_v3 = vld [vmem:[#allocation10 + $0x128] sm:$0xff] }
 0x2ff   : > { %v1805_v8 = vpop.f32.mrb[1].mxu1  ;;  %v8161_v10 = vadd.f32 %v1734_v7, %v1077_v4  ;;  %v8162_v25 = vadd.f32 %v1803_v6, %v1081_v19  ;;  %v2042_v6 = vld [vmem:[#allocation10 + $0x138] sm:$0xff]  ;;  %v2049_v19 = vld [vmem:[#allocation10 + $0x170] sm:$0xff] }
 0x300   : > { %v5802_v9 = vmul.f32 -1.442695, %v8160_v5  ;;  %v8163_v22 = vadd.f32 %v1805_v8, %v1085_v18  ;;  %v2048_v5 = vld [vmem:[#allocation10 + $0x168] sm:$0xff]  ;;  %v2050_v7 = vld [vmem:[#allocation10 + $0x178] sm:$0xff]  ;;  %v2041_v18 = vld [vmem:[#allocation10 + $0x130] sm:$0xff] }
 0x301   : > { %v5803_v12 = vmul.f32 -1.442695, %v8161_v10  ;;  %v7294_v10 = vpack.c.bf16 %v2033_v2, %v2025_v59  ;;  %v2098_v59 = vld [vmem:[#allocation10 + $0x2f8] sm:$0xff] }
 0x302   : > { %8401 = vpow2.f32 %v5802_v9  ;;  %v7262_v9 = vpack.c.bf16 %v2031_v54, %v2023_v53  ;;  %v2088_v53 = vld [vmem:[#allocation10 + $0x2a8] sm:$0xff] }
 0x303   : > { %8403 = vpow2.f32 %v5803_v12  ;;  %v2039_v12 = vld [vmem:[#allocation10 + $0x120] sm:$0xff] }
 0x30c   : > { %v8402_v13 = vpop.eup %8401 }
 0x30d   : > { %v1961_v14 = vadd.f32 1.0, %v8402_v13  ;;  %v8404_v17 = vpop.eup %8403  ;;  %v2047_v13 = vld [vmem:[#allocation10 + $0x160] sm:$0xff] }
 0x30e   : > { %v1967_v20 = vadd.f32 1.0, %v8404_v17  ;;  %v7296_v17 = vpack.c.bf16 %v2050_v7, %v2042_v6  ;;  %v2087_v6 = vld [vmem:[#allocation10 + $0x2a0] sm:$0xff] }
 0x30f   : > { %8405 = vrcp.f32 %v1961_v14  ;;  %v7264_v14 = vpack.c.bf16 %v2048_v5, %v2040_v3  ;;  %v2095_v7 = vld [vmem:[#allocation10 + $0x2e0] sm:$0xff] }
 0x310   : > { %8407 = vrcp.f32 %v1967_v20  ;;  %v2056_v20 = vld [vmem:[#allocation10 + $0x1a8] sm:$0xff] }
 0x319   : > { %v8406_v23 = vpop.eup %8405 }
 0x31a   : > { %v1970_v26 = vmul.f32 %v8406_v23, %v8163_v22  ;;  %v8408_v37 = vpop.eup %8407  ;;  %v1100_v22 = vsub.s32 7, %v9468_v61  ;;  %v2064_v23 = vld [vmem:[#allocation10 + $0x1e8] sm:$0xff] }
 0x31b   : > { %v1973_v41 = vsub.f32 1.0, %v8408_v37  ;;  %v1975_v50 = vmul.f32 %v8475_v49, %v8408_v37  ;;  %v2057_v37 = vld [vmem:[#allocation10 + $0x1b0] sm:$0xff] }
 0x31c   : > { %v1971_v28 = vadd.f32 %v8162_v25, %v1970_v26  ;;  %v2058_v25 = vld [vmem:[#allocation10 + $0x1b8] sm:$0xff]  ;;  %v1101_v40 = vrot.slane %v9471_v0, %v1100_v22 }
 0x31d   : > { %v1874_v29 = vpop.f32.mrb[2].mxu0  ;;  %v2066_v26 = vld [vmem:[#allocation10 + $0x1f8] sm:$0xff] }
 0x31e   : > { %8409 = vtanh.f32 %v1971_v28  ;;  %v8164_v31 = vadd.f32 %v1874_v29, %v1089_v27  ;;  %v9496_v32 = vpop.f32.mrb[2].mxu1  ;;  %v1876_v33 = vpop.f32.mrb[3].mxu0  ;;  %v1096_v27 = vsub.s32 6, %v9468_v61  ;;  %v7266_v28 = vpack.c.bf16 %v2047_v13, %v2039_v12  ;;  %v2104_v12 = vld [vmem:[#allocation10 + $0x328] sm:$0xff] }
 0x31f   : > { %v9498_v34 = vpop.f32.mrb[3].mxu1  ;;  %v8165_v36 = vadd.f32 %v1876_v33, %v1093_v30  ;;  %v7298_v29 = vpack.c.bf16 %v2049_v19, %v2041_v18  ;;  %v2055_v30 = vld [vmem:[#allocation10 + $0x1a0] sm:$0xff]  ;;  %v2114_v18 = vld [vmem:[#allocation10 + $0x378] sm:$0xff] }
 0x320   : > { %v5804_v35 = vmul.f32 -1.442695, %v8164_v31  ;;  %v2063_v31 = vld [vmem:[#allocation10 + $0x1e0] sm:$0xff]  ;;  %v1097_v44 = vrot.slane %v9471_v0, %v1096_v27  ;;  %v8167_v54 = vadd.f32 %v9498_v34, %v1101_v40  ;;  %v2097_v34 = vld [vmem:[#allocation10 + $0x2f0] sm:$0xff] }
 0x321   : > { %v5805_v38 = vmul.f32 -1.442695, %v8165_v36  ;;  %v7300_v36 = vpack.c.bf16 %v2066_v26, %v2058_v25  ;;  %v7270_v46 = vpack.c.bf16 %v2063_v31, %v2055_v30  ;;  %v2120_v30 = vld [vmem:[#allocation10 + $0x3a8] sm:$0xff] }
 0x322   : > { %8411 = vpow2.f32 %v5804_v35  ;;  %v7268_v35 = vpack.c.bf16 %v2064_v23, %v2056_v20  ;;  %v8166_v3 = vadd.f32 %v9496_v32, %v1097_v44  ;;  %v7278_v32 = vpack.c.bf16 %v2095_v7, %v2087_v6  ;;  %v2103_v20 = vld [vmem:[#allocation10 + $0x320] sm:$0xff]  ;;  %v2128_v31 = vld [vmem:[#allocation10 + $0x3e8] sm:$0xff] }
 0x323   : > { %8413 = vpow2.f32 %v5805_v38  ;;  %v2065_v38 = vld [vmem:[#allocation10 + $0x1f0] sm:$0xff]  ;;  %v2111_v23 = vld [vmem:[#allocation10 + $0x360] sm:$0xff]  ;;  %v7284_v40 = vpack.c.bf16 %v2128_v31, %v2120_v30  ;;  %v2465_v44 = vld [vmem:[#allocation10 + $0x408] sm:$0xff] }
 0x324   : > { %v7302_v47 = vpack.c.bf16 %v2065_v38, %v2057_v37  ;;  %v2119_v38 = vld [vmem:[#allocation10 + $0x3a0] sm:$0xff]  ;;  %v2498_v30 = vld [vmem:[#allocation10 + $0x510] sm:$0xff] }
 0x325   : > { %v2506_v31 = vld [vmem:[#allocation10 + $0x550] sm:$0xff] }
 0x328   : > { %v8410_v45 = vpop.eup %8409 }
 0x329   : > { %v1974_v48 = vmul.f32 %v8410_v45, %v1973_v41  ;;  %v2080_v41 = vld [vmem:[#allocation10 + $0x268] sm:$0xff] }
 0x32a   : > { %v7272_v49 = vpack.c.bf16 %v2080_v41, %v2072_v39  ;;  %v2127_v39 = vld [vmem:[#allocation10 + $0x3e0] sm:$0xff] }
 0x32b   : > { %v9500_v55 = vadd.f32 %v1975_v50, %v1974_v48  ;;  %v2079_v48 = vld [vmem:[#allocation10 + $0x260] sm:$0xff]  ;;  %v7304_v50 = vpack.c.bf16 %v2082_v43, %v2074_v42  ;;  %v2121_v42 = vld [vmem:[#allocation10 + $0x3b0] sm:$0xff] }
 0x32c   : > { %v8412_v4 = vpop.eup %8411  ;;  %v7274_v2 = vpack.c.bf16 %v2079_v48, %v2071_v52  ;;  %v2129_v43 = vld [vmem:[#allocation10 + $0x3f0] sm:$0xff]  ;;  %v2475_v52 = vld [vmem:[#allocation10 + $0x458] sm:$0xff]  ;;  %v7286_v48 = vpack.c.bf16 %v2127_v39, %v2119_v38  ;;  %v7362_v38 = vpack.c.bf16 %v2506_v31, %v2498_v30  ;;  %v2512_v39 = vld [vmem:[#allocation10 + $0x580] sm:$0xff] }
 0x32d   : > { %v1981_v8 = vadd.f32 1.0, %v8412_v4  ;;  %2196 = vmatmul.mubr.f32.vlgmr.msra.gmra.mrb[4].mxu0 %v9500_v55  ;;  %1977 = vst [vmem:[#allocation21] sm:$0xff] %v9500_v55  ;;  %2267 = vmatmul.mubr.f32.vlgmr.msra.gmra.mrb[4].mxu1 %v9500_v55  ;;  %v8414_v33 = vpop.eup %8413  ;;  %v2579_v30 = vld [vmem:[#allocation10 + $0x798] sm:$0xff] }
 0x32e   : > { %7259 = vmatpush1.bf16.msra.mxu0 %v7258_v51  ;;  %7291 = vmatpush1.bf16.msra.mxu1 %v7290_v57  ;;  %v1987_v45 = vadd.f32 1.0, %v8414_v33  ;;  %v2073_v51 = vld [vmem:[#allocation10 + $0x230] sm:$0xff]  ;;  %v2122_v33 = vld [vmem:[#allocation10 + $0x3b8] sm:$0xff] }
 0x32f   : > { %8415 = vrcp.f32 %v1981_v8  ;;  %7261 = vmatprep.subr.bf16.mxu0 %v7260_v56  ;;  %7293 = vmatprep.subr.bf16.mxu1 %v7292_v58  ;;  %v2081_v57 = vld [vmem:[#allocation10 + $0x270] sm:$0xff]  ;;  %v2096_v56 = vld [vmem:[#allocation10 + $0x2e8] sm:$0xff]  ;;  %v2090_v58 = vld [vmem:[#allocation10 + $0x2b8] sm:$0xff] }
 0x330   : > { %2337 = vmatprep.mubr.f32.mxu0 %v10278_v11  ;;  %2408 = vmatprep.mubr.f32.mxu1 %v10278_v11  ;;  %8417 = vrcp.f32 %v1987_v45  ;;  %v7306_v5 = vpack.c.bf16 %v2081_v57, %v2073_v51  ;;  %v7276_v8 = vpack.c.bf16 %v2096_v56, %v2088_v53  ;;  %v2472_v51 = vld [vmem:[#allocation10 + $0x440] sm:$0xff]  ;;  %v2466_v56 = vld [vmem:[#allocation10 + $0x410] sm:$0xff]  ;;  %v2587_v31 = vld [vmem:[#allocation10 + $0x7d8] sm:$0xff] }
 0x332   : > { %7263 = vmatpush1.bf16.msra.mxu0 %v7262_v9  ;;  %7295 = vmatpush1.bf16.msra.mxu1 %v7294_v10  ;;  %v7308_v9 = vpack.c.bf16 %v2098_v59, %v2090_v58  ;;  %v2089_v10 = vld [vmem:[#allocation10 + $0x2b0] sm:$0xff]  ;;  %v2481_v59 = vld [vmem:[#allocation10 + $0x488] sm:$0xff] }
 0x333   : > { %7265 = vmatprep.subr.bf16.mxu0 %v7264_v14  ;;  %7297 = vmatprep.subr.bf16.mxu1 %v7296_v17  ;;  %v2112_v14 = vld [vmem:[#allocation10 + $0x368] sm:$0xff]  ;;  %v2106_v17 = vld [vmem:[#allocation10 + $0x338] sm:$0xff]  ;;  %v7310_v19 = vpack.c.bf16 %v2097_v34, %v2089_v10  ;;  %v2474_v58 = vld [vmem:[#allocation10 + $0x450] sm:$0xff] }
 0x334   : > { %v7280_v25 = vpack.c.bf16 %v2112_v14, %v2104_v12  ;;  %v7312_v26 = vpack.c.bf16 %v2114_v18, %v2106_v17  ;;  %v2488_v10 = vld [vmem:[#allocation10 + $0x4c0] sm:$0xff]  ;;  %v2490_v14 = vld [vmem:[#allocation10 + $0x4d0] sm:$0xff]  ;;  %v2497_v17 = vld [vmem:[#allocation10 + $0x508] sm:$0xff] }
 0x336   : > { %7267 = vmatpush1.bf16.msra.mxu0 %v7266_v28  ;;  %7299 = vmatpush1.bf16.msra.mxu1 %v7298_v29  ;;  %v2105_v28 = vld [vmem:[#allocation10 + $0x330] sm:$0xff] }
 0x337   : > { %7269 = vmatprep.subr.bf16.mxu0 %v7268_v35  ;;  %7301 = vmatprep.subr.bf16.mxu1 %v7300_v36  ;;  %v2113_v29 = vld [vmem:[#allocation10 + $0x370] sm:$0xff]  ;;  %v2130_v35 = vld [vmem:[#allocation10 + $0x3f8] sm:$0xff]  ;;  %v7282_v36 = vpack.c.bf16 %v2111_v23, %v2103_v20 }
 0x338   : > { %v7314_v37 = vpack.c.bf16 %v2113_v29, %v2105_v28  ;;  %v7316_v41 = vpack.c.bf16 %v2130_v35, %v2122_v33  ;;  %v2507_v20 = vld [vmem:[#allocation10 + $0x558] sm:$0xff]  ;;  %v2513_v33 = vld [vmem:[#allocation10 + $0x588] sm:$0xff] }
 0x339   : > { %v8416_v0 = vpop.eup %8415  ;;  %v2521_v35 = vld [vmem:[#allocation10 + $0x5c8] sm:$0xff] }
 0x33a   : > { %v1990_v4 = vmul.f32 %v8416_v0, %v8167_v54  ;;  %7271 = vmatpush1.bf16.msra.mxu0 %v7270_v46  ;;  %7303 = vmatpush1.bf16.msra.mxu1 %v7302_v47  ;;  %v8418_v45 = vpop.eup %8417  ;;  %v2473_v46 = vld [vmem:[#allocation10 + $0x448] sm:$0xff]  ;;  %v2467_v47 = vld [vmem:[#allocation10 + $0x418] sm:$0xff] }
 0x33b   : > { %7273 = vmatprep.subr.bf16.mxu0 %v7272_v49  ;;  %7305 = vmatprep.subr.bf16.mxu1 %v7304_v50  ;;  %v7318_v49 = vpack.c.bf16 %v2129_v43, %v2121_v42  ;;  %v2464_v50 = vld [vmem:[#allocation10 + $0x400] sm:$0xff]  ;;  %v1993_v57 = vsub.f32 1.0, %v8418_v45  ;;  %v7320_v53 = vpack.c.bf16 %v2473_v46, %v2465_v44  ;;  %v7352_v54 = vpack.c.bf16 %v2475_v52, %v2467_v47  ;;  %v2514_v43 = vld [vmem:[#allocation10 + $0x590] sm:$0xff]  ;;  %v2537_v46 = vld [vmem:[#allocation10 + $0x648] sm:$0xff] }
 0x33c   : > { %v1991_v13 = vadd.f32 %v8166_v3, %v1990_v4  ;;  %v2483_v3 = vld [vmem:[#allocation10 + $0x498] sm:$0xff]  ;;  %v1995_v6 = vmul.f32 %v8418_v45, %v9457_v62  ;;  %v7322_v7 = vpack.c.bf16 %v2472_v51, %v2464_v50  ;;  %v2522_v44 = vld [vmem:[#allocation10 + $0x5d0] sm:$0xff]  ;;  %v2529_v45 = vld [vmem:[#allocation10 + $0x608] sm:$0xff] }
 0x33d   : > { %v2491_v4 = vld [vmem:[#allocation10 + $0x4d8] sm:$0xff]  ;;  %v2528_v50 = vld [vmem:[#allocation10 + $0x600] sm:$0xff] }
 0x33e   : > { %8419 = vtanh.f32 %v1991_v13  ;;  %7275 = vmatpush1.bf16.msra.mxu0 %v7274_v2  ;;  %7307 = vmatpush1.bf16.msra.mxu1 %v7306_v5  ;;  %v2489_v2 = vld [vmem:[#allocation10 + $0x4c8] sm:$0xff]  ;;  %v7356_v12 = vpack.c.bf16 %v2491_v4, %v2483_v3  ;;  %v2482_v13 = vld [vmem:[#allocation10 + $0x490] sm:$0xff]  ;;  %v2531_v47 = vld [vmem:[#allocation10 + $0x618] sm:$0xff] }
 0x33f   : > { %7277 = vmatprep.subr.bf16.mxu0 %v7276_v8  ;;  %7309 = vmatprep.subr.bf16.mxu1 %v7308_v9  ;;  %v7354_v8 = vpack.c.bf16 %v2474_v58, %v2466_v56  ;;  %v2480_v9 = vld [vmem:[#allocation10 + $0x480] sm:$0xff]  ;;  %v7324_v34 = vpack.c.bf16 %v2489_v2, %v2481_v59  ;;  %v7358_v23 = vpack.c.bf16 %v2490_v14, %v2482_v13  ;;  %v2539_v52 = vld [vmem:[#allocation10 + $0x658] sm:$0xff]  ;;  %v2538_v56 = vld [vmem:[#allocation10 + $0x650] sm:$0xff] }
 0x340   : > { %v7326_v62 = vpack.c.bf16 %v2488_v10, %v2480_v9  ;;  %v2536_v51 = vld [vmem:[#allocation10 + $0x640] sm:$0xff]  ;;  %v2545_v58 = vld [vmem:[#allocation10 + $0x688] sm:$0xff]  ;;  %v2555_v2 = vld [vmem:[#allocation10 + $0x6d8] sm:$0xff] }
 0x341   : > { %v2553_v59 = vld [vmem:[#allocation10 + $0x6c8] sm:$0xff]  ;;  %v7338_v3 = vpack.c.bf16 %v2536_v51, %v2528_v50  ;;  %v2546_v9 = vld [vmem:[#allocation10 + $0x690] sm:$0xff]  ;;  %v2563_v13 = vld [vmem:[#allocation10 + $0x718] sm:$0xff] }
 0x342   : > { %7279 = vmatpush1.bf16.msra.mxu0 %v7278_v32  ;;  %7311 = vmatpush1.bf16.msra.mxu1 %v7310_v19  ;;  %v2505_v32 = vld [vmem:[#allocation10 + $0x548] sm:$0xff]  ;;  %v2499_v19 = vld [vmem:[#allocation10 + $0x518] sm:$0xff]  ;;  %v2554_v10 = vld [vmem:[#allocation10 + $0x6d0] sm:$0xff] }
 0x343   : > { %7281 = vmatprep.subr.bf16.mxu0 %v7280_v25  ;;  %7313 = vmatprep.subr.bf16.mxu1 %v7312_v26  ;;  %v2496_v25 = vld [vmem:[#allocation10 + $0x500] sm:$0xff]  ;;  %v7328_v28 = vpack.c.bf16 %v2505_v32, %v2497_v17  ;;  %v7360_v29 = vpack.c.bf16 %v2507_v20, %v2499_v19  ;;  %v2571_v14 = vld [vmem:[#allocation10 + $0x758] sm:$0xff]  ;;  %v7374_v32 = vpack.c.bf16 %v2554_v10, %v2546_v9  ;;  %v2470_v50 = vld [vmem:[#allocation10 + $0x430] sm:$0xff] }
 0x344   : > { %v2504_v26 = vld [vmem:[#allocation10 + $0x540] sm:$0xff]  ;;  %v2478_v51 = vld [vmem:[#allocation10 + $0x470] sm:$0xff]  ;;  %v2503_v9 = vld [vmem:[#allocation10 + $0x538] sm:$0xff] }
 0x345   : > { %v2560_v19 = vld [vmem:[#allocation10 + $0x700] sm:$0xff]  ;;  %v2511_v10 = vld [vmem:[#allocation10 + $0x578] sm:$0xff] }
 0x346   : > { %7283 = vmatpush1.bf16.msra.mxu0 %v7282_v36  ;;  %7315 = vmatpush1.bf16.msra.mxu1 %v7314_v37  ;;  %v2515_v36 = vld [vmem:[#allocation10 + $0x598] sm:$0xff]  ;;  %v2568_v20 = vld [vmem:[#allocation10 + $0x740] sm:$0xff] }
 0x347   : > { %7285 = vmatprep.subr.bf16.mxu0 %v7284_v40  ;;  %7317 = vmatprep.subr.bf16.mxu1 %v7316_v41  ;;  %v2523_v37 = vld [vmem:[#allocation10 + $0x5d8] sm:$0xff]  ;;  %v2520_v40 = vld [vmem:[#allocation10 + $0x5c0] sm:$0xff]  ;;  %v7332_v41 = vpack.c.bf16 %v2521_v35, %v2513_v33  ;;  %v7346_v33 = vpack.c.bf16 %v2568_v20, %v2560_v19  ;;  %v2502_v19 = vld [vmem:[#allocation10 + $0x530] sm:$0xff] }
 0x348   : > { %v8420_v0 = vpop.eup %8419  ;;  %v7364_v42 = vpack.c.bf16 %v2523_v37, %v2515_v36  ;;  %v2576_v36 = vld [vmem:[#allocation10 + $0x780] sm:$0xff]  ;;  %v2510_v20 = vld [vmem:[#allocation10 + $0x570] sm:$0xff] }
 0x349   : > { %v1994_v5 = vmul.f32 %v8420_v0, %v1993_v57  ;;  %v7336_v57 = vpack.c.bf16 %v2537_v46, %v2529_v45  ;;  %v2547_v0 = vld [vmem:[#allocation10 + $0x698] sm:$0xff]  ;;  %v2584_v37 = vld [vmem:[#allocation10 + $0x7c0] sm:$0xff] }
 0x34a   : > { %7287 = vmatpush1.bf16.msra.mxu0 %v7286_v48  ;;  %7319 = vmatpush1.bf16.msra.mxu1 %v7318_v49  ;;  %v7334_v48 = vpack.c.bf16 %v2520_v40, %v2512_v39  ;;  %v7366_v49 = vpack.c.bf16 %v2522_v44, %v2514_v43  ;;  %v2578_v39 = vld [vmem:[#allocation10 + $0x790] sm:$0xff]  ;;  %v2471_v43 = vld [vmem:[#allocation10 + $0x438] sm:$0xff]  ;;  %v7350_v45 = vpack.c.bf16 %v2584_v37, %v2576_v36 }
 0x34b   : > { %7321 = vmatprep.subr.bf16.mxu0 %v7320_v53  ;;  %7353 = vmatprep.subr.bf16.mxu1 %v7352_v54  ;;  %v9518_v18 = vadd.f32 %v1995_v6, %v1994_v5  ;;  %v7368_v53 = vpack.c.bf16 %v2539_v52, %v2531_v47  ;;  %v2530_v54 = vld [vmem:[#allocation10 + $0x610] sm:$0xff]  ;;  %v2544_v5 = vld [vmem:[#allocation10 + $0x680] sm:$0xff]  ;;  %v2479_v44 = vld [vmem:[#allocation10 + $0x478] sm:$0xff] }
 0x34c   : > { %v7370_v4 = vpack.c.bf16 %v2538_v56, %v2530_v54  ;;  %v2552_v6 = vld [vmem:[#allocation10 + $0x6c0] sm:$0xff]  ;;  %v2586_v40 = vld [vmem:[#allocation10 + $0x7d0] sm:$0xff]  ;;  %v2487_v54 = vld [vmem:[#allocation10 + $0x4b8] sm:$0xff] }
 0x34d   : > { %2338 = vmatmul.mubr.f32.vlgmr.msra.gmra.mrb[6].mxu0 %v9500_v55  ;;  %2409 = vmatmul.mubr.f32.vlgmr.msra.gmra.mrb[6].mxu1 %v9500_v55  ;;  %1997 = vst [vmem:[#allocation21 + $0x8] sm:$0xff] %v9518_v18  ;;  %v7330_v55 = vpack.c.bf16 %v2504_v26, %v2496_v25  ;;  %v7342_v17 = vpack.c.bf16 %v2552_v6, %v2544_v5  ;;  %v2562_v25 = vld [vmem:[#allocation10 + $0x710] sm:$0xff]  ;;  %v2468_v47 = vld [vmem:[#allocation10 + $0x420] sm:$0xff]  ;;  %v2495_v56 = vld [vmem:[#allocation10 + $0x4f8] sm:$0xff] }
 0x34e   : > { %7323 = vmatpush1.bf16.msra.mxu0 %v7322_v7  ;;  %7355 = vmatpush1.bf16.msra.mxu1 %v7354_v8  ;;  %v7340_v7 = vpack.c.bf16 %v2553_v59, %v2545_v58  ;;  %v7372_v8 = vpack.c.bf16 %v2555_v2, %v2547_v0  ;;  %v2570_v26 = vld [vmem:[#allocation10 + $0x750] sm:$0xff]  ;;  %v7382_v46 = vpack.c.bf16 %v2586_v40, %v2578_v39  ;;  %v2476_v52 = vld [vmem:[#allocation10 + $0x460] sm:$0xff]  ;;  %v2535_v39 = vld [vmem:[#allocation10 + $0x638] sm:$0xff] }
 0x34f   : > { %7325 = vmatprep.subr.bf16.mxu0 %v7324_v34  ;;  %7357 = vmatprep.subr.bf16.mxu1 %v7356_v12  ;;  %v2561_v34 = vld [vmem:[#allocation10 + $0x708] sm:$0xff]  ;;  %v7378_v35 = vpack.c.bf16 %v2570_v26, %v2562_v25  ;;  %v7386_v58 = vpack.c.bf16 %v2476_v52, %v2468_v47  ;;  %v7418_v59 = vpack.c.bf16 %v2478_v51, %v2470_v50  ;;  %v2484_v0 = vld [vmem:[#allocation10 + $0x4a0] sm:$0xff]  ;;  %v2486_v5 = vld [vmem:[#allocation10 + $0x4b0] sm:$0xff] }
 0x350   : > { %2656 = vmatprep.mubr.f32.mxu0 %v10278_v11  ;;  %2727 = vmatprep.mubr.f32.mxu1 %v10278_v11  ;;  %v2569_v12 = vld [vmem:[#allocation10 + $0x748] sm:$0xff]  ;;  %v2492_v2 = vld [vmem:[#allocation10 + $0x4e0] sm:$0xff]  ;;  %v2494_v6 = vld [vmem:[#allocation10 + $0x4f0] sm:$0xff] }
 0x351   : > { %v2519_v25 = vld [vmem:[#allocation10 + $0x5b8] sm:$0xff]  ;;  %v2518_v36 = vld [vmem:[#allocation10 + $0x5b0] sm:$0xff] }
 0x352   : > { %7327 = vmatpush1.bf16.msra.mxu0 %v7326_v62  ;;  %7359 = vmatpush1.bf16.msra.mxu1 %v7358_v23  ;;  %v7344_v62 = vpack.c.bf16 %v2569_v12, %v2561_v34  ;;  %v7376_v23 = vpack.c.bf16 %v2571_v14, %v2563_v13  ;;  %v7390_v34 = vpack.c.bf16 %v2492_v2, %v2484_v0  ;;  %v2500_v13 = vld [vmem:[#allocation10 + $0x520] sm:$0xff]  ;;  %v2527_v26 = vld [vmem:[#allocation10 + $0x5f8] sm:$0xff]  ;;  %v2526_v37 = vld [vmem:[#allocation10 + $0x5f0] sm:$0xff] }
 0x353   : > { %7329 = vmatprep.subr.bf16.mxu0 %v7328_v28  ;;  %7361 = vmatprep.subr.bf16.mxu1 %v7360_v29  ;;  %v2577_v28 = vld [vmem:[#allocation10 + $0x788] sm:$0xff]  ;;  %v7422_v12 = vpack.c.bf16 %v2494_v6, %v2486_v5  ;;  %v2508_v14 = vld [vmem:[#allocation10 + $0x560] sm:$0xff]  ;;  %v2543_v40 = vld [vmem:[#allocation10 + $0x678] sm:$0xff] }
 0x354   : > { %v2585_v29 = vld [vmem:[#allocation10 + $0x7c8] sm:$0xff]  ;;  %v2534_v47 = vld [vmem:[#allocation10 + $0x630] sm:$0xff]  ;;  %v2551_v50 = vld [vmem:[#allocation10 + $0x6b8] sm:$0xff] }
 0x355   : > { %v2542_v52 = vld [vmem:[#allocation10 + $0x670] sm:$0xff]  ;;  %v2559_v51 = vld [vmem:[#allocation10 + $0x6f8] sm:$0xff] }
 0x356   : > { %7331 = vmatpush1.bf16.msra.mxu0 %v7330_v55  ;;  %7363 = vmatpush1.bf16.msra.mxu1 %v7362_v38  ;;  %v7348_v55 = vpack.c.bf16 %v2585_v29, %v2577_v28  ;;  %v7380_v38 = vpack.c.bf16 %v2587_v31, %v2579_v30  ;;  %v7394_v28 = vpack.c.bf16 %v2508_v14, %v2500_v13  ;;  %v2516_v30 = vld [vmem:[#allocation10 + $0x5a0] sm:$0xff]  ;;  %v2550_v0 = vld [vmem:[#allocation10 + $0x6b0] sm:$0xff]  ;;  %v2567_v5 = vld [vmem:[#allocation10 + $0x738] sm:$0xff] }
 0x357   : > { %7333 = vmatprep.subr.bf16.mxu0 %v7332_v41  ;;  %7365 = vmatprep.subr.bf16.mxu1 %v7364_v42  ;;  %v2469_v41 = vld [vmem:[#allocation10 + $0x428] sm:$0xff]  ;;  %v7426_v29 = vpack.c.bf16 %v2510_v20, %v2502_v19  ;;  %v2524_v31 = vld [vmem:[#allocation10 + $0x5e0] sm:$0xff]  ;;  %v2558_v2 = vld [vmem:[#allocation10 + $0x6f0] sm:$0xff] }
 0x358   : > { %v2477_v42 = vld [vmem:[#allocation10 + $0x468] sm:$0xff]  ;;  %v2575_v6 = vld [vmem:[#allocation10 + $0x778] sm:$0xff]  ;;  %v2566_v13 = vld [vmem:[#allocation10 + $0x730] sm:$0xff] }
 0x359   : > { %v2574_v14 = vld [vmem:[#allocation10 + $0x770] sm:$0xff]  ;;  %v2583_v19 = vld [vmem:[#allocation10 + $0x7b8] sm:$0xff] }
 0x35a   : > { %7335 = vmatpush1.bf16.msra.mxu0 %v7334_v48  ;;  %7367 = vmatpush1.bf16.msra.mxu1 %v7366_v49  ;;  %v7384_v48 = vpack.c.bf16 %v2477_v42, %v2469_v41  ;;  %v7416_v49 = vpack.c.bf16 %v2479_v44, %v2471_v43  ;;  %v7398_v41 = vpack.c.bf16 %v2524_v31, %v2516_v30  ;;  %v2532_v43 = vld [vmem:[#allocation10 + $0x620] sm:$0xff]  ;;  %v2591_v20 = vld [vmem:[#allocation10 + $0x7f8] sm:$0xff]  ;;  %v2582_v30 = vld [vmem:[#allocation10 + $0x7b0] sm:$0xff] }
 0x35b   : > { %7337 = vmatprep.subr.bf16.mxu0 %v7336_v57  ;;  %7369 = vmatprep.subr.bf16.mxu1 %v7368_v53  ;;  %v2485_v57 = vld [vmem:[#allocation10 + $0x4a8] sm:$0xff]  ;;  %v7430_v42 = vpack.c.bf16 %v2526_v37, %v2518_v36  ;;  %v2540_v44 = vld [vmem:[#allocation10 + $0x660] sm:$0xff]  ;;  %v2590_v31 = vld [vmem:[#allocation10 + $0x7f0] sm:$0xff] }
 0x35c   : > { %v2493_v53 = vld [vmem:[#allocation10 + $0x4e8] sm:$0xff]  ;;  %v2887_v36 = vld [vmem:[#allocation10 + $0x818] sm:$0xff] }
 0x35d   : > { %v2895_v37 = vld [vmem:[#allocation10 + $0x858] sm:$0xff] }
 0x35e   : > { %7339 = vmatpush1.bf16.msra.mxu0 %v7338_v3  ;;  %7371 = vmatpush1.bf16.msra.mxu1 %v7370_v4  ;;  %v7388_v3 = vpack.c.bf16 %v2493_v53, %v2485_v57  ;;  %v7420_v4 = vpack.c.bf16 %v2495_v56, %v2487_v54  ;;  %v7402_v57 = vpack.c.bf16 %v2540_v44, %v2532_v43  ;;  %v2548_v54 = vld [vmem:[#allocation10 + $0x6a0] sm:$0xff]  ;;  %v2886_v43 = vld [vmem:[#allocation10 + $0x810] sm:$0xff] }
 0x35f   : > { %7341 = vmatprep.subr.bf16.mxu0 %v7340_v7  ;;  %7373 = vmatprep.subr.bf16.mxu1 %v7372_v8  ;;  %v2501_v7 = vld [vmem:[#allocation10 + $0x528] sm:$0xff]  ;;  %v7434_v53 = vpack.c.bf16 %v2542_v52, %v2534_v47  ;;  %v2556_v56 = vld [vmem:[#allocation10 + $0x6e0] sm:$0xff]  ;;  %v2894_v44 = vld [vmem:[#allocation10 + $0x850] sm:$0xff] }
 0x360   : > { %v2509_v8 = vld [vmem:[#allocation10 + $0x568] sm:$0xff]  ;;  %v2903_v47 = vld [vmem:[#allocation10 + $0x898] sm:$0xff] }
 0x361   : > { %v2911_v52 = vld [vmem:[#allocation10 + $0x8d8] sm:$0xff] }
 0x362   : > { %7343 = vmatpush1.bf16.msra.mxu0 %v7342_v17  ;;  %7375 = vmatpush1.bf16.msra.mxu1 %v7374_v32  ;;  %v7392_v17 = vpack.c.bf16 %v2509_v8, %v2501_v7  ;;  %v7424_v32 = vpack.c.bf16 %v2511_v10, %v2503_v9  ;;  %v7406_v7 = vpack.c.bf16 %v2556_v56, %v2548_v54  ;;  %v2564_v9 = vld [vmem:[#allocation10 + $0x720] sm:$0xff]  ;;  %v2902_v54 = vld [vmem:[#allocation10 + $0x890] sm:$0xff] }
 0x363   : > { %7345 = vmatprep.subr.bf16.mxu0 %v7344_v62  ;;  %7377 = vmatprep.subr.bf16.mxu1 %v7376_v23  ;;  %v2517_v62 = vld [vmem:[#allocation10 + $0x5a8] sm:$0xff]  ;;  %v7438_v8 = vpack.c.bf16 %v2558_v2, %v2550_v0  ;;  %v2572_v10 = vld [vmem:[#allocation10 + $0x760] sm:$0xff]  ;;  %v2910_v56 = vld [vmem:[#allocation10 + $0x8d0] sm:$0xff] }
 0x364   : > { %v2525_v23 = vld [vmem:[#allocation10 + $0x5e8] sm:$0xff]  ;;  %v2919_v0 = vld [vmem:[#allocation10 + $0x918] sm:$0xff] }
 0x365   : > { %v2927_v2 = vld [vmem:[#allocation10 + $0x958] sm:$0xff] }
 0x366   : > { %7347 = vmatpush1.bf16.msra.mxu0 %v7346_v33  ;;  %7379 = vmatpush1.bf16.msra.mxu1 %v7378_v35  ;;  %v7396_v33 = vpack.c.bf16 %v2525_v23, %v2517_v62  ;;  %v7428_v35 = vpack.c.bf16 %v2527_v26, %v2519_v25  ;;  %v7410_v62 = vpack.c.bf16 %v2572_v10, %v2564_v9  ;;  %v2580_v25 = vld [vmem:[#allocation10 + $0x7a0] sm:$0xff]  ;;  %v2918_v9 = vld [vmem:[#allocation10 + $0x910] sm:$0xff] }
 0x367   : > { %7349 = vmatprep.subr.bf16.mxu0 %v7348_v55  ;;  %7381 = vmatprep.subr.bf16.mxu1 %v7380_v38  ;;  %v2533_v55 = vld [vmem:[#allocation10 + $0x628] sm:$0xff]  ;;  %v7442_v23 = vpack.c.bf16 %v2574_v14, %v2566_v13  ;;  %v2588_v26 = vld [vmem:[#allocation10 + $0x7e0] sm:$0xff]  ;;  %v2926_v10 = vld [vmem:[#allocation10 + $0x950] sm:$0xff] }
 0x368   : > { %v2541_v38 = vld [vmem:[#allocation10 + $0x668] sm:$0xff]  ;;  %v2935_v13 = vld [vmem:[#allocation10 + $0x998] sm:$0xff] }
 0x369   : > { %v2943_v14 = vld [vmem:[#allocation10 + $0x9d8] sm:$0xff] }
 0x36a   : > { %7351 = vmatpush1.bf16.msra.mxu0 %v7350_v45  ;;  %7383 = vmatpush1.bf16.msra.mxu1 %v7382_v46  ;;  %v7400_v45 = vpack.c.bf16 %v2541_v38, %v2533_v55  ;;  %v7432_v46 = vpack.c.bf16 %v2543_v40, %v2535_v39  ;;  %v7414_v55 = vpack.c.bf16 %v2588_v26, %v2580_v25  ;;  %v2884_v39 = vld [vmem:[#allocation10 + $0x800] sm:$0xff]  ;;  %v2942_v25 = vld [vmem:[#allocation10 + $0x9d0] sm:$0xff]  ;;  %v2949_v26 = vld [vmem:[#allocation10 + $0xa08] sm:$0xff] }
 0x36b   : > { %7385 = vmatprep.subr.bf16.mxu0 %v7384_v48  ;;  %7417 = vmatprep.subr.bf16.mxu1 %v7416_v49  ;;  %v2549_v48 = vld [vmem:[#allocation10 + $0x6a8] sm:$0xff]  ;;  %v7446_v38 = vpack.c.bf16 %v2590_v31, %v2582_v30  ;;  %v2892_v40 = vld [vmem:[#allocation10 + $0x840] sm:$0xff]  ;;  %v2959_v30 = vld [vmem:[#allocation10 + $0xa58] sm:$0xff] }
 0x36c   : > { %v2557_v49 = vld [vmem:[#allocation10 + $0x6e8] sm:$0xff] }
 0x36d   : > { %2657 = vmatmul.mubr.f32.vlgmr.msra.gmra.mrb[4].mxu0 %v9518_v18  ;;  %2728 = vmatmul.mubr.f32.vlgmr.msra.gmra.mrb[4].mxu1 %v9518_v18 }
 0x36e   : > { %7387 = vmatpush1.bf16.msra.mxu0 %v7386_v58  ;;  %7419 = vmatpush1.bf16.msra.mxu1 %v7418_v59  ;;  %v7404_v58 = vpack.c.bf16 %v2557_v49, %v2549_v48  ;;  %v7436_v59 = vpack.c.bf16 %v2559_v51, %v2551_v50  ;;  %v7450_v48 = vpack.c.bf16 %v2892_v40, %v2884_v39  ;;  %v2900_v50 = vld [vmem:[#allocation10 + $0x880] sm:$0xff]  ;;  %v2958_v39 = vld [vmem:[#allocation10 + $0xa50] sm:$0xff]  ;;  %v2965_v40 = vld [vmem:[#allocation10 + $0xa88] sm:$0xff] }
 0x36f   : > { %7389 = vmatprep.subr.bf16.mxu0 %v7388_v3  ;;  %7421 = vmatprep.subr.bf16.mxu1 %v7420_v4  ;;  %v2565_v3 = vld [vmem:[#allocation10 + $0x728] sm:$0xff]  ;;  %v7482_v49 = vpack.c.bf16 %v2894_v44, %v2886_v43  ;;  %v2908_v51 = vld [vmem:[#allocation10 + $0x8c0] sm:$0xff]  ;;  %v2975_v43 = vld [vmem:[#allocation10 + $0xad8] sm:$0xff] }
 0x370   : > { %2798 = vmatprep.mubr.f32.mxu0 %v10278_v11  ;;  %2869 = vmatprep.mubr.f32.mxu1 %v10278_v11  ;;  %v2573_v4 = vld [vmem:[#allocation10 + $0x768] sm:$0xff] }
 0x372   : > { %7391 = vmatpush1.bf16.msra.mxu0 %v7390_v34  ;;  %7423 = vmatpush1.bf16.msra.mxu1 %v7422_v12  ;;  %v7408_v34 = vpack.c.bf16 %v2573_v4, %v2565_v3  ;;  %v7440_v12 = vpack.c.bf16 %v2575_v6, %v2567_v5  ;;  %v7454_v3 = vpack.c.bf16 %v2908_v51, %v2900_v50  ;;  %v2916_v5 = vld [vmem:[#allocation10 + $0x900] sm:$0xff]  ;;  %v2974_v50 = vld [vmem:[#allocation10 + $0xad0] sm:$0xff]  ;;  %v2981_v51 = vld [vmem:[#allocation10 + $0xb08] sm:$0xff] }
 0x373   : > { %7393 = vmatprep.subr.bf16.mxu0 %v7392_v17  ;;  %7425 = vmatprep.subr.bf16.mxu1 %v7424_v32  ;;  %v2581_v17 = vld [vmem:[#allocation10 + $0x7a8] sm:$0xff]  ;;  %v7486_v4 = vpack.c.bf16 %v2910_v56, %v2902_v54  ;;  %v2924_v6 = vld [vmem:[#allocation10 + $0x940] sm:$0xff]  ;;  %v2991_v54 = vld [vmem:[#allocation10 + $0xb58] sm:$0xff] }
 0x374   : > { %v2589_v32 = vld [vmem:[#allocation10 + $0x7e8] sm:$0xff] }
 0x376   : > { %7395 = vmatpush1.bf16.msra.mxu0 %v7394_v28  ;;  %7427 = vmatpush1.bf16.msra.mxu1 %v7426_v29  ;;  %v7412_v28 = vpack.c.bf16 %v2589_v32, %v2581_v17  ;;  %v7444_v29 = vpack.c.bf16 %v2591_v20, %v2583_v19  ;;  %v7490_v17 = vpack.c.bf16 %v2926_v10, %v2918_v9  ;;  %v2932_v32 = vld [vmem:[#allocation10 + $0x980] sm:$0xff]  ;;  %v3007_v9 = vld [vmem:[#allocation10 + $0xbd8] sm:$0xff] }
 0x377   : > { %7397 = vmatprep.subr.bf16.mxu0 %v7396_v33  ;;  %7429 = vmatprep.subr.bf16.mxu1 %v7428_v35  ;;  %v2885_v33 = vld [vmem:[#allocation10 + $0x808] sm:$0xff]  ;;  %v2940_v19 = vld [vmem:[#allocation10 + $0x9c0] sm:$0xff] }
 0x378   : > { %v2893_v35 = vld [vmem:[#allocation10 + $0x848] sm:$0xff]  ;;  %v7462_v31 = vpack.c.bf16 %v2940_v19, %v2932_v32  ;;  %v3006_v32 = vld [vmem:[#allocation10 + $0xbd0] sm:$0xff] }
 0x379   : > { %v2889_v19 = vld [vmem:[#allocation10 + $0x828] sm:$0xff] }
 0x37a   : > { %7399 = vmatpush1.bf16.msra.mxu0 %v7398_v41  ;;  %7431 = vmatpush1.bf16.msra.mxu1 %v7430_v42  ;;  %v7448_v41 = vpack.c.bf16 %v2893_v35, %v2885_v33  ;;  %v7480_v42 = vpack.c.bf16 %v2895_v37, %v2887_v36  ;;  %v2948_v35 = vld [vmem:[#allocation10 + $0xa00] sm:$0xff] }
 0x37b   : > { %7401 = vmatprep.subr.bf16.mxu0 %v7400_v45  ;;  %7433 = vmatprep.subr.bf16.mxu1 %v7432_v46  ;;  %v2901_v45 = vld [vmem:[#allocation10 + $0x888] sm:$0xff]  ;;  %v2956_v36 = vld [vmem:[#allocation10 + $0xa40] sm:$0xff] }
 0x37c   : > { %v2909_v46 = vld [vmem:[#allocation10 + $0x8c8] sm:$0xff]  ;;  %v7466_v44 = vpack.c.bf16 %v2956_v36, %v2948_v35  ;;  %v2898_v35 = vld [vmem:[#allocation10 + $0x870] sm:$0xff] }
 0x37d   : > { %v2905_v36 = vld [vmem:[#allocation10 + $0x8a8] sm:$0xff] }
 0x37e   : > { %7403 = vmatpush1.bf16.msra.mxu0 %v7402_v57  ;;  %7435 = vmatpush1.bf16.msra.mxu1 %v7434_v53  ;;  %v7452_v57 = vpack.c.bf16 %v2909_v46, %v2901_v45  ;;  %v7484_v53 = vpack.c.bf16 %v2911_v52, %v2903_v47  ;;  %v2964_v46 = vld [vmem:[#allocation10 + $0xa80] sm:$0xff] }
 0x37f   : > { %7405 = vmatprep.subr.bf16.mxu0 %v7404_v58  ;;  %7437 = vmatprep.subr.bf16.mxu1 %v7436_v59  ;;  %v2917_v58 = vld [vmem:[#allocation10 + $0x908] sm:$0xff]  ;;  %v2972_v47 = vld [vmem:[#allocation10 + $0xac0] sm:$0xff] }
 0x380   : > { %v2925_v59 = vld [vmem:[#allocation10 + $0x948] sm:$0xff]  ;;  %v7470_v56 = vpack.c.bf16 %v2972_v47, %v2964_v46  ;;  %v2906_v46 = vld [vmem:[#allocation10 + $0x8b0] sm:$0xff] }
 0x381   : > { %v2914_v47 = vld [vmem:[#allocation10 + $0x8f0] sm:$0xff] }
 0x382   : > { %7407 = vmatpush1.bf16.msra.mxu0 %v7406_v7  ;;  %7439 = vmatpush1.bf16.msra.mxu1 %v7438_v8  ;;  %v7456_v7 = vpack.c.bf16 %v2925_v59, %v2917_v58  ;;  %v7488_v8 = vpack.c.bf16 %v2927_v2, %v2919_v0  ;;  %v2980_v59 = vld [vmem:[#allocation10 + $0xb00] sm:$0xff] }
 0x383   : > { %7409 = vmatprep.subr.bf16.mxu0 %v7408_v34  ;;  %7441 = vmatprep.subr.bf16.mxu1 %v7440_v12  ;;  %v2933_v34 = vld [vmem:[#allocation10 + $0x988] sm:$0xff]  ;;  %v2988_v0 = vld [vmem:[#allocation10 + $0xb40] sm:$0xff] }
 0x384   : > { %v2941_v12 = vld [vmem:[#allocation10 + $0x9c8] sm:$0xff]  ;;  %v7474_v10 = vpack.c.bf16 %v2988_v0, %v2980_v59  ;;  %v2922_v59 = vld [vmem:[#allocation10 + $0x930] sm:$0xff] }
 0x385   : > { %v7460_v20 = vpack.c.bf16 %v2941_v12, %v2933_v34  ;;  %v2996_v12 = vld [vmem:[#allocation10 + $0xb80] sm:$0xff]  ;;  %v2930_v0 = vld [vmem:[#allocation10 + $0x970] sm:$0xff] }
 0x386   : > { %7411 = vmatpush1.bf16.msra.mxu0 %v7410_v62  ;;  %7443 = vmatpush1.bf16.msra.mxu1 %v7442_v23  ;;  %v7492_v62 = vpack.c.bf16 %v2943_v14, %v2935_v13  ;;  %v2934_v23 = vld [vmem:[#allocation10 + $0x990] sm:$0xff]  ;;  %v3004_v13 = vld [vmem:[#allocation10 + $0xbc0] sm:$0xff] }
 0x387   : > { %7413 = vmatprep.subr.bf16.mxu0 %v7412_v28  ;;  %7445 = vmatprep.subr.bf16.mxu1 %v7444_v29  ;;  %v2957_v28 = vld [vmem:[#allocation10 + $0xa48] sm:$0xff]  ;;  %v2951_v29 = vld [vmem:[#allocation10 + $0xa18] sm:$0xff]  ;;  %v7494_v33 = vpack.c.bf16 %v2942_v25, %v2934_v23  ;;  %v7478_v25 = vpack.c.bf16 %v3004_v13, %v2996_v12  ;;  %v2938_v12 = vld [vmem:[#allocation10 + $0x9b0] sm:$0xff] }
 0x388   : > { %v7464_v37 = vpack.c.bf16 %v2957_v28, %v2949_v26  ;;  %v2899_v23 = vld [vmem:[#allocation10 + $0x878] sm:$0xff]  ;;  %v2888_v28 = vld [vmem:[#allocation10 + $0x820] sm:$0xff]  ;;  %v2946_v13 = vld [vmem:[#allocation10 + $0x9f0] sm:$0xff] }
 0x38a   : > { %7415 = vmatpush1.bf16.msra.mxu0 %v7414_v55  ;;  %7447 = vmatpush1.bf16.msra.mxu1 %v7446_v38  ;;  %v7496_v55 = vpack.c.bf16 %v2959_v30, %v2951_v29  ;;  %v2950_v38 = vld [vmem:[#allocation10 + $0xa10] sm:$0xff]  ;;  %v2896_v29 = vld [vmem:[#allocation10 + $0x860] sm:$0xff] }
 0x38b   : > { %7449 = vmatprep.subr.bf16.mxu0 %v7448_v41  ;;  %7481 = vmatprep.subr.bf16.mxu1 %v7480_v42  ;;  %v2973_v41 = vld [vmem:[#allocation10 + $0xac8] sm:$0xff]  ;;  %v2967_v42 = vld [vmem:[#allocation10 + $0xa98] sm:$0xff]  ;;  %v7498_v45 = vpack.c.bf16 %v2958_v39, %v2950_v38 }
 0x38c   : > { %v7468_v52 = vpack.c.bf16 %v2973_v41, %v2965_v40  ;;  %v2915_v38 = vld [vmem:[#allocation10 + $0x8f8] sm:$0xff]  ;;  %v9533_v39 = vld [vmem:[#allocation21 + $0x10] sm:$0xff]  ;;  %v7514_v40 = vpack.c.bf16 %v2896_v29, %v2888_v28 }
 0x38d   : > { %2799 = vmatmul.mubr.f32.vlgmr.msra.gmra.mrb[6].mxu0 %v9518_v18  ;;  %2870 = vmatmul.mubr.f32.vlgmr.msra.gmra.mrb[6].mxu1 %v9518_v18  ;;  %v7458_v18 = vpack.c.bf16 %v2924_v6, %v2916_v5  ;;  %v2990_v5 = vld [vmem:[#allocation10 + $0xb50] sm:$0xff]  ;;  %v2997_v6 = vld [vmem:[#allocation10 + $0xb88] sm:$0xff] }
 0x38e   : > { %7451 = vmatpush1.bf16.msra.mxu0 %v7450_v48  ;;  %7483 = vmatpush1.bf16.msra.mxu1 %v7482_v49  ;;  %v7500_v48 = vpack.c.bf16 %v2975_v43, %v2967_v42  ;;  %v2966_v49 = vld [vmem:[#allocation10 + $0xa90] sm:$0xff]  ;;  %v2904_v42 = vld [vmem:[#allocation10 + $0x8a0] sm:$0xff] }
 0x38f   : > { %7453 = vmatprep.subr.bf16.mxu0 %v7452_v57  ;;  %7485 = vmatprep.subr.bf16.mxu1 %v7484_v53  ;;  %v2989_v57 = vld [vmem:[#allocation10 + $0xb48] sm:$0xff]  ;;  %v2983_v53 = vld [vmem:[#allocation10 + $0xb18] sm:$0xff]  ;;  %v7502_v58 = vpack.c.bf16 %v2974_v50, %v2966_v49  ;;  %v2912_v43 = vld [vmem:[#allocation10 + $0x8e0] sm:$0xff] }
 0x390   : > { %3076 = vmatprep.mubr.f32.mxu0 %v10278_v11  ;;  %3147 = vmatprep.mubr.f32.mxu1 %v10278_v11  ;;  %v7472_v2 = vpack.c.bf16 %v2989_v57, %v2981_v51  ;;  %v2923_v49 = vld [vmem:[#allocation10 + $0x938] sm:$0xff]  ;;  %v7518_v51 = vpack.c.bf16 %v2912_v43, %v2904_v42  ;;  %v7550_v57 = vpack.c.bf16 %v2914_v47, %v2906_v46  ;;  %v2954_v28 = vld [vmem:[#allocation10 + $0xa30] sm:$0xff] }
 0x391   : > { %v2931_v50 = vld [vmem:[#allocation10 + $0x978] sm:$0xff]  ;;  %v2962_v29 = vld [vmem:[#allocation10 + $0xa70] sm:$0xff] }
 0x392   : > { %7455 = vmatpush1.bf16.msra.mxu0 %v7454_v3  ;;  %7487 = vmatpush1.bf16.msra.mxu1 %v7486_v4  ;;  %v7504_v3 = vpack.c.bf16 %v2991_v54, %v2983_v53  ;;  %v2982_v4 = vld [vmem:[#allocation10 + $0xb10] sm:$0xff]  ;;  %v2920_v53 = vld [vmem:[#allocation10 + $0x920] sm:$0xff]  ;;  %v2987_v46 = vld [vmem:[#allocation10 + $0xb38] sm:$0xff] }
 0x393   : > { %7457 = vmatprep.subr.bf16.mxu0 %v7456_v7  ;;  %7489 = vmatprep.subr.bf16.mxu1 %v7488_v8  ;;  %v3005_v7 = vld [vmem:[#allocation10 + $0xbc8] sm:$0xff]  ;;  %v2999_v8 = vld [vmem:[#allocation10 + $0xb98] sm:$0xff]  ;;  %v7506_v34 = vpack.c.bf16 %v2990_v5, %v2982_v4  ;;  %v2928_v54 = vld [vmem:[#allocation10 + $0x960] sm:$0xff] }
 0x394   : > { %v7476_v14 = vpack.c.bf16 %v3005_v7, %v2997_v6  ;;  %v2939_v4 = vld [vmem:[#allocation10 + $0x9b8] sm:$0xff]  ;;  %v7522_v6 = vpack.c.bf16 %v2928_v54, %v2920_v53  ;;  %v7554_v7 = vpack.c.bf16 %v2930_v0, %v2922_v59  ;;  %v2970_v42 = vld [vmem:[#allocation10 + $0xab0] sm:$0xff] }
 0x395   : > { %v2947_v5 = vld [vmem:[#allocation10 + $0x9f8] sm:$0xff]  ;;  %v2978_v43 = vld [vmem:[#allocation10 + $0xaf0] sm:$0xff] }
 0x396   : > { %7459 = vmatpush1.bf16.msra.mxu0 %v7458_v18  ;;  %7491 = vmatpush1.bf16.msra.mxu1 %v7490_v17  ;;  %v7508_v18 = vpack.c.bf16 %v3007_v9, %v2999_v8  ;;  %v2998_v17 = vld [vmem:[#allocation10 + $0xb90] sm:$0xff]  ;;  %v2936_v8 = vld [vmem:[#allocation10 + $0x9a0] sm:$0xff]  ;;  %v2995_v47 = vld [vmem:[#allocation10 + $0xb78] sm:$0xff] }
 0x397   : > { %7461 = vmatprep.subr.bf16.mxu0 %v7460_v20  ;;  %7493 = vmatprep.subr.bf16.mxu1 %v7492_v62  ;;  %v2897_v20 = vld [vmem:[#allocation10 + $0x868] sm:$0xff]  ;;  %v2891_v62 = vld [vmem:[#allocation10 + $0x838] sm:$0xff]  ;;  %v7510_v26 = vpack.c.bf16 %v3006_v32, %v2998_v17  ;;  %v2944_v9 = vld [vmem:[#allocation10 + $0x9e0] sm:$0xff] }
 0x398   : > { %v7512_v30 = vpack.c.bf16 %v2897_v20, %v2889_v19  ;;  %v2955_v17 = vld [vmem:[#allocation10 + $0xa38] sm:$0xff]  ;;  %v7526_v19 = vpack.c.bf16 %v2944_v9, %v2936_v8  ;;  %v7558_v20 = vpack.c.bf16 %v2946_v13, %v2938_v12  ;;  %v2986_v53 = vld [vmem:[#allocation10 + $0xb30] sm:$0xff] }
 0x399   : > { %v2963_v32 = vld [vmem:[#allocation10 + $0xa78] sm:$0xff]  ;;  %v2994_v54 = vld [vmem:[#allocation10 + $0xb70] sm:$0xff] }
 0x39a   : > { %7463 = vmatpush1.bf16.msra.mxu0 %v7462_v31  ;;  %7495 = vmatpush1.bf16.msra.mxu1 %v7494_v33  ;;  %v7544_v31 = vpack.c.bf16 %v2899_v23, %v2891_v62  ;;  %v2890_v33 = vld [vmem:[#allocation10 + $0x830] sm:$0xff]  ;;  %v2952_v62 = vld [vmem:[#allocation10 + $0xa20] sm:$0xff]  ;;  %v3003_v59 = vld [vmem:[#allocation10 + $0xbb8] sm:$0xff] }
 0x39b   : > { %7465 = vmatprep.subr.bf16.mxu0 %v7464_v37  ;;  %7497 = vmatprep.subr.bf16.mxu1 %v7496_v55  ;;  %v2913_v37 = vld [vmem:[#allocation10 + $0x8e8] sm:$0xff]  ;;  %v2907_v55 = vld [vmem:[#allocation10 + $0x8b8] sm:$0xff]  ;;  %v7546_v41 = vpack.c.bf16 %v2898_v35, %v2890_v33  ;;  %v2960_v23 = vld [vmem:[#allocation10 + $0xa60] sm:$0xff] }
 0x39c   : > { %v2971_v33 = vld [vmem:[#allocation10 + $0xab8] sm:$0xff]  ;;  %v3002_v8 = vld [vmem:[#allocation10 + $0xbb0] sm:$0xff] }
 0x39d   : > { %v2979_v35 = vld [vmem:[#allocation10 + $0xaf8] sm:$0xff]  ;;  %v3010_v9 = vld [vmem:[#allocation10 + $0xbf0] sm:$0xff] }
 0x39e   : > { %7467 = vmatpush1.bf16.msra.mxu0 %v7466_v44  ;;  %7499 = vmatpush1.bf16.msra.mxu1 %v7498_v45  ;;  %v7516_v44 = vpack.c.bf16 %v2913_v37, %v2905_v36  ;;  %v7548_v45 = vpack.c.bf16 %v2915_v38, %v2907_v55  ;;  %v7530_v36 = vpack.c.bf16 %v2960_v23, %v2952_v62  ;;  %v2968_v55 = vld [vmem:[#allocation10 + $0xaa0] sm:$0xff]  ;;  %v3011_v0 = vld [vmem:[#allocation10 + $0xbf8] sm:$0xff]  ;;  %v3306_v62 = vld [vmem:[#allocation10 + $0xc10] sm:$0xff] }
 0x39f   : > { %7469 = vmatprep.subr.bf16.mxu0 %v7468_v52  ;;  %7501 = vmatprep.subr.bf16.mxu1 %v7500_v48  ;;  %v2921_v52 = vld [vmem:[#allocation10 + $0x928] sm:$0xff]  ;;  %v7562_v37 = vpack.c.bf16 %v2962_v29, %v2954_v28  ;;  %v2976_v38 = vld [vmem:[#allocation10 + $0xae0] sm:$0xff]  ;;  %v3307_v12 = vld [vmem:[#allocation10 + $0xc18] sm:$0xff] }
 0x3a0   : > { %v2929_v48 = vld [vmem:[#allocation10 + $0x968] sm:$0xff]  ;;  %v3315_v13 = vld [vmem:[#allocation10 + $0xc58] sm:$0xff]  ;;  %v3314_v23 = vld [vmem:[#allocation10 + $0xc50] sm:$0xff] }
 0x3a1   : > { %v3323_v28 = vld [vmem:[#allocation10 + $0xc98] sm:$0xff] }
 0x3a2   : > { %7471 = vmatpush1.bf16.msra.mxu0 %v7470_v56  ;;  %7503 = vmatpush1.bf16.msra.mxu1 %v7502_v58  ;;  %v7520_v56 = vpack.c.bf16 %v2929_v48, %v2921_v52  ;;  %v7552_v58 = vpack.c.bf16 %v2931_v50, %v2923_v49  ;;  %v7534_v52 = vpack.c.bf16 %v2976_v38, %v2968_v55  ;;  %v2984_v49 = vld [vmem:[#allocation10 + $0xb20] sm:$0xff]  ;;  %v3331_v29 = vld [vmem:[#allocation10 + $0xcd8] sm:$0xff]  ;;  %v3322_v55 = vld [vmem:[#allocation10 + $0xc90] sm:$0xff] }
 0x3a3   : > { %7473 = vmatprep.subr.bf16.mxu0 %v7472_v2  ;;  %7505 = vmatprep.subr.bf16.mxu1 %v7504_v3  ;;  %v2937_v2 = vld [vmem:[#allocation10 + $0x9a8] sm:$0xff]  ;;  %v7566_v48 = vpack.c.bf16 %v2978_v43, %v2970_v42  ;;  %v2992_v50 = vld [vmem:[#allocation10 + $0xb60] sm:$0xff]  ;;  %v3330_v38 = vld [vmem:[#allocation10 + $0xcd0] sm:$0xff] }
 0x3a4   : > { %v2945_v3 = vld [vmem:[#allocation10 + $0x9e8] sm:$0xff]  ;;  %v3339_v42 = vld [vmem:[#allocation10 + $0xd18] sm:$0xff] }
 0x3a5   : > { %v3347_v43 = vld [vmem:[#allocation10 + $0xd58] sm:$0xff] }
 0x3a6   : > { %7475 = vmatpush1.bf16.msra.mxu0 %v7474_v10  ;;  %7507 = vmatpush1.bf16.msra.mxu1 %v7506_v34  ;;  %v7524_v10 = vpack.c.bf16 %v2945_v3, %v2937_v2  ;;  %v7556_v34 = vpack.c.bf16 %v2947_v5, %v2939_v4  ;;  %v7538_v2 = vpack.c.bf16 %v2992_v50, %v2984_v49  ;;  %v3000_v4 = vld [vmem:[#allocation10 + $0xba0] sm:$0xff]  ;;  %v3338_v49 = vld [vmem:[#allocation10 + $0xd10] sm:$0xff] }
 0x3a7   : > { %7477 = vmatprep.subr.bf16.mxu0 %v7476_v14  ;;  %7509 = vmatprep.subr.bf16.mxu1 %v7508_v18  ;;  %v2953_v14 = vld [vmem:[#allocation10 + $0xa28] sm:$0xff]  ;;  %v7570_v3 = vpack.c.bf16 %v2994_v54, %v2986_v53  ;;  %v3008_v5 = vld [vmem:[#allocation10 + $0xbe0] sm:$0xff]  ;;  %v3346_v50 = vld [vmem:[#allocation10 + $0xd50] sm:$0xff] }
 0x3a8   : > { %v2961_v18 = vld [vmem:[#allocation10 + $0xa68] sm:$0xff]  ;;  %v3355_v53 = vld [vmem:[#allocation10 + $0xd98] sm:$0xff] }
 0x3a9   : > { %v3363_v54 = vld [vmem:[#allocation10 + $0xdd8] sm:$0xff] }
 0x3aa   : > { %7479 = vmatpush1.bf16.msra.mxu0 %v7478_v25  ;;  %7511 = vmatpush1.bf16.msra.mxu1 %v7510_v26  ;;  %v7528_v25 = vpack.c.bf16 %v2961_v18, %v2953_v14  ;;  %v7560_v26 = vpack.c.bf16 %v2963_v32, %v2955_v17  ;;  %v7542_v14 = vpack.c.bf16 %v3008_v5, %v3000_v4  ;;  %v3304_v17 = vld [vmem:[#allocation10 + $0xc00] sm:$0xff]  ;;  %v3362_v4 = vld [vmem:[#allocation10 + $0xdd0] sm:$0xff]  ;;  %v3369_v5 = vld [vmem:[#allocation10 + $0xe08] sm:$0xff] }
 0x3ab   : > { %7513 = vmatprep.subr.bf16.mxu0 %v7512_v30  ;;  %7545 = vmatprep.subr.bf16.mxu1 %v7544_v31  ;;  %v2969_v30 = vld [vmem:[#allocation10 + $0xaa8] sm:$0xff]  ;;  %v7574_v18 = vpack.c.bf16 %v3010_v9, %v3002_v8  ;;  %v3312_v32 = vld [vmem:[#allocation10 + $0xc40] sm:$0xff]  ;;  %v3379_v8 = vld [vmem:[#allocation10 + $0xe58] sm:$0xff] }
 0x3ac   : > { %v2977_v31 = vld [vmem:[#allocation10 + $0xae8] sm:$0xff] }
 0x3ad   : > { %3077 = vmatmul.mubr.f32.vlgmr.msra.gmra.mrb[4].mxu0 %v9533_v39  ;;  %3148 = vmatmul.mubr.f32.vlgmr.msra.gmra.mrb[4].mxu1 %v9533_v39 }
 0x3ae   : > { %7515 = vmatpush1.bf16.msra.mxu0 %v7514_v40  ;;  %7547 = vmatpush1.bf16.msra.mxu1 %v7546_v41  ;;  %v7532_v40 = vpack.c.bf16 %v2977_v31, %v2969_v30  ;;  %v7564_v41 = vpack.c.bf16 %v2979_v35, %v2971_v33  ;;  %v7578_v30 = vpack.c.bf16 %v3312_v32, %v3304_v17  ;;  %v3320_v33 = vld [vmem:[#allocation10 + $0xc80] sm:$0xff]  ;;  %v3378_v17 = vld [vmem:[#allocation10 + $0xe50] sm:$0xff]  ;;  %v3385_v32 = vld [vmem:[#allocation10 + $0xe88] sm:$0xff] }
 0x3af   : > { %7517 = vmatprep.subr.bf16.mxu0 %v7516_v44  ;;  %7549 = vmatprep.subr.bf16.mxu1 %v7548_v45  ;;  %v2985_v44 = vld [vmem:[#allocation10 + $0xb28] sm:$0xff]  ;;  %v7610_v31 = vpack.c.bf16 %v3314_v23, %v3306_v62  ;;  %v3328_v35 = vld [vmem:[#allocation10 + $0xcc0] sm:$0xff]  ;;  %v3395_v62 = vld [vmem:[#allocation10 + $0xed8] sm:$0xff] }
 0x3b0   : > { %3218 = vmatprep.mubr.f32.mxu0 %v10278_v11  ;;  %3289 = vmatprep.mubr.f32.mxu1 %v10278_v11  ;;  %v2993_v45 = vld [vmem:[#allocation10 + $0xb68] sm:$0xff] }
 0x3b2   : > { %7519 = vmatpush1.bf16.msra.mxu0 %v7518_v51  ;;  %7551 = vmatpush1.bf16.msra.mxu1 %v7550_v57  ;;  %v7536_v51 = vpack.c.bf16 %v2993_v45, %v2985_v44  ;;  %v7568_v57 = vpack.c.bf16 %v2995_v47, %v2987_v46  ;;  %v7582_v44 = vpack.c.bf16 %v3328_v35, %v3320_v33  ;;  %v3336_v46 = vld [vmem:[#allocation10 + $0xd00] sm:$0xff]  ;;  %v3394_v33 = vld [vmem:[#allocation10 + $0xed0] sm:$0xff]  ;;  %v3401_v35 = vld [vmem:[#allocation10 + $0xf08] sm:$0xff] }
 0x3b3   : > { %7521 = vmatprep.subr.bf16.mxu0 %v7520_v56  ;;  %7553 = vmatprep.subr.bf16.mxu1 %v7552_v58  ;;  %v3001_v56 = vld [vmem:[#allocation10 + $0xba8] sm:$0xff]  ;;  %v7614_v45 = vpack.c.bf16 %v3330_v38, %v3322_v55  ;;  %v3344_v47 = vld [vmem:[#allocation10 + $0xd40] sm:$0xff]  ;;  %v3411_v55 = vld [vmem:[#allocation10 + $0xf58] sm:$0xff] }
 0x3b4   : > { %v3009_v58 = vld [vmem:[#allocation10 + $0xbe8] sm:$0xff] }
 0x3b6   : > { %7523 = vmatpush1.bf16.msra.mxu0 %v7522_v6  ;;  %7555 = vmatpush1.bf16.msra.mxu1 %v7554_v7  ;;  %v7540_v6 = vpack.c.bf16 %v3009_v58, %v3001_v56  ;;  %v7572_v7 = vpack.c.bf16 %v3011_v0, %v3003_v59  ;;  %v7618_v56 = vpack.c.bf16 %v3346_v50, %v3338_v49  ;;  %v3352_v58 = vld [vmem:[#allocation10 + $0xd80] sm:$0xff]  ;;  %v3427_v49 = vld [vmem:[#allocation10 + $0xfd8] sm:$0xff] }
 0x3b7   : > { %7525 = vmatprep.subr.bf16.mxu0 %v7524_v10  ;;  %7557 = vmatprep.subr.bf16.mxu1 %v7556_v34  ;;  %v3305_v10 = vld [vmem:[#allocation10 + $0xc08] sm:$0xff]  ;;  %v3360_v59 = vld [vmem:[#allocation10 + $0xdc0] sm:$0xff] }
 0x3b8   : > { %v3313_v34 = vld [vmem:[#allocation10 + $0xc48] sm:$0xff]  ;;  %v7590_v9 = vpack.c.bf16 %v3360_v59, %v3352_v58  ;;  %v3426_v58 = vld [vmem:[#allocation10 + $0xfd0] sm:$0xff] }
 0x3b9   : > { %v3309_v59 = vld [vmem:[#allocation10 + $0xc28] sm:$0xff] }
 0x3ba   : > { %7527 = vmatpush1.bf16.msra.mxu0 %v7526_v19  ;;  %7559 = vmatpush1.bf16.msra.mxu1 %v7558_v20  ;;  %v7576_v19 = vpack.c.bf16 %v3313_v34, %v3305_v10  ;;  %v7608_v20 = vpack.c.bf16 %v3315_v13, %v3307_v12  ;;  %v3368_v34 = vld [vmem:[#allocation10 + $0xe00] sm:$0xff] }
 0x3bb   : > { %7529 = vmatprep.subr.bf16.mxu0 %v7528_v25  ;;  %7561 = vmatprep.subr.bf16.mxu1 %v7560_v26  ;;  %v3321_v25 = vld [vmem:[#allocation10 + $0xc88] sm:$0xff]  ;;  %v3376_v12 = vld [vmem:[#allocation10 + $0xe40] sm:$0xff] }
 0x3bc   : > { %v3329_v26 = vld [vmem:[#allocation10 + $0xcc8] sm:$0xff]  ;;  %v7594_v23 = vpack.c.bf16 %v3376_v12, %v3368_v34  ;;  %v3318_v34 = vld [vmem:[#allocation10 + $0xc70] sm:$0xff] }
 0x3bd   : > { %v3325_v12 = vld [vmem:[#allocation10 + $0xca8] sm:$0xff] }
 0x3be   : > { %7531 = vmatpush1.bf16.msra.mxu0 %v7530_v36  ;;  %7563 = vmatpush1.bf16.msra.mxu1 %v7562_v37  ;;  %v7580_v36 = vpack.c.bf16 %v3329_v26, %v3321_v25  ;;  %v7612_v37 = vpack.c.bf16 %v3331_v29, %v3323_v28  ;;  %v3384_v26 = vld [vmem:[#allocation10 + $0xe80] sm:$0xff] }
 0x3bf   : > { %7533 = vmatprep.subr.bf16.mxu0 %v7532_v40  ;;  %7565 = vmatprep.subr.bf16.mxu1 %v7564_v41  ;;  %v3337_v40 = vld [vmem:[#allocation10 + $0xd08] sm:$0xff]  ;;  %v3392_v28 = vld [vmem:[#allocation10 + $0xec0] sm:$0xff] }
 0x3c0   : > { %v3345_v41 = vld [vmem:[#allocation10 + $0xd48] sm:$0xff]  ;;  %v7598_v38 = vpack.c.bf16 %v3392_v28, %v3384_v26  ;;  %v3326_v26 = vld [vmem:[#allocation10 + $0xcb0] sm:$0xff] }
 0x3c1   : > { %v3334_v28 = vld [vmem:[#allocation10 + $0xcf0] sm:$0xff] }
 0x3c2   : > { %7535 = vmatpush1.bf16.msra.mxu0 %v7534_v52  ;;  %7567 = vmatpush1.bf16.msra.mxu1 %v7566_v48  ;;  %v7584_v52 = vpack.c.bf16 %v3345_v41, %v3337_v40  ;;  %v7616_v48 = vpack.c.bf16 %v3347_v43, %v3339_v42  ;;  %v3400_v41 = vld [vmem:[#allocation10 + $0xf00] sm:$0xff] }
 0x3c3   : > { %7537 = vmatprep.subr.bf16.mxu0 %v7536_v51  ;;  %7569 = vmatprep.subr.bf16.mxu1 %v7568_v57  ;;  %v3353_v51 = vld [vmem:[#allocation10 + $0xd88] sm:$0xff]  ;;  %v3408_v42 = vld [vmem:[#allocation10 + $0xf40] sm:$0xff] }
 0x3c4   : > { %v3361_v57 = vld [vmem:[#allocation10 + $0xdc8] sm:$0xff]  ;;  %v7602_v50 = vpack.c.bf16 %v3408_v42, %v3400_v41  ;;  %v3342_v41 = vld [vmem:[#allocation10 + $0xd30] sm:$0xff] }
 0x3c5   : > { %v7588_v0 = vpack.c.bf16 %v3361_v57, %v3353_v51  ;;  %v3416_v57 = vld [vmem:[#allocation10 + $0xf80] sm:$0xff]  ;;  %v3350_v42 = vld [vmem:[#allocation10 + $0xd70] sm:$0xff] }
 0x3c6   : > { %7539 = vmatpush1.bf16.msra.mxu0 %v7538_v2  ;;  %7571 = vmatpush1.bf16.msra.mxu1 %v7570_v3  ;;  %v7620_v2 = vpack.c.bf16 %v3363_v54, %v3355_v53  ;;  %v3354_v3 = vld [vmem:[#allocation10 + $0xd90] sm:$0xff]  ;;  %v3424_v53 = vld [vmem:[#allocation10 + $0xfc0] sm:$0xff] }
 0x3c7   : > { %7541 = vmatprep.subr.bf16.mxu0 %v7540_v6  ;;  %7573 = vmatprep.subr.bf16.mxu1 %v7572_v7  ;;  %v3377_v6 = vld [vmem:[#allocation10 + $0xe48] sm:$0xff]  ;;  %v3371_v7 = vld [vmem:[#allocation10 + $0xe18] sm:$0xff]  ;;  %v7622_v10 = vpack.c.bf16 %v3362_v4, %v3354_v3  ;;  %v7606_v4 = vpack.c.bf16 %v3424_v53, %v3416_v57  ;;  %v3358_v57 = vld [vmem:[#allocation10 + $0xdb0] sm:$0xff] }
 0x3c8   : > { %v7592_v13 = vpack.c.bf16 %v3377_v6, %v3369_v5  ;;  %v3319_v3 = vld [vmem:[#allocation10 + $0xc78] sm:$0xff]  ;;  %v3308_v6 = vld [vmem:[#allocation10 + $0xc20] sm:$0xff]  ;;  %v3366_v53 = vld [vmem:[#allocation10 + $0xdf0] sm:$0xff] }
 0x3ca   : > { %7543 = vmatpush1.bf16.msra.mxu0 %v7542_v14  ;;  %7575 = vmatpush1.bf16.msra.mxu1 %v7574_v18  ;;  %v7624_v14 = vpack.c.bf16 %v3379_v8, %v3371_v7  ;;  %v3370_v18 = vld [vmem:[#allocation10 + $0xe10] sm:$0xff]  ;;  %v3316_v7 = vld [vmem:[#allocation10 + $0xc60] sm:$0xff] }
 0x3cb   : > { %7577 = vmatprep.subr.bf16.mxu0 %v7576_v19  ;;  %7609 = vmatprep.subr.bf16.mxu1 %v7608_v20  ;;  %v3393_v19 = vld [vmem:[#allocation10 + $0xec8] sm:$0xff]  ;;  %v3387_v20 = vld [vmem:[#allocation10 + $0xe98] sm:$0xff]  ;;  %v7626_v25 = vpack.c.bf16 %v3378_v17, %v3370_v18 }
 0x3cc   : > { %v7596_v29 = vpack.c.bf16 %v3393_v19, %v3385_v32  ;;  %v3335_v18 = vld [vmem:[#allocation10 + $0xcf8] sm:$0xff]  ;;  %v7642_v32 = vpack.c.bf16 %v3316_v7, %v3308_v6  ;;  %v3374_v6 = vld [vmem:[#allocation10 + $0xe30] sm:$0xff] }
 0x3cd   : > { %3219 = vmatmul.mubr.f32.vlgmr.msra.gmra.mrb[6].mxu0 %v9533_v39  ;;  %3290 = vmatmul.mubr.f32.vlgmr.msra.gmra.mrb[6].mxu1 %v9533_v39  ;;  %v7586_v39 = vpack.c.bf16 %v3344_v47, %v3336_v46  ;;  %v3410_v46 = vld [vmem:[#allocation10 + $0xf50] sm:$0xff]  ;;  %v3417_v47 = vld [vmem:[#allocation10 + $0xf88] sm:$0xff] }
 0x3ce   : > { %7579 = vmatpush1.bf16.msra.mxu0 %v7578_v30  ;;  %7611 = vmatpush1.bf16.msra.mxu1 %v7610_v31  ;;  %v7628_v30 = vpack.c.bf16 %v3395_v62, %v3387_v20  ;;  %v3386_v31 = vld [vmem:[#allocation10 + $0xe90] sm:$0xff]  ;;  %v3324_v20 = vld [vmem:[#allocation10 + $0xca0] sm:$0xff] }
 0x3cf   : > { %7581 = vmatprep.subr.bf16.mxu0 %v7580_v36  ;;  %7613 = vmatprep.subr.bf16.mxu1 %v7612_v37  ;;  %v3409_v36 = vld [vmem:[#allocation10 + $0xf48] sm:$0xff]  ;;  %v3403_v37 = vld [vmem:[#allocation10 + $0xf18] sm:$0xff]  ;;  %v7630_v40 = vpack.c.bf16 %v3394_v33, %v3386_v31  ;;  %v3332_v62 = vld [vmem:[#allocation10 + $0xce0] sm:$0xff] }
 0x3d0   : > { %3496 = vmatprep.mubr.f32.mxu0 %v10278_v11  ;;  %3567 = vmatprep.mubr.f32.mxu1 %v10278_v11  ;;  %v7600_v43 = vpack.c.bf16 %v3409_v36, %v3401_v35  ;;  %v9543_v17 = vld [vmem:[#allocation21 + $0x18] sm:$0xff]  ;;  %v7646_v35 = vpack.c.bf16 %v3332_v62, %v3324_v20  ;;  %v7678_v36 = vpack.c.bf16 %v3334_v28, %v3326_v26 }
 0x3d1   : > { %v3343_v31 = vld [vmem:[#allocation10 + $0xd38] sm:$0xff]  ;;  %v3382_v7 = vld [vmem:[#allocation10 + $0xe70] sm:$0xff] }
 0x3d2   : > { %7583 = vmatpush1.bf16.msra.mxu0 %v7582_v44  ;;  %7615 = vmatpush1.bf16.msra.mxu1 %v7614_v45  ;;  %v7632_v44 = vpack.c.bf16 %v3411_v55, %v3403_v37  ;;  %v3402_v45 = vld [vmem:[#allocation10 + $0xf10] sm:$0xff]  ;;  %v3351_v33 = vld [vmem:[#allocation10 + $0xd78] sm:$0xff]  ;;  %v3340_v37 = vld [vmem:[#allocation10 + $0xd20] sm:$0xff] }
 0x3d3   : > { %7585 = vmatprep.subr.bf16.mxu0 %v7584_v52  ;;  %7617 = vmatprep.subr.bf16.mxu1 %v7616_v48  ;;  %v3425_v52 = vld [vmem:[#allocation10 + $0xfc8] sm:$0xff]  ;;  %v3419_v48 = vld [vmem:[#allocation10 + $0xf98] sm:$0xff]  ;;  %v7634_v51 = vpack.c.bf16 %v3410_v46, %v3402_v45  ;;  %v3348_v55 = vld [vmem:[#allocation10 + $0xd60] sm:$0xff] }
 0x3d4   : > { %v7604_v54 = vpack.c.bf16 %v3425_v52, %v3417_v47  ;;  %v3359_v45 = vld [vmem:[#allocation10 + $0xdb8] sm:$0xff]  ;;  %v7650_v47 = vpack.c.bf16 %v3348_v55, %v3340_v37  ;;  %v7682_v52 = vpack.c.bf16 %v3350_v42, %v3342_v41  ;;  %v3390_v20 = vld [vmem:[#allocation10 + $0xeb0] sm:$0xff] }
 0x3d5   : > { %v3367_v46 = vld [vmem:[#allocation10 + $0xdf8] sm:$0xff]  ;;  %v3398_v62 = vld [vmem:[#allocation10 + $0xef0] sm:$0xff] }
 0x3d6   : > { %7587 = vmatpush1.bf16.msra.mxu0 %v7586_v39  ;;  %7619 = vmatpush1.bf16.msra.mxu1 %v7618_v56  ;;  %v7636_v39 = vpack.c.bf16 %v3427_v49, %v3419_v48  ;;  %v3418_v56 = vld [vmem:[#allocation10 + $0xf90] sm:$0xff]  ;;  %v3356_v48 = vld [vmem:[#allocation10 + $0xda0] sm:$0xff]  ;;  %v3407_v26 = vld [vmem:[#allocation10 + $0xf38] sm:$0xff] }
 0x3d7   : > { %7589 = vmatprep.subr.bf16.mxu0 %v7588_v0  ;;  %7621 = vmatprep.subr.bf16.mxu1 %v7620_v2  ;;  %v3317_v0 = vld [vmem:[#allocation10 + $0xc68] sm:$0xff]  ;;  %v3311_v2 = vld [vmem:[#allocation10 + $0xc38] sm:$0xff]  ;;  %v7638_v5 = vpack.c.bf16 %v3426_v58, %v3418_v56  ;;  %v3364_v49 = vld [vmem:[#allocation10 + $0xde0] sm:$0xff] }
 0x3d8   : > { %v7640_v8 = vpack.c.bf16 %v3317_v0, %v3309_v59  ;;  %v3375_v56 = vld [vmem:[#allocation10 + $0xe38] sm:$0xff]  ;;  %v7654_v59 = vpack.c.bf16 %v3364_v49, %v3356_v48  ;;  %v7686_v0 = vpack.c.bf16 %v3366_v53, %v3358_v57  ;;  %v3406_v37 = vld [vmem:[#allocation10 + $0xf30] sm:$0xff]  ;;  %v3765_v57 = vld [vmem:[#allocation13] sm:$0xff] }
 0x3d9   : > { %v3383_v58 = vld [vmem:[#allocation10 + $0xe78] sm:$0xff]  ;;  %v3414_v55 = vld [vmem:[#allocation10 + $0xf70] sm:$0xff] }
 0x3da   : > { %7591 = vmatpush1.bf16.msra.mxu0 %v7590_v9  ;;  %7623 = vmatpush1.bf16.msra.mxu1 %v7622_v10  ;;  %v7672_v9 = vpack.c.bf16 %v3319_v3, %v3311_v2  ;;  %v3310_v10 = vld [vmem:[#allocation10 + $0xc30] sm:$0xff]  ;;  %v3372_v2 = vld [vmem:[#allocation10 + $0xe20] sm:$0xff]  ;;  %v3415_v28 = vld [vmem:[#allocation10 + $0xf78] sm:$0xff] }
 0x3db   : > { %7593 = vmatprep.subr.bf16.mxu0 %v7592_v13  ;;  %7625 = vmatprep.subr.bf16.mxu1 %v7624_v14  ;;  %v3333_v13 = vld [vmem:[#allocation10 + $0xce8] sm:$0xff]  ;;  %v3327_v14 = vld [vmem:[#allocation10 + $0xcb8] sm:$0xff]  ;;  %v7674_v19 = vpack.c.bf16 %v3318_v34, %v3310_v10  ;;  %v3380_v3 = vld [vmem:[#allocation10 + $0xe60] sm:$0xff] }
 0x3dc   : > { %v3391_v10 = vld [vmem:[#allocation10 + $0xeb8] sm:$0xff]  ;;  %v3422_v48 = vld [vmem:[#allocation10 + $0xfb0] sm:$0xff] }
 0x3dd   : > { %v3399_v34 = vld [vmem:[#allocation10 + $0xef8] sm:$0xff]  ;;  %v3430_v49 = vld [vmem:[#allocation10 + $0xff0] sm:$0xff] }
 0x3de   : > { %7595 = vmatpush1.bf16.msra.mxu0 %v7594_v23  ;;  %7627 = vmatpush1.bf16.msra.mxu1 %v7626_v25  ;;  %v7644_v23 = vpack.c.bf16 %v3333_v13, %v3325_v12  ;;  %v7676_v25 = vpack.c.bf16 %v3335_v18, %v3327_v14  ;;  %v7658_v12 = vpack.c.bf16 %v3380_v3, %v3372_v2  ;;  %v3388_v14 = vld [vmem:[#allocation10 + $0xea0] sm:$0xff]  ;;  %v3423_v41 = vld [vmem:[#allocation10 + $0xfb8] sm:$0xff]  ;;  %v3766_v53 = vld [vmem:[#allocation13 + $0x8] sm:$0xff] }
 0x3df   : > { %7597 = vmatprep.subr.bf16.mxu0 %v7596_v29  ;;  %7629 = vmatprep.subr.bf16.mxu1 %v7628_v30  ;;  %v3341_v29 = vld [vmem:[#allocation10 + $0xd28] sm:$0xff]  ;;  %v7690_v13 = vpack.c.bf16 %v3382_v7, %v3374_v6  ;;  %v3396_v18 = vld [vmem:[#allocation10 + $0xee0] sm:$0xff]  ;;  %v3431_v42 = vld [vmem:[#allocation10 + $0xff8] sm:$0xff] }
 0x3e0   : > { %v3349_v30 = vld [vmem:[#allocation10 + $0xd68] sm:$0xff]  ;;  %v3768_v2 = vld [vmem:[#allocation13 + $0x18] sm:$0xff] }
 0x3e1   : > { %v3769_v7 = vld [vmem:[#allocation13 + $0x20] sm:$0xff] }
 0x3e2   : > { %7599 = vmatpush1.bf16.msra.mxu0 %v7598_v38  ;;  %7631 = vmatpush1.bf16.msra.mxu1 %v7630_v40  ;;  %v7648_v38 = vpack.c.bf16 %v3349_v30, %v3341_v29  ;;  %v7680_v40 = vpack.c.bf16 %v3351_v33, %v3343_v31  ;;  %v7662_v29 = vpack.c.bf16 %v3396_v18, %v3388_v14  ;;  %v3404_v31 = vld [vmem:[#allocation10 + $0xf20] sm:$0xff] }
 0x3e3   : > { %7601 = vmatprep.subr.bf16.mxu0 %v7600_v43  ;;  %7633 = vmatprep.subr.bf16.mxu1 %v7632_v44  ;;  %v3357_v43 = vld [vmem:[#allocation10 + $0xda8] sm:$0xff]  ;;  %v7694_v30 = vpack.c.bf16 %v3398_v62, %v3390_v20  ;;  %v3412_v33 = vld [vmem:[#allocation10 + $0xf60] sm:$0xff] }
 0x3e4   : > { %v3365_v44 = vld [vmem:[#allocation10 + $0xde8] sm:$0xff]  ;;  %v3772_v14 = vld [vmem:[#allocation13 + $0x38] sm:$0xff] }
 0x3e5   : > { %v3773_v62 = vld [vmem:[#allocation13 + $0x40] sm:$0xff] }
 0x3e6   : > { %7603 = vmatpush1.bf16.msra.mxu0 %v7602_v50  ;;  %7635 = vmatpush1.bf16.msra.mxu1 %v7634_v51  ;;  %v7652_v50 = vpack.c.bf16 %v3365_v44, %v3357_v43  ;;  %v7684_v51 = vpack.c.bf16 %v3367_v46, %v3359_v45  ;;  %v7666_v43 = vpack.c.bf16 %v3412_v33, %v3404_v31  ;;  %v3420_v45 = vld [vmem:[#allocation10 + $0xfa0] sm:$0xff] }
 0x3e7   : > { %7605 = vmatprep.subr.bf16.mxu0 %v7604_v54  ;;  %7637 = vmatprep.subr.bf16.mxu1 %v7636_v39  ;;  %v3373_v54 = vld [vmem:[#allocation10 + $0xe28] sm:$0xff]  ;;  %v7698_v44 = vpack.c.bf16 %v3414_v55, %v3406_v37  ;;  %v3776_v31 = vld [vmem:[#allocation13 + $0x58] sm:$0xff] }
 0x3e8   : > { %v3381_v39 = vld [vmem:[#allocation10 + $0xe68] sm:$0xff] }
 0x3e9   : > { %v3777_v55 = vld [vmem:[#allocation13 + $0x60] sm:$0xff] }
 0x3ea   : > { %7607 = vmatpush1.bf16.msra.mxu0 %v7606_v4  ;;  %7639 = vmatpush1.bf16.msra.mxu1 %v7638_v5  ;;  %v7656_v4 = vpack.c.bf16 %v3381_v39, %v3373_v54  ;;  %v7688_v5 = vpack.c.bf16 %v3383_v58, %v3375_v56  ;;  %v9551_v54 = vpack.c.bf16 %v3766_v53, %v3765_v57  ;;  %v8965_v39 = vmov 0.0|0.0   ;;  %v3781_v56 = vld [vmem:[#allocation13 + $0x80] sm:$0xff]  ;;  %v3782_v58 = vld [vmem:[#allocation13 + $0x88] sm:$0xff] }
 0x3eb   : > { %7641 = vmatprep.subr.bf16.mxu0 %v7640_v8  ;;  %7673 = vmatprep.subr.bf16.mxu1 %v7672_v9  ;;  %v3389_v8 = vld [vmem:[#allocation10 + $0xea8] sm:$0xff] }
 0x3ec   : > { %v3397_v9 = vld [vmem:[#allocation10 + $0xee8] sm:$0xff] }
 0x3ed   : > { %3497 = vmatmul.mubr.f32.vlgmr.msra.gmra.mrb[4].mxu0 %v9543_v17  ;;  %3568 = vmatmul.mubr.f32.vlgmr.msra.gmra.mrb[4].mxu1 %v9543_v17 }
 0x3ee   : > { %7643 = vmatpush1.bf16.msra.mxu0 %v7642_v32  ;;  %7675 = vmatpush1.bf16.msra.mxu1 %v7674_v19  ;;  %v7660_v32 = vpack.c.bf16 %v3397_v9, %v3389_v8  ;;  %v7692_v19 = vpack.c.bf16 %v3399_v34, %v3391_v10  ;;  %v3770_v8 = vld [vmem:[#allocation13 + $0x28] sm:$0xff]  ;;  %v3785_v10 = vld [vmem:[#allocation13 + $0xa0] sm:$0xff] }
 0x3ef   : > { %7645 = vmatprep.subr.bf16.mxu0 %v7644_v23  ;;  %7677 = vmatprep.subr.bf16.mxu1 %v7676_v25  ;;  %v3405_v23 = vld [vmem:[#allocation10 + $0xf28] sm:$0xff]  ;;  %v9569_v9 = vpack.c.bf16 %v3770_v8, %v3769_v7  ;;  %v3786_v34 = vld [vmem:[#allocation13 + $0xa8] sm:$0xff] }
 0x3f0   : > { %3638 = vmatprep.mubr.f32.mxu0 %v10278_v11  ;;  %3709 = vmatprep.mubr.f32.mxu1 %v10278_v11  ;;  %v3413_v25 = vld [vmem:[#allocation10 + $0xf68] sm:$0xff] }
 0x3f2   : > { %7647 = vmatpush1.bf16.msra.mxu0 %v7646_v35  ;;  %7679 = vmatpush1.bf16.msra.mxu1 %v7678_v36  ;;  %v7664_v35 = vpack.c.bf16 %v3413_v25, %v3405_v23  ;;  %v7696_v36 = vpack.c.bf16 %v3415_v28, %v3407_v26  ;;  %v3774_v23 = vld [vmem:[#allocation13 + $0x48] sm:$0xff]  ;;  %v3789_v26 = vld [vmem:[#allocation13 + $0xc0] sm:$0xff] }
 0x3f3   : > { %7649 = vmatprep.subr.bf16.mxu0 %v7648_v38  ;;  %7681 = vmatprep.subr.bf16.mxu1 %v7680_v40  ;;  %v3421_v38 = vld [vmem:[#allocation10 + $0xfa8] sm:$0xff]  ;;  %v9585_v25 = vpack.c.bf16 %v3774_v23, %v3773_v62  ;;  %v3790_v28 = vld [vmem:[#allocation13 + $0xc8] sm:$0xff] }
 0x3f4   : > { %v3429_v40 = vld [vmem:[#allocation10 + $0xfe8] sm:$0xff] }
 0x3f5   : > { %v7668_v46 = vpack.c.bf16 %v3429_v40, %v3421_v38  ;;  %v3778_v38 = vld [vmem:[#allocation13 + $0x68] sm:$0xff] }
 0x3f6   : > { %7651 = vmatpush1.bf16.msra.mxu0 %v7650_v47  ;;  %7683 = vmatpush1.bf16.msra.mxu1 %v7682_v52  ;;  %v7700_v47 = vpack.c.bf16 %v3431_v42, %v3423_v41  ;;  %v3428_v52 = vld [vmem:[#allocation10 + $0xfe0] sm:$0xff]  ;;  %v9601_v40 = vpack.c.bf16 %v3778_v38, %v3777_v55  ;;  %v3793_v41 = vld [vmem:[#allocation13 + $0xe0] sm:$0xff]  ;;  %v3794_v42 = vld [vmem:[#allocation13 + $0xe8] sm:$0xff] }
 0x3f7   : > { %7653 = vmatprep.subr.bf16.mxu0 %v7652_v50  ;;  %7685 = vmatprep.subr.bf16.mxu1 %v7684_v51  ;;  %v7670_v50 = vpack.c.bf16 %v3428_v52, %v3420_v45  ;;  %v7702_v51 = vpack.c.bf16 %v3430_v49, %v3422_v48  ;;  %v3780_v45 = vld [vmem:[#allocation13 + $0x78] sm:$0xff] }
 0x3f8   : > { %v3796_v52 = vld [vmem:[#allocation13 + $0xf8] sm:$0xff] }
 0x3f9   : > { %v2002_v49 = vld [vmem:[#allocation11] sm:$0xff] }
 0x3fa   : > { %7655 = vmatpush1.bf16.msra.mxu0 %v7654_v59  ;;  %7687 = vmatpush1.bf16.msra.mxu1 %v7686_v0  ;;  %v9556_v59 = vpack.c.bf16 %v3782_v58, %v3781_v56  ;;  %v3767_v0 = vld [vmem:[#allocation13 + $0x10] sm:$0xff]  ;;  %v2423_v53 = vrot.slane %v2002_v49, %v1076_v1  ;;  %v2435_v62 = vrot.slane %v2002_v49, %v1088_v21 }
 0x3fb   : > { %7657 = vmatprep.subr.bf16.mxu0 %v7656_v4  ;;  %7689 = vmatprep.subr.bf16.mxu1 %v7688_v5  ;;  %v9561_v3 = vpack.c.bf16 %v3768_v2, %v3767_v0  ;;  %v3783_v4 = vld [vmem:[#allocation13 + $0x90] sm:$0xff]  ;;  %v3784_v5 = vld [vmem:[#allocation13 + $0x98] sm:$0xff] }
 0x3fc   : > { %v9564_v6 = vpack.c.bf16 %v3784_v5, %v3783_v4 }
 0x3fe   : > { %7659 = vmatpush1.bf16.msra.mxu0 %v7658_v12  ;;  %7691 = vmatpush1.bf16.msra.mxu1 %v7690_v13  ;;  %v9572_v12 = vpack.c.bf16 %v3786_v34, %v3785_v10  ;;  %v3771_v13 = vld [vmem:[#allocation13 + $0x30] sm:$0xff]  ;;  %v2427_v34 = vrot.slane %v2002_v49, %v1080_v16 }
 0x3ff   : > { %7661 = vmatprep.subr.bf16.mxu0 %v7660_v32  ;;  %7693 = vmatprep.subr.bf16.mxu1 %v7692_v19  ;;  %v9577_v18 = vpack.c.bf16 %v3772_v14, %v3771_v13  ;;  %v3787_v32 = vld [vmem:[#allocation13 + $0xb0] sm:$0xff]  ;;  %v3788_v19 = vld [vmem:[#allocation13 + $0xb8] sm:$0xff] }
 0x400   : > { %v9580_v20 = vpack.c.bf16 %v3788_v19, %v3787_v32 }
 0x402   : > { %7663 = vmatpush1.bf16.msra.mxu0 %v7662_v29  ;;  %7695 = vmatpush1.bf16.msra.mxu1 %v7694_v30  ;;  %v9588_v29 = vpack.c.bf16 %v3790_v28, %v3789_v26  ;;  %v3775_v30 = vld [vmem:[#allocation13 + $0x50] sm:$0xff] }
 0x403   : > { %7665 = vmatprep.subr.bf16.mxu0 %v7664_v35  ;;  %7697 = vmatprep.subr.bf16.mxu1 %v7696_v36  ;;  %v9593_v33 = vpack.c.bf16 %v3776_v31, %v3775_v30  ;;  %v3791_v35 = vld [vmem:[#allocation13 + $0xd0] sm:$0xff]  ;;  %v3792_v36 = vld [vmem:[#allocation13 + $0xd8] sm:$0xff]  ;;  %v2439_v30 = vrot.slane %v2002_v49, %v1092_v24 }
 0x404   : > { %v9596_v37 = vpack.c.bf16 %v3792_v36, %v3791_v35 }
 0x406   : > { %7667 = vmatpush1.bf16.msra.mxu0 %v7666_v43  ;;  %7699 = vmatpush1.bf16.msra.mxu1 %v7698_v44  ;;  %v9604_v43 = vpack.c.bf16 %v3794_v42, %v3793_v41  ;;  %v3779_v44 = vld [vmem:[#allocation13 + $0x70] sm:$0xff] }
 0x407   : > { %7669 = vmatprep.subr.bf16.mxu0 %v7668_v46  ;;  %7701 = vmatprep.subr.bf16.mxu1 %v7700_v47  ;;  %v9609_v46 = vpack.c.bf16 %v3780_v45, %v3779_v44  ;;  %v3795_v47 = vld [vmem:[#allocation13 + $0xf0] sm:$0xff]  ;;  %v8476_v44 = vld [vmem:[#allocation21 + $0x10] sm:$0xff] }
 0x408   : > { %v9611_v48 = vpack.c.bf16 %v3796_v52, %v3795_v47 }
 0x40a   : > { %7671 = vmatpush1.bf16.msra.mxu0 %v7670_v50  ;;  %7703 = vmatpush1.bf16.msra.mxu1 %v7702_v51  ;;  %v2419_v50 = vrot.slane %v2002_v49, %v1072_v63  ;;  %v2431_v63 = vrot.slane %v2002_v49, %v1084_v15 }
 0x40b   : > { %7704 = vmatprep.subr.bf16.mxu0 %v8965_v39  ;;  %7728 = vmatprep.subr.bf16.mxu1 %v8965_v39 }
 0x40d   : > { %3639 = vmatmul.mubr.f32.vlgmr.msra.gmra.mrb[6].mxu0 %v9543_v17  ;;  %3710 = vmatmul.mubr.f32.vlgmr.msra.gmra.mrb[6].mxu1 %v9543_v17 }
 0x40e   : > { %6175 = vmatprep.mubr.msk.f32.mxu0 %vm8966_vm0, %v10278_v11  ;;  %6210 = vmatprep.mubr.msk.f32.mxu1 %vm8966_vm0, %v10278_v11 }
 0x413   : > { %7706 = vmatpush3.bf16.xpose.msra.mxu0 %v9551_v54  ;;  %7730 = vmatpush3.bf16.xpose.msra.mxu1 %v9556_v59 }
 0x414   : > { %7707 = vmatprep.subr.bf16.mxu0 %v8965_v39  ;;  %7731 = vmatprep.subr.bf16.mxu1 %v8965_v39 }
 0x41b   : > { %7709 = vmatpush3.bf16.xpose.msra.mxu0 %v9561_v3  ;;  %7733 = vmatpush3.bf16.xpose.msra.mxu1 %v9564_v6 }
 0x41c   : > { %7710 = vmatprep.subr.bf16.mxu0 %v8965_v39  ;;  %7734 = vmatprep.subr.bf16.mxu1 %v8965_v39 }
 0x423   : > { %7712 = vmatpush3.bf16.xpose.msra.mxu0 %v9569_v9  ;;  %7736 = vmatpush3.bf16.xpose.msra.mxu1 %v9572_v12 }
 0x424   : > { %7713 = vmatprep.subr.bf16.mxu0 %v8965_v39  ;;  %7737 = vmatprep.subr.bf16.mxu1 %v8965_v39 }
 0x42b   : > { %7715 = vmatpush3.bf16.xpose.msra.mxu0 %v9577_v18  ;;  %7739 = vmatpush3.bf16.xpose.msra.mxu1 %v9580_v20 }
 0x42c   : > { %7716 = vmatprep.subr.bf16.mxu0 %v8965_v39  ;;  %7740 = vmatprep.subr.bf16.mxu1 %v8965_v39 }
 0x433   : > { %7718 = vmatpush3.bf16.xpose.msra.mxu0 %v9585_v25  ;;  %7742 = vmatpush3.bf16.xpose.msra.mxu1 %v9588_v29 }
 0x434   : > { %7719 = vmatprep.subr.bf16.mxu0 %v8965_v39  ;;  %7743 = vmatprep.subr.bf16.mxu1 %v8965_v39 }
 0x43b   : > { %7721 = vmatpush3.bf16.xpose.msra.mxu0 %v9593_v33  ;;  %7745 = vmatpush3.bf16.xpose.msra.mxu1 %v9596_v37 }
 0x43c   : > { %7722 = vmatprep.subr.bf16.mxu0 %v8965_v39  ;;  %7746 = vmatprep.subr.bf16.mxu1 %v8965_v39 }
 0x443   : > { %7724 = vmatpush3.bf16.xpose.msra.mxu0 %v9601_v40  ;;  %7748 = vmatpush3.bf16.xpose.msra.mxu1 %v9604_v43 }
 0x444   : > { %7725 = vmatprep.subr.bf16.mxu0 %v8965_v39  ;;  %7749 = vmatprep.subr.bf16.mxu1 %v8965_v39 }
 0x44b   : > { %7727 = vmatpush3.bf16.xpose.msra.mxu0 %v9609_v46  ;;  %7751 = vmatpush3.bf16.xpose.msra.mxu1 %v9611_v48 }
 0x44c   : > { %7752 = vmatprep.subr.bf16.mxu0 %v8965_v39  ;;  %7776 = vmatprep.subr.bf16.mxu1 %v8965_v39 }
 0x4c0   : > { %v3498_v51 = vpop.f32.mrb[4].mxu0  ;;  %v3569_v57 = vpop.f32.mrb[4].mxu1 }
 0x4c1   : > { %v8168_v56 = vadd.f32 %v3498_v51, %v2419_v50  ;;  %v3500_v58 = vpop.f32.mrb[5].mxu0  ;;  %v3571_v0 = vpop.f32.mrb[5].mxu1  ;;  %v8170_v32 = vadd.f32 %v3569_v57, %v2427_v34  ;;  %v2447_v51 = vrot.slane %v2002_v49, %v1100_v22  ;;  %v2443_v57 = vrot.slane %v2002_v49, %v1096_v27 }
 0x4c2   : > { %v8169_v4 = vadd.f32 %v3500_v58, %v2423_v53  ;;  %v8171_v1 = vadd.f32 %v3571_v0, %v2431_v63 }
 0x4c3   : > { %v5806_v2 = vmul.f32 -1.442695, %v8168_v56 }
 0x4c4   : > { %v5807_v5 = vmul.f32 -1.442695, %v8169_v4 }
 0x4c5   : > { %8421 = vpow2.f32 %v5806_v2 }
 0x4c6   : > { %8423 = vpow2.f32 %v5807_v5  ;;  %v8967_v5 = vmov 1966171168  }
 0x4cf   : > { %v8422_v7 = vpop.eup %8421 }
 0x4d0   : > { %v3727_v8 = vadd.f32 1.0, %v8422_v7  ;;  %v8424_v10 = vpop.eup %8423  ;;  %v3896_v7 = vunpack.c.l.s4 %v8967_v5  ;;  %v3807_v5 = vld [vmem:[#allocation13 + $0x150] sm:$0xff] }
 0x4d1   : > { %v3733_v13 = vadd.f32 1.0, %v8424_v10 }
 0x4d2   : > { %8425 = vrcp.f32 %v3727_v8  ;;  %v3897_v63 = vunpack.c.0.s8 %v3896_v7  ;;  %v3808_v7 = vld [vmem:[#allocation13 + $0x158] sm:$0xff] }
 0x4d3   : > { %8427 = vrcp.f32 %v3733_v13 }
 0x4d4   : > { %v9639_v27 = vsub.s32 %v3897_v63, %v9468_v61  ;;  %v9697_v63 = vpack.c.bf16 %v3808_v7, %v3807_v5  ;;  %v3834_v5 = vld [vmem:[#allocation13 + $0x228] sm:$0xff]  ;;  %v3849_v7 = vld [vmem:[#allocation13 + $0x2a0] sm:$0xff] }
 0x4dc   : > { %v8426_v14 = vpop.eup %8425 }
 0x4dd   : > { %v3736_v19 = vmul.f32 %v8426_v14, %v8171_v1  ;;  %v8428_v55 = vpop.eup %8427  ;;  %v3797_v14 = vld [vmem:[#allocation13 + $0x100] sm:$0xff] }
 0x4de   : > { %v3739_v41 = vsub.f32 1.0, %v8428_v55  ;;  %v3741_v45 = vmul.f32 %v8476_v44, %v8428_v55  ;;  %v3818_v44 = vld [vmem:[#allocation13 + $0x1a8] sm:$0xff] }
 0x4df   : > { %v3737_v23 = vadd.f32 %v8170_v32, %v3736_v19  ;;  %v3798_v32 = vld [vmem:[#allocation13 + $0x108] sm:$0xff] }
 0x4e0   : > { %v3640_v26 = vpop.f32.mrb[6].mxu0  ;;  %v3711_v28 = vpop.f32.mrb[6].mxu1 }
 0x4e1   : > { %8429 = vtanh.f32 %v3737_v23  ;;  %v8172_v15 = vadd.f32 %v3640_v26, %v2435_v62  ;;  %v3642_v31 = vpop.f32.mrb[7].mxu0  ;;  %v3713_v35 = vpop.f32.mrb[7].mxu1  ;;  %v8174_v0 = vadd.f32 %v3711_v28, %v2443_v57  ;;  %v3813_v62 = vld [vmem:[#allocation13 + $0x180] sm:$0xff]  ;;  %v3814_v23 = vld [vmem:[#allocation13 + $0x188] sm:$0xff]  ;;  %v9645_v26 = vpack.c.bf16 %v3798_v32, %v3797_v14 }
 0x4e2   : > { %v8173_v36 = vadd.f32 %v3642_v31, %v2439_v30  ;;  %v8175_v56 = vadd.f32 %v3713_v35, %v2447_v51  ;;  %v9650_v30 = vpack.c.bf16 %v3814_v23, %v3813_v62  ;;  %v3800_v31 = vld [vmem:[#allocation13 + $0x118] sm:$0xff]  ;;  %v3815_v35 = vld [vmem:[#allocation13 + $0x190] sm:$0xff]  ;;  %v3826_v14 = vld [vmem:[#allocation13 + $0x1e8] sm:$0xff] }
 0x4e3   : > { %v5808_v16 = vmul.f32 -1.442695, %v8172_v15  ;;  %v3799_v15 = vld [vmem:[#allocation13 + $0x110] sm:$0xff]  ;;  %v3812_v23 = vld [vmem:[#allocation13 + $0x178] sm:$0xff] }
 0x4e4   : > { %v5809_v38 = vmul.f32 -1.442695, %v8173_v36  ;;  %v9665_v36 = vpack.c.bf16 %v3800_v31, %v3799_v15  ;;  %v3811_v62 = vld [vmem:[#allocation13 + $0x170] sm:$0xff]  ;;  %v3828_v15 = vld [vmem:[#allocation13 + $0x1f8] sm:$0xff] }
 0x4e5   : > { %8431 = vpow2.f32 %v5808_v16  ;;  %v3816_v16 = vld [vmem:[#allocation13 + $0x198] sm:$0xff]  ;;  %v9713_v31 = vpack.c.bf16 %v3812_v23, %v3811_v62 }
 0x4e6   : > { %8433 = vpow2.f32 %v5809_v38  ;;  %v9667_v55 = vpack.c.bf16 %v3816_v16, %v3815_v35  ;;  %v3801_v38 = vld [vmem:[#allocation13 + $0x120] sm:$0xff]  ;;  %v3852_v62 = vld [vmem:[#allocation13 + $0x2b8] sm:$0xff] }
 0x4e7   : > { %v3829_v16 = vld [vmem:[#allocation13 + $0x200] sm:$0xff] }
 0x4eb   : > { %v8430_v42 = vpop.eup %8429 }
 0x4ec   : > { %v3740_v21 = vmul.f32 %v8430_v42, %v3739_v41  ;;  %v3802_v41 = vld [vmem:[#allocation13 + $0x128] sm:$0xff]  ;;  %v3817_v42 = vld [vmem:[#allocation13 + $0x1a0] sm:$0xff] }
 0x4ee   : > { %v3742_v47 = vadd.f32 %v3741_v45, %v3740_v21  ;;  %v9673_v45 = vpack.c.bf16 %v3802_v41, %v3801_v38  ;;  %v9675_v21 = vpack.c.bf16 %v3818_v44, %v3817_v42  ;;  %v3830_v38 = vld [vmem:[#allocation13 + $0x208] sm:$0xff]  ;;  %v3845_v41 = vld [vmem:[#allocation13 + $0x280] sm:$0xff] }
 0x4ef   : > { %v8432_v52 = vpop.eup %8431  ;;  %v3846_v42 = vld [vmem:[#allocation13 + $0x288] sm:$0xff]  ;;  %v9721_v44 = vpack.c.bf16 %v3830_v38, %v3829_v16  ;;  %v3853_v38 = vld [vmem:[#allocation13 + $0x2c0] sm:$0xff] }
 0x4f0   : > { %v3747_v50 = vadd.f32 1.0, %v8432_v52  ;;  %3743 = vst [vmem:[#allocation21 + $0x10] sm:$0xff] %v3742_v47  ;;  %v8434_v24 = vpop.eup %8433  ;;  %v3804_v52 = vld [vmem:[#allocation13 + $0x138] sm:$0xff]  ;;  %v3838_v16 = vld [vmem:[#allocation13 + $0x248] sm:$0xff] }
 0x4f1   : > { %v3753_v53 = vadd.f32 1.0, %v8434_v24  ;;  %v3820_v24 = vld [vmem:[#allocation13 + $0x1b8] sm:$0xff] }
 0x4f2   : > { %8435 = vrcp.f32 %v3747_v50  ;;  %v3819_v50 = vld [vmem:[#allocation13 + $0x1b0] sm:$0xff] }
 0x4f3   : > { %8437 = vrcp.f32 %v3753_v53  ;;  %v9683_v57 = vpack.c.bf16 %v3820_v24, %v3819_v50  ;;  %v3805_v53 = vld [vmem:[#allocation13 + $0x140] sm:$0xff]  ;;  %v3831_v24 = vld [vmem:[#allocation13 + $0x210] sm:$0xff] }
 0x4fc   : > { %v8436_v58 = vpop.eup %8435 }
 0x4fd   : > { %v3756_v2 = vmul.f32 %v8436_v58, %v8175_v56  ;;  %v8438_v8 = vpop.eup %8437  ;;  %v3806_v56 = vld [vmem:[#allocation13 + $0x148] sm:$0xff]  ;;  %v3821_v58 = vld [vmem:[#allocation13 + $0x1c0] sm:$0xff] }
 0x4fe   : > { %v3759_v10 = vsub.f32 1.0, %v8438_v8  ;;  %v3761_v13 = vmul.f32 %v8438_v8, %v9543_v17  ;;  %v3823_v8 = vld [vmem:[#allocation13 + $0x1d0] sm:$0xff] }
 0x4ff   : > { %v3757_v4 = vadd.f32 %v8174_v0, %v3756_v2  ;;  %v3822_v0 = vld [vmem:[#allocation13 + $0x1c8] sm:$0xff]  ;;  %v9689_v2 = vpack.c.bf16 %v3806_v56, %v3805_v53  ;;  %v3832_v53 = vld [vmem:[#allocation13 + $0x218] sm:$0xff] }
 0x500   : > { %v3848_v56 = vld [vmem:[#allocation13 + $0x298] sm:$0xff] }
 0x501   : > { %8439 = vtanh.f32 %v3757_v4  ;;  %v9691_v4 = vpack.c.bf16 %v3822_v0, %v3821_v58  ;;  %v3833_v0 = vld [vmem:[#allocation13 + $0x220] sm:$0xff] }
 0x50b   : > { %v8440_v34 = vpop.eup %8439 }
 0x50c   : > { %v3760_v22 = vmul.f32 %v8440_v34, %v3759_v10  ;;  %v3824_v10 = vld [vmem:[#allocation13 + $0x1d8] sm:$0xff] }
 0x50d   : > { %v9699_v34 = vpack.c.bf16 %v3824_v10, %v3823_v8  ;;  %v3850_v8 = vld [vmem:[#allocation13 + $0x2a8] sm:$0xff]  ;;  %v9745_v10 = vpack.c.bf16 %v3834_v5, %v3833_v0  ;;  %v3841_v5 = vld [vmem:[#allocation13 + $0x260] sm:$0xff] }
 0x50e   : > { %v3762_v1 = vadd.f32 %v3761_v13, %v3760_v22  ;;  %v3809_v13 = vld [vmem:[#allocation13 + $0x160] sm:$0xff]  ;;  %v3810_v22 = vld [vmem:[#allocation13 + $0x168] sm:$0xff] }
 0x50f   : > { %v9705_v32 = vpack.c.bf16 %v3810_v22, %v3809_v13  ;;  %v9747_v13 = vpack.c.bf16 %v3850_v8, %v3849_v7  ;;  %v3835_v22 = vld [vmem:[#allocation13 + $0x230] sm:$0xff]  ;;  %v3842_v7 = vld [vmem:[#allocation13 + $0x268] sm:$0xff]  ;;  %v3857_v8 = vld [vmem:[#allocation13 + $0x2e0] sm:$0xff] }
 0x510   : > { %v9641_v49 = vadd.f32 %v3762_v1, %v3742_v47  ;;  %3763 = vst [vmem:[#allocation21 + $0x18] sm:$0xff] %v3762_v1  ;;  %v3803_v47 = vld [vmem:[#allocation13 + $0x130] sm:$0xff]  ;;  %v3825_v1 = vld [vmem:[#allocation13 + $0x1e0] sm:$0xff] }
 0x511   : > { %v9681_v51 = vpack.c.bf16 %v3804_v52, %v3803_v47  ;;  %v9725_v52 = vpack.c.bf16 %v3846_v42, %v3845_v41  ;;  %v3854_v41 = vld [vmem:[#allocation13 + $0x2c8] sm:$0xff] }
 0x512   : > { %10341 = vst [vmem:[#allocation35_spill] sm:$0xff] %v9641_v49  ;;  %v3901_v19 = vrot.slane %v9641_v49, %v9639_v27 }
 0x514   : > { %v9648_v28 = vrot.slane %v3901_v19, %v9639_v27  ;;  %v3909_v17 = vcombine.high %v3901_v19, %v3901_v19  ;;  %v9707_v19 = vpack.c.bf16 %v3826_v14, %v3825_v1  ;;  %v3836_v1 = vld [vmem:[#allocation13 + $0x238] sm:$0xff]  ;;  %v3851_v14 = vld [vmem:[#allocation13 + $0x2b0] sm:$0xff] }
 0x515   : > { %v9753_v23 = vpack.c.bf16 %v3836_v1, %v3835_v22  ;;  %v3858_v22 = vld [vmem:[#allocation13 + $0x2e8] sm:$0xff]  ;;  %v9777_v1 = vpack.c.bf16 %v3842_v7, %v3841_v5 }
 0x516   : > { %6176 = vmatmul.mubr.f32.vlgmr.msra.gmra.mrb[8].mxu0 %v9648_v28  ;;  %v9654_v61 = vrot.slane %v3909_v17, %v9639_v27  ;;  %v3827_v17 = vld [vmem:[#allocation13 + $0x1f0] sm:$0xff]  ;;  %v3939_v47 = vcombine.high %v9648_v28, %v9648_v28  ;;  %v3862_v5 = vld [vmem:[#allocation13 + $0x308] sm:$0xff] }
 0x517   : > { %7754 = vmatpush3.bf16.xpose.msra.mxu0 %v9645_v26  ;;  %6245 = vmatprep.mubr.msk.f32.mxu0 %vm8966_vm0, %v10278_v11  ;;  %v9715_v35 = vpack.c.bf16 %v3828_v15, %v3827_v17  ;;  %v3847_v28 = vld [vmem:[#allocation13 + $0x290] sm:$0xff]  ;;  %v9755_v17 = vpack.c.bf16 %v3852_v62, %v3851_v14  ;;  %v3837_v15 = vld [vmem:[#allocation13 + $0x240] sm:$0xff]  ;;  %v9779_v14 = vpack.c.bf16 %v3858_v22, %v3857_v8  ;;  %v3878_v22 = vld [vmem:[#allocation13 + $0x388] sm:$0xff] }
 0x518   : > { %6211 = vmatmul.mubr.f32.vlgmr.msra.gmra.mrb[8].mxu1 %v9654_v61  ;;  %7755 = vmatprep.subr.bf16.mxu0 %v8965_v39  ;;  %v3941_v50 = vcombine.high %v9654_v61, %v9654_v61  ;;  %v9737_v61 = vpack.c.bf16 %v3832_v53, %v3831_v24  ;;  %v9739_v58 = vpack.c.bf16 %v3848_v56, %v3847_v28  ;;  %v3840_v24 = vld [vmem:[#allocation13 + $0x258] sm:$0xff]  ;;  %v3855_v53 = vld [vmem:[#allocation13 + $0x2d0] sm:$0xff]  ;;  %v3877_v8 = vld [vmem:[#allocation13 + $0x380] sm:$0xff] }
 0x519   : > { %7778 = vmatpush3.bf16.xpose.msra.mxu1 %v9650_v30  ;;  %6280 = vmatprep.mubr.msk.f32.mxu1 %vm8966_vm0, %v10278_v11  ;;  %v9761_v42 = vpack.c.bf16 %v3838_v16, %v3837_v15  ;;  %v3856_v28 = vld [vmem:[#allocation13 + $0x2d8] sm:$0xff]  ;;  %v3843_v62 = vld [vmem:[#allocation13 + $0x270] sm:$0xff] }
 0x51a   : > { %7779 = vmatprep.subr.bf16.mxu1 %v8965_v39  ;;  %v9771_v0 = vpack.c.bf16 %v3856_v28, %v3855_v53  ;;  %v3844_v15 = vld [vmem:[#allocation13 + $0x278] sm:$0xff]  ;;  %v3859_v16 = vld [vmem:[#allocation13 + $0x2f0] sm:$0xff]  ;;  %v3861_v28 = vld [vmem:[#allocation13 + $0x300] sm:$0xff] }
 0x51b   : > { %v9796_v60 = vpack.c.bf16 %v3862_v5, %v3861_v28 }
 0x51f   : > { %7757 = vmatpush3.bf16.xpose.msra.mxu0 %v9665_v36 }
 0x520   : > { %7758 = vmatprep.subr.bf16.mxu0 %v8965_v39 }
 0x521   : > { %7781 = vmatpush3.bf16.xpose.msra.mxu1 %v9667_v55 }
 0x522   : > { %7782 = vmatprep.subr.bf16.mxu1 %v8965_v39 }
 0x527   : > { %7760 = vmatpush3.bf16.xpose.msra.mxu0 %v9673_v45 }
 0x528   : > { %7761 = vmatprep.subr.bf16.mxu0 %v8965_v39 }
 0x529   : > { %7784 = vmatpush3.bf16.xpose.msra.mxu1 %v9675_v21 }
 0x52a   : > { %7785 = vmatprep.subr.bf16.mxu1 %v8965_v39 }
 0x52f   : > { %7763 = vmatpush3.bf16.xpose.msra.mxu0 %v9681_v51 }
 0x530   : > { %7764 = vmatprep.subr.bf16.mxu0 %v8965_v39 }
 0x531   : > { %7787 = vmatpush3.bf16.xpose.msra.mxu1 %v9683_v57 }
 0x532   : > { %7788 = vmatprep.subr.bf16.mxu1 %v8965_v39 }
 0x537   : > { %7766 = vmatpush3.bf16.xpose.msra.mxu0 %v9689_v2 }
 0x538   : > { %7767 = vmatprep.subr.bf16.mxu0 %v8965_v39 }
 0x539   : > { %7790 = vmatpush3.bf16.xpose.msra.mxu1 %v9691_v4 }
 0x53a   : > { %7791 = vmatprep.subr.bf16.mxu1 %v8965_v39 }
 0x53f   : > { %7769 = vmatpush3.bf16.xpose.msra.mxu0 %v9697_v63 }
 0x540   : > { %7770 = vmatprep.subr.bf16.mxu0 %v8965_v39 }
 0x541   : > { %7793 = vmatpush3.bf16.xpose.msra.mxu1 %v9699_v34 }
 0x542   : > { %7794 = vmatprep.subr.bf16.mxu1 %v8965_v39 }
 0x547   : > { %7772 = vmatpush3.bf16.xpose.msra.mxu0 %v9705_v32 }
 0x548   : > { %7773 = vmatprep.subr.bf16.mxu0 %v8965_v39 }
 0x549   : > { %7796 = vmatpush3.bf16.xpose.msra.mxu1 %v9707_v19 }
 0x54a   : > { %7797 = vmatprep.subr.bf16.mxu1 %v8965_v39 }
 0x54f   : > { %7775 = vmatpush3.bf16.xpose.msra.mxu0 %v9713_v31 }
 0x550   : > { %7800 = vmatprep.subr.bf16.mxu0 %v8965_v39 }
 0x551   : > { %7799 = vmatpush3.bf16.xpose.msra.mxu1 %v9715_v35 }
 0x552   : > { %7824 = vmatprep.subr.bf16.mxu1 %v8965_v39 }
 0x556   : > { %6246 = vmatmul.mubr.f32.vlgmr.msra.gmra.mrb[10].mxu0 %v3939_v47  ;;  %v9763_v47 = vpack.c.bf16 %v3854_v41, %v3853_v38  ;;  %v3860_v38 = vld [vmem:[#allocation13 + $0x2f8] sm:$0xff]  ;;  %v3894_v41 = vcombine.high %v9641_v49, %v9641_v49 }
 0x557   : > { %7802 = vmatpush3.bf16.xpose.msra.mxu0 %v9721_v44  ;;  %6315 = vmatprep.mubr.msk.f32.mxu0 %vm8966_vm0, %v10278_v11 }
 0x558   : > { %6281 = vmatmul.mubr.f32.vlgmr.msra.gmra.mrb[10].mxu1 %v3941_v50  ;;  %7803 = vmatprep.subr.bf16.mxu0 %v8965_v39  ;;  %v3839_v50 = vld [vmem:[#allocation13 + $0x250] sm:$0xff]  ;;  %v3908_v53 = vrot.slane %v3894_v41, %v9639_v27  ;;  %v3864_v41 = vld [vmem:[#allocation13 + $0x318] sm:$0xff] }
 0x559   : > { %7826 = vmatpush3.bf16.xpose.msra.mxu1 %v9725_v52  ;;  %6350 = vmatprep.mubr.msk.f32.mxu1 %vm8966_vm0, %v10278_v11  ;;  %v9769_v56 = vpack.c.bf16 %v3840_v24, %v3839_v50  ;;  %v9787_v50 = vpack.c.bf16 %v3844_v15, %v3843_v62  ;;  %v9789_v24 = vpack.c.bf16 %v3860_v38, %v3859_v16  ;;  %v3863_v38 = vld [vmem:[#allocation13 + $0x310] sm:$0xff] }
 0x55a   : > { %7827 = vmatprep.subr.bf16.mxu1 %v8965_v39  ;;  %v3910_v7 = vcombine.high %v3908_v53, %v3908_v53  ;;  %v9799_v62 = vrot.slane %v3908_v53, %v9639_v27  ;;  %v9801_v15 = vpack.c.bf16 %v3878_v22, %v3877_v8  ;;  %v3880_v53 = vld [vmem:[#allocation13 + $0x398] sm:$0xff]  ;;  %v9816_v28 = vpack.c.bf16 %v3864_v41, %v3863_v38  ;;  %v3866_v8 = vld [vmem:[#allocation13 + $0x328] sm:$0xff]  ;;  %v3881_v22 = vld [vmem:[#allocation13 + $0x3a0] sm:$0xff] }
 0x55b   : > { %v3867_v38 = vld [vmem:[#allocation13 + $0x330] sm:$0xff]  ;;  %v3868_v41 = vld [vmem:[#allocation13 + $0x338] sm:$0xff] }
 0x55c   : > { %10342 = vst [vmem:[#allocation36_spill] sm:$0xff] %v9801_v15  ;;  %v9805_v16 = vrot.slane %v3910_v7, %v9639_v27  ;;  %v3879_v27 = vld [vmem:[#allocation13 + $0x390] sm:$0xff]  ;;  %10343 = vst [vmem:[#allocation37_spill] sm:$0xff] %v9816_v28  ;;  %v3865_v7 = vld [vmem:[#allocation13 + $0x320] sm:$0xff] }
 0x55d   : > { %v9818_v5 = vpack.c.bf16 %v3880_v53, %v3879_v27  ;;  %v9824_v49 = vpack.c.bf16 %v3866_v8, %v3865_v7  ;;  %v3883_v27 = vld [vmem:[#allocation13 + $0x3b0] sm:$0xff]  ;;  %v3884_v53 = vld [vmem:[#allocation13 + $0x3b8] sm:$0xff]  ;;  %v3870_v7 = vld [vmem:[#allocation13 + $0x348] sm:$0xff] }
 0x55e   : > { %v3885_v8 = vld [vmem:[#allocation13 + $0x3c0] sm:$0xff] }
 0x55f   : > { %7805 = vmatpush3.bf16.xpose.msra.mxu0 %v9737_v61  ;;  %10344 = vst [vmem:[#allocation38_spill] sm:$0xff] %v9818_v5  ;;  %10345 = vst [vmem:[#allocation39_spill] sm:$0xff] %v9824_v49 }
 0x560   : > { %7806 = vmatprep.subr.bf16.mxu0 %v8965_v39 }
 0x561   : > { %7829 = vmatpush3.bf16.xpose.msra.mxu1 %v9739_v58 }
 0x562   : > { %7830 = vmatprep.subr.bf16.mxu1 %v8965_v39 }
 0x567   : > { %7808 = vmatpush3.bf16.xpose.msra.mxu0 %v9745_v10 }
 0x568   : > { %7809 = vmatprep.subr.bf16.mxu0 %v8965_v39 }
 0x569   : > { %7832 = vmatpush3.bf16.xpose.msra.mxu1 %v9747_v13 }
 0x56a   : > { %7833 = vmatprep.subr.bf16.mxu1 %v8965_v39 }
 0x56f   : > { %7811 = vmatpush3.bf16.xpose.msra.mxu0 %v9753_v23 }
 0x570   : > { %7812 = vmatprep.subr.bf16.mxu0 %v8965_v39 }
 0x571   : > { %7835 = vmatpush3.bf16.xpose.msra.mxu1 %v9755_v17 }
 0x572   : > { %7836 = vmatprep.subr.bf16.mxu1 %v8965_v39 }
 0x577   : > { %7814 = vmatpush3.bf16.xpose.msra.mxu0 %v9761_v42 }
 0x578   : > { %7815 = vmatprep.subr.bf16.mxu0 %v8965_v39 }
 0x579   : > { %7838 = vmatpush3.bf16.xpose.msra.mxu1 %v9763_v47 }
 0x57a   : > { %7839 = vmatprep.subr.bf16.mxu1 %v8965_v39 }
 0x57f   : > { %7817 = vmatpush3.bf16.xpose.msra.mxu0 %v9769_v56 }
 0x580   : > { %7818 = vmatprep.subr.bf16.mxu0 %v8965_v39 }
 0x581   : > { %7841 = vmatpush3.bf16.xpose.msra.mxu1 %v9771_v0 }
 0x582   : > { %7842 = vmatprep.subr.bf16.mxu1 %v8965_v39 }
 0x587   : > { %7820 = vmatpush3.bf16.xpose.msra.mxu0 %v9777_v1 }
 0x588   : > { %7821 = vmatprep.subr.bf16.mxu0 %v8965_v39 }
 0x589   : > { %7844 = vmatpush3.bf16.xpose.msra.mxu1 %v9779_v14 }
 0x58a   : > { %7845 = vmatprep.subr.bf16.mxu1 %v8965_v39 }
 0x58f   : > { %7823 = vmatpush3.bf16.xpose.msra.mxu0 %v9787_v50 }
 0x590   : > { %7848 = vmatprep.subr.bf16.mxu0 %v8965_v39 }
 0x591   : > { %7847 = vmatpush3.bf16.xpose.msra.mxu1 %v9789_v24 }
 0x592   : > { %7872 = vmatprep.subr.bf16.mxu1 %v8965_v39 }
 0x596   : > { %6316 = vmatmul.mubr.f32.vlgmr.msra.gmra.mrb[12].mxu0 %v9799_v62 }
 0x597   : > { %7850 = vmatpush3.bf16.xpose.msra.mxu0 %v9796_v60  ;;  %6385 = vmatprep.mubr.msk.f32.mxu0 %vm8966_vm0, %v10278_v11 }
 0x598   : > { %6351 = vmatmul.mubr.f32.vlgmr.msra.gmra.mrb[12].mxu1 %v9805_v16  ;;  %7851 = vmatprep.subr.bf16.mxu0 %v8965_v39 }
 0x599   : > { %7874 = vmatpush3.bf16.xpose.msra.mxu1 %v9801_v15  ;;  %6420 = vmatprep.mubr.msk.f32.mxu1 %vm8966_vm0, %v10278_v11  ;;  %v3882_v11 = vld [vmem:[#allocation13 + $0x3a8] sm:$0xff] }
 0x59a   : > { %7875 = vmatprep.subr.bf16.mxu1 %v8965_v39  ;;  %v9826_v15 = vpack.c.bf16 %v3882_v11, %v3881_v22  ;;  %v3869_v11 = vld [vmem:[#allocation13 + $0x340] sm:$0xff]  ;;  %v3886_v22 = vld [vmem:[#allocation13 + $0x3c8] sm:$0xff] }
 0x59c   : > { %10346 = vst [vmem:[#allocation40_spill] sm:$0xff] %v9826_v15 }
 0x59f   : > { %7853 = vmatpush3.bf16.xpose.msra.mxu0 %v9816_v28  ;;  %v9834_v28 = vpack.c.bf16 %v3884_v53, %v3883_v27  ;;  %v3887_v27 = vld [vmem:[#allocation13 + $0x3d0] sm:$0xff]  ;;  %v3888_v53 = vld [vmem:[#allocation13 + $0x3d8] sm:$0xff] }
 0x5a0   : > { %7854 = vmatprep.subr.bf16.mxu0 %v8965_v39 }
 0x5a1   : > { %7877 = vmatpush3.bf16.xpose.msra.mxu1 %v9818_v5  ;;  %v9832_v5 = vpack.c.bf16 %v3868_v41, %v3867_v38  ;;  %10348 = vst [vmem:[#allocation42_spill] sm:$0xff] %v9834_v28  ;;  %v3871_v38 = vld [vmem:[#allocation13 + $0x350] sm:$0xff]  ;;  %v3872_v41 = vld [vmem:[#allocation13 + $0x358] sm:$0xff] }
 0x5a2   : > { %7878 = vmatprep.subr.bf16.mxu1 %v8965_v39 }
 0x5a3   : > { %10347 = vst [vmem:[#allocation41_spill] sm:$0xff] %v9832_v5 }
 0x5a7   : > { %7856 = vmatpush3.bf16.xpose.msra.mxu0 %v9824_v49  ;;  %v9842_v49 = vpack.c.bf16 %v3886_v22, %v3885_v8  ;;  %v3889_v8 = vld [vmem:[#allocation13 + $0x3e0] sm:$0xff]  ;;  %v3890_v22 = vld [vmem:[#allocation13 + $0x3e8] sm:$0xff] }
 0x5a8   : > { %7857 = vmatprep.subr.bf16.mxu0 %v8965_v39 }
 0x5a9   : > { %7880 = vmatpush3.bf16.xpose.msra.mxu1 %v9826_v15  ;;  %v9840_v15 = vpack.c.bf16 %v3870_v7, %v3869_v11  ;;  %10350 = vst [vmem:[#allocation44_spill] sm:$0xff] %v9842_v49  ;;  %v3873_v11 = vld [vmem:[#allocation13 + $0x360] sm:$0xff]  ;;  %v3874_v7 = vld [vmem:[#allocation13 + $0x368] sm:$0xff] }
 0x5aa   : > { %7881 = vmatprep.subr.bf16.mxu1 %v8965_v39 }
 0x5ab   : > { %10349 = vst [vmem:[#allocation43_spill] sm:$0xff] %v9840_v15 }
 0x5af   : > { %7859 = vmatpush3.bf16.xpose.msra.mxu0 %v9832_v5  ;;  %v9850_v5 = vpack.c.bf16 %v3888_v53, %v3887_v27  ;;  %v3891_v27 = vld [vmem:[#allocation13 + $0x3f0] sm:$0xff]  ;;  %v3892_v53 = vld [vmem:[#allocation13 + $0x3f8] sm:$0xff] }
 0x5b0   : > { %7860 = vmatprep.subr.bf16.mxu0 %v8965_v39 }
 0x5b1   : > { %7883 = vmatpush3.bf16.xpose.msra.mxu1 %v9834_v28  ;;  %v9848_v28 = vpack.c.bf16 %v3872_v41, %v3871_v38  ;;  %10352 = vst [vmem:[#allocation46_spill] sm:$0xff] %v9850_v5  ;;  %v3875_v38 = vld [vmem:[#allocation13 + $0x370] sm:$0xff]  ;;  %v3876_v41 = vld [vmem:[#allocation13 + $0x378] sm:$0xff] }
 0x5b2   : > { %7884 = vmatprep.subr.bf16.mxu1 %v8965_v39 }
 0x5b3   : > { %10351 = vst [vmem:[#allocation45_spill] sm:$0xff] %v9848_v28 }
 0x5b7   : > { %7862 = vmatpush3.bf16.xpose.msra.mxu0 %v9840_v15  ;;  %v9858_v15 = vpack.c.bf16 %v3890_v22, %v3889_v8  ;;  %v10353_v8 = vmov 0.0  }
 0x5b8   : > { %7863 = vmatprep.subr.bf16.mxu0 %v8965_v39 }
 0x5b9   : > { %7886 = vmatpush3.bf16.xpose.msra.mxu1 %v9842_v49  ;;  %v9856_v49 = vpack.c.bf16 %v3874_v7, %v3873_v11  ;;  %v3940_v11 = vcombine.high %v9799_v62, %v9799_v62  ;;  %v3942_v7 = vcombine.high %v9805_v16, %v9805_v16 }
 0x5ba   : > { %7887 = vmatprep.subr.bf16.mxu1 %v8965_v39 }
 0x5bf   : > { %7865 = vmatpush3.bf16.xpose.msra.mxu0 %v9848_v28  ;;  %v9866_v28 = vpack.c.bf16 %v3892_v53, %v3891_v27 }
 0x5c0   : > { %7866 = vmatprep.subr.bf16.mxu0 %v8965_v39 }
 0x5c1   : > { %7889 = vmatpush3.bf16.xpose.msra.mxu1 %v9850_v5  ;;  %v9864_v5 = vpack.c.bf16 %v3876_v41, %v3875_v38 }
 0x5c2   : > { %7890 = vmatprep.subr.bf16.mxu1 %v8965_v39 }
 0x5c7   : > { %7868 = vmatpush3.bf16.xpose.msra.mxu0 %v9856_v49 }
 0x5c8   : > { %7869 = vmatprep.subr.bf16.mxu0 %v8965_v39 }
 0x5c9   : > { %7892 = vmatpush3.bf16.xpose.msra.mxu1 %v9858_v15 }
 0x5ca   : > { %7893 = vmatprep.subr.bf16.mxu1 %v8965_v39 }
 0x5cf   : > { %7871 = vmatpush3.bf16.xpose.msra.mxu0 %v9864_v5 }
 0x5d0   : > { %7896 = vmatprep.subr.bf16.mxu0 %v8965_v39 }
 0x5d1   : > { %7895 = vmatpush3.bf16.xpose.msra.mxu1 %v9866_v28 }
 0x5d2   : > { %7920 = vmatprep.subr.bf16.mxu1 %v8965_v39 }
 0x5d6   : > { %6386 = vmatmul.mubr.f32.vlgmr.msra.gmra.mrb[14].mxu0 %v3940_v11 }
 0x5d7   : > { %7898 = vmatpush3.bf16.msra.mxu0 %v9551_v54  ;;  %6455 = vmatprep.mubr.msk.f32.mxu0 %vm8966_vm0, %v10353_v8  ;;  %v10354_v54 = vlaneseq }
 0x5d8   : > { %6421 = vmatmul.mubr.f32.vlgmr.msra.gmra.mrb[14].mxu1 %v3942_v7  ;;  %7899 = vmatprep.subr.bf16.mxu0 %v8965_v39 }
 0x5d9   : > { %7922 = vmatpush3.bf16.msra.mxu1 %v9556_v59  ;;  %6490 = vmatprep.mubr.msk.f32.mxu1 %vm8966_vm0, %v10353_v8  ;;  %v9893_v59 = vand.u32 127, %v10354_v54 }
 0x5da   : > { %7923 = vmatprep.subr.bf16.mxu1 %v8965_v39 }
 0x5db   : > { %7901 = vmatpush3.bf16.msra.mxu0 %v9561_v3  ;;  %vm4513_vm1 = vcmp.lt.s32.totalorder %v9893_v59, 8 }
 0x5dc   : > { %7902 = vmatprep.subr.bf16.mxu0 %v8965_v39 }
 0x5dd   : > { %7925 = vmatpush3.bf16.msra.mxu1 %v9564_v6 }
 0x5de   : > { %7926 = vmatprep.subr.bf16.mxu1 %v8965_v39 }
 0x5df   : > { %7904 = vmatpush3.bf16.msra.mxu0 %v9569_v9 }
 0x5e0   : > { %7905 = vmatprep.subr.bf16.mxu0 %v8965_v39 }
 0x5e1   : > { %7928 = vmatpush3.bf16.msra.mxu1 %v9572_v12 }
 0x5e2   : > { %7929 = vmatprep.subr.bf16.mxu1 %v8965_v39 }
 0x5e3   : > { %7907 = vmatpush3.bf16.msra.mxu0 %v9577_v18 }
 0x5e4   : > { %7908 = vmatprep.subr.bf16.mxu0 %v8965_v39 }
 0x5e5   : > { %7931 = vmatpush3.bf16.msra.mxu1 %v9580_v20 }
 0x5e6   : > { %7932 = vmatprep.subr.bf16.mxu1 %v8965_v39 }
 0x5e7   : > { %7910 = vmatpush3.bf16.msra.mxu0 %v9585_v25 }
 0x5e8   : > { %7911 = vmatprep.subr.bf16.mxu0 %v8965_v39 }
 0x5e9   : > { %v4017_v3 = vpop.f32.mrb[8].mxu0  ;;  %7934 = vmatpush3.bf16.msra.mxu1 %v9588_v29 }
 0x5ea   : > { %v4514_v6 = vsel %vm4513_vm1, %v4017_v3, -1e+30  ;;  %v6177_v9 = vpop.f32.mrb[9].mxu0  ;;  %7935 = vmatprep.subr.bf16.mxu1 %v8965_v39 }
 0x5eb   : > { %v4087_v12 = vpop.f32.mrb[8].mxu1  ;;  %v4523_v18 = vsel %vm4522_vm2, %v4514_v6, -inf  ;;  %7913 = vmatpush3.bf16.msra.mxu0 %v9593_v33 }
 0x5ec   : > { %v4515_v20 = vsel %vm4513_vm1, %v4087_v12, -1e+30  ;;  %4524 = vmax.xlane.f32.xlu0 %v4523_v18  ;;  %v6212_v25 = vpop.f32.mrb[9].mxu1  ;;  %7914 = vmatprep.subr.bf16.mxu0 %v8965_v39 }
 0x5ed   : > { %7937 = vmatpush3.bf16.msra.mxu1 %v9596_v37  ;;  %v4526_v29 = vsel %vm4522_vm2, %v4515_v20, -inf }
 0x5ee   : > { %7938 = vmatprep.subr.bf16.mxu1 %v8965_v39 }
 0x5ef   : > { %7916 = vmatpush3.bf16.msra.mxu0 %v9601_v40 }
 0x5f0   : > { %4527 = vmax.xlane.f32.xlu0 %v4526_v29  ;;  %7917 = vmatprep.subr.bf16.mxu0 %v8965_v39 }
 0x5f1   : > { %7940 = vmatpush3.bf16.msra.mxu1 %v9604_v43 }
 0x5f2   : > { %7941 = vmatprep.subr.bf16.mxu1 %v8965_v39 }
 0x5f3   : > { %7919 = vmatpush3.bf16.msra.mxu0 %v9609_v46 }
 0x5f4   : > { %7944 = vmatprep.subr.bf16.mxu0 %v8965_v39 }
 0x5f5   : > { %7943 = vmatpush3.bf16.msra.mxu1 %v9611_v48 }
 0x5f6   : > { %7968 = vmatprep.subr.bf16.mxu1 %v8965_v39 }
 0x629   : > { %v4157_v33 = vpop.f32.mrb[10].mxu0 }
 0x62a   : > { %v4516_v37 = vsel %vm4513_vm1, %v4157_v33, -1e+30  ;;  %v6247_v40 = vpop.f32.mrb[11].mxu0 }
 0x62b   : > { %v4227_v62 = vpop.f32.mrb[10].mxu1  ;;  %v4529_v16 = vsel %vm4522_vm2, %v4516_v37, -inf }
 0x62c   : > { %v4517_v43 = vsel %vm4513_vm1, %v4227_v62, -1e+30  ;;  %4530 = vmax.xlane.f32.xlu1 %v4529_v16  ;;  %v6282_v22 = vpop.f32.mrb[11].mxu1 }
 0x62d   : > { %v4532_v46 = vsel %vm4522_vm2, %v4517_v43, -inf }
 0x630   : > { %4533 = vmax.xlane.f32.xlu1 %v4532_v46 }
 0x669   : > { %v4297_v38 = vpop.f32.mrb[12].mxu0 }
 0x66a   : > { %v4518_v48 = vsel %vm4513_vm1, %v4297_v38, -1e+30  ;;  %v6317_v41 = vpop.f32.mrb[13].mxu0 }
 0x66b   : > { %v4367_v27 = vpop.f32.mrb[12].mxu1  ;;  %v4535_v53 = vsel %vm4522_vm2, %v4518_v48, -inf }
 0x66c   : > { %v4519_v11 = vsel %vm4513_vm1, %v4367_v27, -1e+30  ;;  %4536 = vmax.xlane.f32.xlu0 %v4535_v53  ;;  %v6352_v7 = vpop.f32.mrb[13].mxu1 }
 0x66d   : > { %v4538_v54 = vsel %vm4522_vm2, %v4519_v11, -inf }
 0x66e   : > { %4539 = vmax.xlane.f32.xlu1 %v4538_v54 }
 0x679   : > { %v4525_v3 = vpop.xlane.xlu0 %4524 }
 0x67a   : > { %v4547_v9 = vsub.f32 %v4514_v6, %v4525_v3 }
 0x67c   : > { %v4555_v12 = vmul.f32 1.442695, %v4547_v9 }
 0x67d   : > { %v4528_v18 = vpop.xlane.xlu0 %4527 }
 0x67e   : > { %8441 = vpow2.f32 %v4555_v12  ;;  %v4548_v25 = vsub.f32 %v4515_v20, %v4528_v18 }
 0x680   : > { %v4557_v29 = vmul.f32 1.442695, %v4548_v25 }
 0x682   : > { %8443 = vpow2.f32 %v4557_v29 }
 0x688   : > { %v8442_v33 = vpop.eup %8441 }
 0x689   : > { %v4571_v40 = vsel %vm4522_vm2, %v8442_v33, 0.0 }
 0x68a   : > { %4572 = vadd.xlane.f32.xlu0 %v4571_v40 }
 0x68c   : > { %v8444_v62 = vpop.eup %8443 }
 0x68d   : > { %v4574_v16 = vsel %vm4522_vm2, %v8444_v62, 0.0 }
 0x68e   : > { %4575 = vadd.xlane.f32.xlu1 %v4574_v16 }
 0x6a9   : > { %v4437_v22 = vpop.f32.mrb[14].mxu0 }
 0x6aa   : > { %v9938_v46 = vsel %vm4513_vm1, %v4437_v22, -1e+30  ;;  %v6387_v6 = vpop.f32.mrb[15].mxu0 }
 0x6ab   : > { %v4507_v38 = vpop.f32.mrb[14].mxu1  ;;  %v4541_v20 = vsel %vm4522_vm2, %v9938_v46, -inf }
 0x6ac   : > { %v9944_v41 = vsel %vm4513_vm1, %v4507_v38, -1e+30  ;;  %4542 = vmax.xlane.f32.xlu0 %v4541_v20  ;;  %v6422_v27 = vpop.f32.mrb[15].mxu1 }
 0x6ad   : > { %v4544_v53 = vsel %vm4522_vm2, %v9944_v41, -inf }
 0x6ae   : > { %4545 = vmax.xlane.f32.xlu1 %v4544_v53 }
 0x6b9   : > { %v4531_v7 = vpop.xlane.xlu1 %4530 }
 0x6ba   : > { %v4549_v54 = vsub.f32 %v4516_v37, %v4531_v7 }
 0x6bc   : > { %v4559_v3 = vmul.f32 1.442695, %v4549_v54 }
 0x6bd   : > { %v4534_v9 = vpop.xlane.xlu1 %4533 }
 0x6be   : > { %8445 = vpow2.f32 %v4559_v3  ;;  %v4550_v12 = vsub.f32 %v4517_v43, %v4534_v9 }
 0x6c0   : > { %v4561_v18 = vmul.f32 1.442695, %v4550_v12 }
 0x6c2   : > { %8447 = vpow2.f32 %v4561_v18 }
 0x6c8   : > { %v9948_v25 = vpop.eup %8445 }
 0x6c9   : > { %v4577_v59 = vsel %vm4522_vm2, %v9948_v25, 0.0 }
 0x6ca   : > { %4578 = vadd.xlane.f32.xlu0 %v4577_v59  ;;  %v10364_v59 = vld [vmem:[#allocation45_spill] sm:$0xff] }
 0x6cc   : > { %v9952_v29 = vpop.eup %8447 }
 0x6cd   : > { %v4580_v40 = vsel %vm4522_vm2, %v9952_v29, 0.0 }
 0x6ce   : > { %4581 = vadd.xlane.f32.xlu1 %v4580_v40 }
 0x6f9   : > { %v4537_v16 = vpop.xlane.xlu0 %4536 }
 0x6fa   : > { %v4551_v37 = vsub.f32 %v4518_v48, %v4537_v16 }
 0x6fb   : > { %v4540_v22 = vpop.xlane.xlu1 %4539 }
 0x6fc   : > { %v4563_v6 = vmul.f32 1.442695, %v4551_v37  ;;  %v4552_v38 = vsub.f32 %v4519_v11, %v4540_v22  ;;  %v5218_v37 = vld [vmem:[#allocation14 + $0x80] sm:$0xff] }
 0x6fe   : > { %8449 = vpow2.f32 %v4563_v6  ;;  %v4565_v43 = vmul.f32 1.442695, %v4552_v38 }
 0x700   : > { %8451 = vpow2.f32 %v4565_v43  ;;  %v5220_v43 = vld [vmem:[#allocation14 + $0x90] sm:$0xff] }
 0x708   : > { %v9956_v20 = vpop.eup %8449 }
 0x709   : > { %v4583_v27 = vsel %vm4522_vm2, %v9956_v20, 0.0 }
 0x70a   : > { %v9960_v53 = vpop.eup %8451  ;;  %4584 = vadd.xlane.f32.xlu0 %v4583_v27 }
 0x70b   : > { %v4586_v7 = vsel %vm4522_vm2, %v9960_v53, 0.0 }
 0x70c   : > { %4587 = vadd.xlane.f32.xlu1 %v4586_v7 }
 0x717   : > { %v4573_v54 = vpop.xlane.xlu0 %4572 }
 0x718   : > { %8453 = vrcp.f32 %v4573_v54 }
 0x71b   : > { %v4576_v48 = vpop.xlane.xlu1 %4575 }
 0x71c   : > { %8455 = vrcp.f32 %v4576_v48  ;;  %v5222_v48 = vld [vmem:[#allocation14 + $0xa0] sm:$0xff] }
 0x722   : > { %v8454_v11 = vpop.eup %8453 }
 0x723   : > { %v4603_v3 = vmul.f32 %v8454_v11, %v8442_v33  ;;  %v5223_v11 = vld [vmem:[#allocation14 + $0xa8] sm:$0xff] }
 0x725   : > { %6456 = vmatmul.mubr.f32.vlgmr.msra.gmra.mrb[16].mxu0 %v4603_v3 }
 0x726   : > { %v8456_v9 = vpop.eup %8455  ;;  %7946 = vmatpush3.bf16.msra.mxu0 %v9645_v26  ;;  %6525 = vmatprep.mubr.msk.f32.mxu0 %vm8966_vm0, %v10353_v8 }
 0x727   : > { %v4604_v12 = vmul.f32 %v8456_v9, %v8444_v62  ;;  %7947 = vmatprep.subr.bf16.mxu0 %v8965_v39 }
 0x729   : > { %v4619_v18 = vrot.slane %v4604_v12, 7  ;;  %6491 = vmatmul.mubr.f32.vlgmr.msra.gmra.mrb[16].mxu1 %v4604_v12  ;;  %v8095_v12 = vpack.c.bf16 %v5223_v11, %v5222_v48  ;;  %v5409_v48 = vld [vmem:[#allocation17 + $0x18] sm:$0xff] }
 0x72a   : > { %7949 = vmatpush3.bf16.msra.mxu0 %v9665_v36  ;;  %7970 = vmatpush3.bf16.msra.mxu1 %v9650_v30 }
 0x72b   : > { %7950 = vmatprep.subr.bf16.mxu0 %v8965_v39  ;;  %7971 = vmatprep.subr.bf16.mxu1 %v8965_v39  ;;  %v4621_v33 = vsel %vm4620_vm3, %v4619_v18, %v4603_v3  ;;  %v5224_v18 = vld [vmem:[#allocation14 + $0xb0] sm:$0xff] }
 0x72c   : > { %6560 = vmatprep.mubr.msk.f32.mxu1 %vm8966_vm0, %v10353_v8 }
 0x72e   : > { %7952 = vmatpush3.bf16.msra.mxu0 %v9673_v45  ;;  %7973 = vmatpush3.bf16.msra.mxu1 %v9667_v55 }
 0x72f   : > { %7953 = vmatprep.subr.bf16.mxu0 %v8965_v39  ;;  %7974 = vmatprep.subr.bf16.mxu1 %v8965_v39 }
 0x732   : > { %7955 = vmatpush3.bf16.msra.mxu0 %v9681_v51  ;;  %7976 = vmatpush3.bf16.msra.mxu1 %v9675_v21 }
 0x733   : > { %7956 = vmatprep.subr.bf16.mxu0 %v8965_v39  ;;  %7977 = vmatprep.subr.bf16.mxu1 %v8965_v39 }
 0x736   : > { %7958 = vmatpush3.bf16.msra.mxu0 %v9689_v2  ;;  %7979 = vmatpush3.bf16.msra.mxu1 %v9683_v57 }
 0x737   : > { %7959 = vmatprep.subr.bf16.mxu0 %v8965_v39  ;;  %7980 = vmatprep.subr.bf16.mxu1 %v8965_v39 }
 0x739   : > { %v4543_v26 = vpop.xlane.xlu0 %4542 }
 0x73a   : > { %v4553_v30 = vsub.f32 %v9938_v46, %v4543_v26  ;;  %7961 = vmatpush3.bf16.msra.mxu0 %v9697_v63  ;;  %7982 = vmatpush3.bf16.msra.mxu1 %v9691_v4 }
 0x73b   : > { %v4546_v36 = vpop.xlane.xlu1 %4545  ;;  %7962 = vmatprep.subr.bf16.mxu0 %v8965_v39  ;;  %7983 = vmatprep.subr.bf16.mxu1 %v8965_v39 }
 0x73c   : > { %v4567_v55 = vmul.f32 1.442695, %v4553_v30  ;;  %v4554_v45 = vsub.f32 %v9944_v41, %v4546_v36  ;;  %v5226_v30 = vld [vmem:[#allocation14 + $0xc0] sm:$0xff]  ;;  %v5227_v36 = vld [vmem:[#allocation14 + $0xc8] sm:$0xff] }
 0x73e   : > { %8457 = vpow2.f32 %v4567_v55  ;;  %v4569_v21 = vmul.f32 1.442695, %v4554_v45  ;;  %7964 = vmatpush3.bf16.msra.mxu0 %v9705_v32  ;;  %7985 = vmatpush3.bf16.msra.mxu1 %v9699_v34  ;;  %v8101_v55 = vpack.c.bf16 %v5227_v36, %v5226_v30  ;;  %v5228_v45 = vld [vmem:[#allocation14 + $0xd0] sm:$0xff] }
 0x73f   : > { %7965 = vmatprep.subr.bf16.mxu0 %v8965_v39  ;;  %7986 = vmatprep.subr.bf16.mxu1 %v8965_v39 }
 0x740   : > { %8459 = vpow2.f32 %v4569_v21  ;;  %v5229_v21 = vld [vmem:[#allocation14 + $0xd8] sm:$0xff] }
 0x742   : > { %7967 = vmatpush3.bf16.msra.mxu0 %v9713_v31  ;;  %7988 = vmatpush3.bf16.msra.mxu1 %v9707_v19 }
 0x743   : > { %7989 = vmatprep.subr.bf16.mxu1 %v8965_v39  ;;  %7992 = vmatprep.subr.bf16.mxu0 %v8965_v39 }
 0x746   : > { %7991 = vmatpush3.bf16.msra.mxu1 %v9715_v35 }
 0x747   : > { %8016 = vmatprep.subr.bf16.mxu1 %v8965_v39 }
 0x748   : > { %v10003_v51 = vpop.eup %8457 }
 0x749   : > { %v4589_v57 = vsel %vm4522_vm2, %v10003_v51, 0.0 }
 0x74a   : > { %v10007_v2 = vpop.eup %8459  ;;  %4590 = vadd.xlane.f32.xlu0 %v4589_v57  ;;  %v5230_v57 = vld [vmem:[#allocation14 + $0xe0] sm:$0xff] }
 0x74b   : > { %v4592_v4 = vsel %vm4522_vm2, %v10007_v2, 0.0 }
 0x74c   : > { %4593 = vadd.xlane.f32.xlu1 %v4592_v4 }
 0x757   : > { %v4579_v63 = vpop.xlane.xlu0 %4578 }
 0x758   : > { %8461 = vrcp.f32 %v4579_v63 }
 0x75b   : > { %v4582_v34 = vpop.xlane.xlu1 %4581 }
 0x75c   : > { %8463 = vrcp.f32 %v4582_v34 }
 0x762   : > { %v8462_v32 = vpop.eup %8461 }
 0x763   : > { %v4605_v19 = vmul.f32 %v8462_v32, %v9948_v25  ;;  %v10363_v25 = vld [vmem:[#allocation44_spill] sm:$0xff] }
 0x764   : > { %v5232_v32 = vld [vmem:[#allocation14 + $0xf0] sm:$0xff] }
 0x765   : > { %v4622_v31 = vrot.slane %v4605_v19, 6  ;;  %6526 = vmatmul.mubr.f32.vlgmr.msra.gmra.mrb[18].mxu0 %v4605_v19  ;;  %v5233_v19 = vld [vmem:[#allocation14 + $0xf8] sm:$0xff] }
 0x766   : > { %v8464_v35 = vpop.eup %8463  ;;  %7994 = vmatpush3.bf16.msra.mxu0 %v9721_v44  ;;  %6595 = vmatprep.mubr.msk.f32.mxu0 %vm8966_vm0, %v10353_v8 }
 0x767   : > { %v4606_v62 = vmul.f32 %v8464_v35, %v9952_v29  ;;  %7995 = vmatprep.subr.bf16.mxu0 %v8965_v39  ;;  %v4624_v46 = vsel %vm4623_vm4, %v4622_v31, %v4621_v33  ;;  %v10365_v29 = vld [vmem:[#allocation46_spill] sm:$0xff] }
 0x768   : > { %v5225_v33 = vld [vmem:[#allocation14 + $0xb8] sm:$0xff] }
 0x769   : > { %v4625_v41 = vrot.slane %v4606_v62, 5  ;;  %6561 = vmatmul.mubr.f32.vlgmr.msra.gmra.mrb[18].mxu1 %v4606_v62  ;;  %v8098_v26 = vpack.c.bf16 %v5225_v33, %v5224_v18  ;;  %v5412_v18 = vld [vmem:[#allocation17 + $0x30] sm:$0xff]  ;;  %v5413_v33 = vld [vmem:[#allocation17 + $0x38] sm:$0xff] }
 0x76a   : > { %8018 = vmatpush3.bf16.msra.mxu1 %v9725_v52  ;;  %7997 = vmatpush3.bf16.msra.mxu0 %v9737_v61 }
 0x76b   : > { %8019 = vmatprep.subr.bf16.mxu1 %v8965_v39  ;;  %7998 = vmatprep.subr.bf16.mxu0 %v8965_v39  ;;  %v4627_v44 = vsel %vm4626_vm5, %v4625_v41, %v4624_v46  ;;  %v5202_v46 = vld [vmem:[#allocation14] sm:$0xff]  ;;  %v5203_v41 = vld [vmem:[#allocation14 + $0x8] sm:$0xff] }
 0x76c   : > { %6630 = vmatprep.mubr.msk.f32.mxu1 %vm8966_vm0, %v10353_v8 }
 0x76e   : > { %8021 = vmatpush3.bf16.msra.mxu1 %v9739_v58  ;;  %8000 = vmatpush3.bf16.msra.mxu0 %v9745_v10 }
 0x76f   : > { %8022 = vmatprep.subr.bf16.mxu1 %v8965_v39  ;;  %8001 = vmatprep.subr.bf16.mxu0 %v8965_v39 }
 0x772   : > { %8024 = vmatpush3.bf16.msra.mxu1 %v9747_v13  ;;  %8003 = vmatpush3.bf16.msra.mxu0 %v9753_v23 }
 0x773   : > { %8025 = vmatprep.subr.bf16.mxu1 %v8965_v39  ;;  %8004 = vmatprep.subr.bf16.mxu0 %v8965_v39 }
 0x776   : > { %8027 = vmatpush3.bf16.msra.mxu1 %v9755_v17  ;;  %8006 = vmatpush3.bf16.msra.mxu0 %v9761_v42 }
 0x777   : > { %8028 = vmatprep.subr.bf16.mxu1 %v8965_v39  ;;  %8007 = vmatprep.subr.bf16.mxu0 %v8965_v39 }
 0x77a   : > { %8030 = vmatpush3.bf16.msra.mxu1 %v9763_v47  ;;  %8009 = vmatpush3.bf16.msra.mxu0 %v9769_v56  ;;  %v10355_v47 = vld [vmem:[#allocation36_spill] sm:$0xff]  ;;  %v10356_v56 = vld [vmem:[#allocation37_spill] sm:$0xff] }
 0x77b   : > { %8031 = vmatprep.subr.bf16.mxu1 %v8965_v39  ;;  %8010 = vmatprep.subr.bf16.mxu0 %v8965_v39 }
 0x77e   : > { %8033 = vmatpush3.bf16.msra.mxu1 %v9771_v0  ;;  %8012 = vmatpush3.bf16.msra.mxu0 %v9777_v1  ;;  %v10358_v0 = vld [vmem:[#allocation39_spill] sm:$0xff]  ;;  %v10359_v1 = vld [vmem:[#allocation40_spill] sm:$0xff] }
 0x77f   : > { %8034 = vmatprep.subr.bf16.mxu1 %v8965_v39  ;;  %8013 = vmatprep.subr.bf16.mxu0 %v8965_v39 }
 0x782   : > { %8036 = vmatpush3.bf16.msra.mxu1 %v9779_v14  ;;  %8015 = vmatpush3.bf16.msra.mxu0 %v9787_v50  ;;  %v10360_v14 = vld [vmem:[#allocation41_spill] sm:$0xff]  ;;  %v10361_v50 = vld [vmem:[#allocation42_spill] sm:$0xff] }
 0x783   : > { %8037 = vmatprep.subr.bf16.mxu1 %v8965_v39  ;;  %8040 = vmatprep.subr.bf16.mxu0 %v8965_v39 }
 0x786   : > { %8039 = vmatpush3.bf16.msra.mxu1 %v9789_v24  ;;  %v10362_v24 = vld [vmem:[#allocation43_spill] sm:$0xff] }
 0x787   : > { %8064 = vmatprep.subr.bf16.mxu1 %v8965_v39 }
 0x797   : > { %v4585_v52 = vpop.xlane.xlu0 %4584 }
 0x798   : > { %8465 = vrcp.f32 %v4585_v52  ;;  %v8110_v52 = vpack.c.bf16 %v5233_v19, %v5232_v32 }
 0x799   : > { %v4588_v61 = vpop.xlane.xlu1 %4587 }
 0x79a   : > { %8467 = vrcp.f32 %v4588_v61  ;;  %v8113_v61 = vpack.c.bf16 %v5203_v41, %v5202_v46 }
 0x7a2   : > { %v8466_v58 = vpop.eup %8465 }
 0x7a3   : > { %v4607_v10 = vmul.f32 %v8466_v58, %v9956_v20  ;;  %v5221_v20 = vld [vmem:[#allocation14 + $0x98] sm:$0xff] }
 0x7a4   : > { %v8468_v13 = vpop.eup %8467  ;;  %v5205_v58 = vld [vmem:[#allocation14 + $0x18] sm:$0xff] }
 0x7a5   : > { %v4628_v23 = vrot.slane %v4607_v10, 4  ;;  %6596 = vmatmul.mubr.f32.vlgmr.msra.gmra.mrb[20].mxu0 %v4607_v10  ;;  %v4608_v17 = vmul.f32 %v8468_v13, %v9960_v53  ;;  %v8092_v53 = vpack.c.bf16 %v5221_v20, %v5220_v43 }
 0x7a6   : > { %8042 = vmatpush3.bf16.msra.mxu0 %v9796_v60  ;;  %6665 = vmatprep.mubr.msk.f32.mxu0 %vm8966_vm0, %v10353_v8  ;;  %v10357_v60 = vld [vmem:[#allocation38_spill] sm:$0xff] }
 0x7a7   : > { %6631 = vmatmul.mubr.f32.vlgmr.msra.gmra.mrb[20].mxu1 %v4608_v17  ;;  %8043 = vmatprep.subr.bf16.mxu0 %v8965_v39  ;;  %v4630_v42 = vsel %vm4629_vm6, %v4628_v23, %v4627_v44  ;;  %v4631_v6 = vrot.slane %v4608_v17, 3  ;;  %v5204_v44 = vld [vmem:[#allocation14 + $0x10] sm:$0xff]  ;;  %v5206_v23 = vld [vmem:[#allocation14 + $0x20] sm:$0xff]  ;;  %v5207_v17 = vld [vmem:[#allocation14 + $0x28] sm:$0xff] }
 0x7a8   : > { %8066 = vmatpush3.bf16.msra.mxu1 %v10355_v47  ;;  %6700 = vmatprep.mubr.msk.f32.mxu1 %vm8966_vm0, %v10353_v8  ;;  %v8116_v13 = vpack.c.bf16 %v5205_v58, %v5204_v44  ;;  %v10366_v47 = vld [vmem:[#allocation35_spill] sm:$0xff]  ;;  %v5416_v58 = vld [vmem:[#allocation17 + $0x50] sm:$0xff] }
 0x7a9   : > { %8067 = vmatprep.subr.bf16.mxu1 %v8965_v39  ;;  %v4633_v7 = vsel %vm4632_vm7, %v4631_v6, %v4630_v42  ;;  %v8119_v42 = vpack.c.bf16 %v5207_v17, %v5206_v23  ;;  %v5217_v6 = vld [vmem:[#allocation14 + $0x78] sm:$0xff]  ;;  %v5414_v44 = vld [vmem:[#allocation17 + $0x40] sm:$0xff]  ;;  %v5419_v17 = vld [vmem:[#allocation17 + $0x68] sm:$0xff] }
 0x7aa   : > { %8045 = vmatpush3.bf16.msra.mxu0 %v10356_v56  ;;  %v5208_v56 = vld [vmem:[#allocation14 + $0x30] sm:$0xff]  ;;  %v5418_v23 = vld [vmem:[#allocation17 + $0x60] sm:$0xff] }
 0x7ab   : > { %8046 = vmatprep.subr.bf16.mxu0 %v8965_v39 }
 0x7ac   : > { %8069 = vmatpush3.bf16.msra.mxu1 %v10357_v60  ;;  %v5209_v60 = vld [vmem:[#allocation14 + $0x38] sm:$0xff] }
 0x7ad   : > { %8070 = vmatprep.subr.bf16.mxu1 %v8965_v39 }
 0x7ae   : > { %8048 = vmatpush3.bf16.msra.mxu0 %v10358_v0  ;;  %v8122_v0 = vpack.c.bf16 %v5209_v60, %v5208_v56  ;;  %v5421_v56 = vld [vmem:[#allocation17 + $0x78] sm:$0xff] }
 0x7af   : > { %8049 = vmatprep.subr.bf16.mxu0 %v8965_v39 }
 0x7b0   : > { %8072 = vmatpush3.bf16.msra.mxu1 %v10359_v1  ;;  %v5210_v1 = vld [vmem:[#allocation14 + $0x40] sm:$0xff] }
 0x7b1   : > { %8073 = vmatprep.subr.bf16.mxu1 %v8965_v39 }
 0x7b2   : > { %8051 = vmatpush3.bf16.msra.mxu0 %v10360_v14  ;;  %v5211_v14 = vld [vmem:[#allocation14 + $0x48] sm:$0xff] }
 0x7b3   : > { %8052 = vmatprep.subr.bf16.mxu0 %v8965_v39 }
 0x7b4   : > { %8075 = vmatpush3.bf16.msra.mxu1 %v10361_v50  ;;  %v8125_v50 = vpack.c.bf16 %v5211_v14, %v5210_v1  ;;  %v5810_v1 = vld [vmem:[#allocation16] ss:$0 sm:$0xff] }
 0x7b5   : > { %8076 = vmatprep.subr.bf16.mxu1 %v8965_v39 }
 0x7b6   : > { %8054 = vmatpush3.bf16.msra.mxu0 %v10362_v24  ;;  %v5212_v24 = vld [vmem:[#allocation14 + $0x50] sm:$0xff] }
 0x7b7   : > { %8055 = vmatprep.subr.bf16.mxu0 %v8965_v39 }
 0x7b8   : > { %8078 = vmatpush3.bf16.msra.mxu1 %v10363_v25  ;;  %v5213_v25 = vld [vmem:[#allocation14 + $0x58] sm:$0xff] }
 0x7b9   : > { %8079 = vmatprep.subr.bf16.mxu1 %v8965_v39 }
 0x7ba   : > { %8057 = vmatpush3.bf16.msra.mxu0 %v10364_v59  ;;  %v8128_v59 = vpack.c.bf16 %v5213_v25, %v5212_v24 }
 0x7bb   : > { %8058 = vmatprep.subr.bf16.mxu0 %v8965_v39 }
 0x7bc   : > { %8081 = vmatpush3.bf16.msra.mxu1 %v10365_v29  ;;  %v5214_v29 = vld [vmem:[#allocation14 + $0x60] sm:$0xff] }
 0x7bd   : > { %8082 = vmatprep.subr.bf16.mxu1 %v8965_v39 }
 0x7be   : > { %8060 = vmatpush3.bf16.msra.mxu0 %v9856_v49  ;;  %v5219_v49 = vld [vmem:[#allocation14 + $0x88] sm:$0xff] }
 0x7bf   : > { %8061 = vmatprep.subr.bf16.mxu0 %v8965_v39  ;;  %v8089_v38 = vpack.c.bf16 %v5219_v49, %v5218_v37 }
 0x7c0   : > { %8084 = vmatpush3.bf16.msra.mxu1 %v9858_v15 }
 0x7c1   : > { %8085 = vmatprep.subr.bf16.mxu1 %v8965_v39 }
 0x7c2   : > { %8063 = vmatpush3.bf16.msra.mxu0 %v9864_v5 }
 0x7c3   : > { %8088 = vmatprep.subr.bf16.mxu0 %v8965_v39 }
 0x7c4   : > { %8087 = vmatpush3.bf16.msra.mxu1 %v9866_v28 }
 0x7c5   : > { %8112 = vmatprep.subr.bf16.mxu1 %v8965_v39 }
 0x7d7   : > { %v4591_v40 = vpop.xlane.xlu0 %4590 }
 0x7d8   : > { %8469 = vrcp.f32 %v4591_v40  ;;  %v5215_v40 = vld [vmem:[#allocation14 + $0x68] sm:$0xff] }
 0x7d9   : > { %v4594_v16 = vpop.xlane.xlu1 %4593 }
 0x7da   : > { %8471 = vrcp.f32 %v4594_v16 }
 0x7e2   : > { %v8470_v22 = vpop.eup %8469 }
 0x7e3   : > { %v4609_v15 = vmul.f32 %v8470_v22, %v10003_v51  ;;  %v8104_v51 = vpack.c.bf16 %v5229_v21, %v5228_v45  ;;  %v5216_v22 = vld [vmem:[#allocation14 + $0x70] sm:$0xff] }
 0x7e4   : > { %v8472_v5 = vpop.eup %8471 }
 0x7e5   : > { %v4634_v27 = vrot.slane %v4609_v15, 2  ;;  %6666 = vmatmul.mubr.f32.vlgmr.msra.gmra.mrb[22].mxu0 %v4609_v15  ;;  %v4610_v28 = vmul.f32 %v8472_v5, %v10007_v2  ;;  %v5231_v2 = vld [vmem:[#allocation14 + $0xe8] sm:$0xff] }
 0x7e6   : > { %8090 = vmatpush3.bf16.msra.mxu0 %v8089_v38  ;;  %6735 = vmatprep.mubr.msk.f32.mxu0 %vm8966_vm0, %v10353_v8  ;;  %v8107_v34 = vpack.c.bf16 %v5231_v2, %v5230_v57  ;;  %v8134_v38 = vpack.c.bf16 %v5217_v6, %v5216_v22 }
 0x7e7   : > { %v4637_v54 = vrot.slane %v4610_v28, 1  ;;  %6701 = vmatmul.mubr.f32.vlgmr.msra.gmra.mrb[22].mxu1 %v4610_v28  ;;  %8091 = vmatprep.subr.bf16.mxu0 %v8965_v39  ;;  %v4636_v3 = vsel %vm4635_vm8, %v4634_v27, %v4633_v7  ;;  %v5406_v28 = vld [vmem:[#allocation17] sm:$0xff]  ;;  %v5408_v7 = vld [vmem:[#allocation17 + $0x10] sm:$0xff] }
 0x7e8   : > { %6770 = vmatprep.mubr.msk.f32.mxu1 %vm8966_vm0, %v10353_v8  ;;  %8114 = vmatpush3.bf16.msra.mxu1 %v8113_v61  ;;  %v8140_v11 = vpack.c.bf16 %v5409_v48, %v5408_v7 }
 0x7e9   : > { %v4639_v9 = vsel %vm4638_vm9, %v4637_v54, %v4636_v3  ;;  %8115 = vmatprep.subr.bf16.mxu1 %v8965_v39  ;;  %v5410_v3 = vld [vmem:[#allocation17 + $0x20] sm:$0xff] }
 0x7ea   : > { %8093 = vmatpush3.bf16.msra.mxu0 %v8092_v53  ;;  %4641 = vst [vmem:[%s10292_s0] sm:$0xff] %v4639_v9  ;;  %v5407_v53 = vld [vmem:[#allocation17 + $0x8] sm:$0xff] }
 0x7eb   : > { %8094 = vmatprep.subr.bf16.mxu0 %v8965_v39  ;;  %v8137_v54 = vpack.c.bf16 %v5407_v53, %v5406_v28  ;;  %v5411_v9 = vld [vmem:[#allocation17 + $0x28] sm:$0xff] }
 0x7ec   : > { %8117 = vmatpush3.bf16.msra.mxu1 %v8116_v13 }
 0x7ed   : > { %8118 = vmatprep.subr.bf16.mxu1 %v8965_v39 }
 0x7ee   : > { %8096 = vmatpush3.bf16.msra.mxu0 %v8095_v12  ;;  %v8143_v12 = vpack.c.bf16 %v5411_v9, %v5410_v3 }
 0x7ef   : > { %8097 = vmatprep.subr.bf16.mxu0 %v8965_v39 }
 0x7f0   : > { %8120 = vmatpush3.bf16.msra.mxu1 %v8119_v42  ;;  %v8155_v42 = vpack.c.bf16 %v5419_v17, %v5418_v23 }
 0x7f1   : > { %8121 = vmatprep.subr.bf16.mxu1 %v8965_v39 }
 0x7f2   : > { %8099 = vmatpush3.bf16.msra.mxu0 %v8098_v26  ;;  %v8146_v26 = vpack.c.bf16 %v5413_v33, %v5412_v18 }
 0x7f3   : > { %8100 = vmatprep.subr.bf16.mxu0 %v8965_v39 }
 0x7f4   : > { %8123 = vmatpush3.bf16.msra.mxu1 %v8122_v0 }
 0x7f5   : > { %8124 = vmatprep.subr.bf16.mxu1 %v8965_v39 }
 0x7f6   : > { %8102 = vmatpush3.bf16.msra.mxu0 %v8101_v55 }
 0x7f7   : > { %8103 = vmatprep.subr.bf16.mxu0 %v8965_v39 }
 0x7f8   : > { %v4708_v4 = vpop.f32.mrb[16].mxu0  ;;  %8126 = vmatpush3.bf16.msra.mxu1 %v8125_v50 }
 0x7f9   : > { %v6457_v63 = vpop.f32.mrb[17].mxu0  ;;  %8127 = vmatprep.subr.bf16.mxu1 %v8965_v39 }
 0x7fa   : > { %8105 = vmatpush3.bf16.msra.mxu0 %v8104_v51 }
 0x7fb   : > { %8106 = vmatprep.subr.bf16.mxu0 %v8965_v39 }
 0x7fc   : > { %v4778_v31 = vpop.f32.mrb[16].mxu1  ;;  %8129 = vmatpush3.bf16.msra.mxu1 %v8128_v59 }
 0x7fd   : > { %v5312_v35 = vrot.slane %v4778_v31, 7  ;;  %v6492_v62 = vpop.f32.mrb[17].mxu1  ;;  %8130 = vmatprep.subr.bf16.mxu1 %v8965_v39 }
 0x7fe   : > { %8108 = vmatpush3.bf16.msra.mxu0 %v8107_v34 }
 0x7ff   : > { %v5313_v10 = vsel %vm4620_vm3, %v5312_v35, %v4708_v4  ;;  %8109 = vmatprep.subr.bf16.mxu0 %v8965_v39 }
 0x802   : > { %8111 = vmatpush3.bf16.msra.mxu0 %v8110_v52  ;;  %v5415_v52 = vld [vmem:[#allocation17 + $0x48] sm:$0xff] }
 0x803   : > { %8136 = vmatprep.subr.bf16.mxu0 %v8965_v39  ;;  %v8149_v61 = vpack.c.bf16 %v5415_v52, %v5414_v44 }
 0x805   : > { %6736 = vmatmul.mubr.f32.vlgmr.msra.gmra.mrb[24].mxu0 %v10366_v47  ;;  %v5420_v47 = vld [vmem:[#allocation17 + $0x70] sm:$0xff] }
 0x806   : > { %6805 = vmatprep.mubr.msk.f32.mxu0 %vm8966_vm0, %v10353_v8  ;;  %v8131_v8 = vpack.c.bf16 %v5215_v40, %v5214_v29  ;;  %8138 = vmatpush3.bf16.msra.mxu0 %v8137_v54  ;;  %v8158_v60 = vpack.c.bf16 %v5421_v56, %v5420_v47 }
 0x807   : > { %8139 = vmatprep.subr.bf16.mxu0 %v8965_v39 }
 0x808   : > { %8132 = vmatpush3.bf16.msra.mxu1 %v8131_v8 }
 0x809   : > { %8133 = vmatprep.subr.bf16.mxu1 %v8965_v39 }
 0x80a   : > { %8141 = vmatpush3.bf16.msra.mxu0 %v8140_v11 }
 0x80b   : > { %8142 = vmatprep.subr.bf16.mxu0 %v8965_v39 }
 0x80c   : > { %8135 = vmatpush3.bf16.msra.mxu1 %v8134_v38 }
 0x80e   : > { %8144 = vmatpush3.bf16.msra.mxu0 %v8143_v12 }
 0x80f   : > { %8145 = vmatprep.subr.bf16.mxu0 %v8965_v39 }
 0x812   : > { %8147 = vmatpush3.bf16.msra.mxu0 %v8146_v26 }
 0x813   : > { %8148 = vmatprep.subr.bf16.mxu0 %v8965_v39 }
 0x816   : > { %8150 = vmatpush3.bf16.msra.mxu0 %v8149_v61 }
 0x817   : > { %8151 = vmatprep.subr.bf16.mxu0 %v8965_v39 }
 0x838   : > { %v4848_v16 = vpop.f32.mrb[18].mxu0 }
 0x839   : > { %v5314_v37 = vrot.slane %v4848_v16, 6  ;;  %v6527_v49 = vpop.f32.mrb[19].mxu0 }
 0x83b   : > { %v5315_v15 = vsel %vm4623_vm4, %v5314_v37, %v5313_v10  ;;  %v5417_v10 = vld [vmem:[#allocation17 + $0x58] sm:$0xff] }
 0x83c   : > { %v4918_v43 = vpop.f32.mrb[18].mxu1  ;;  %v8152_v13 = vpack.c.bf16 %v5417_v10, %v5416_v58 }
 0x83d   : > { %v5316_v20 = vrot.slane %v4918_v43, 5  ;;  %v6562_v5 = vpop.f32.mrb[19].mxu1 }
 0x83e   : > { %8153 = vmatpush3.bf16.msra.mxu0 %v8152_v13 }
 0x83f   : > { %v5317_v27 = vsel %vm4626_vm5, %v5316_v20, %v5315_v15  ;;  %8154 = vmatprep.subr.bf16.mxu0 %v8965_v39 }
 0x842   : > { %8156 = vmatpush3.bf16.msra.mxu0 %v8155_v42 }
 0x843   : > { %8157 = vmatprep.subr.bf16.mxu0 %v8965_v39 }
 0x846   : > { %8159 = vmatpush3.bf16.msra.mxu0 %v8158_v60 }
 0x878   : > { %v4988_v30 = vpop.f32.mrb[20].mxu0 }
 0x879   : > { %v5318_v36 = vrot.slane %v4988_v30, 4  ;;  %v6597_v55 = vpop.f32.mrb[21].mxu0 }
 0x87a   : > { %v5058_v45 = vpop.f32.mrb[20].mxu1 }
 0x87b   : > { %v5319_v21 = vsel %vm4629_vm6, %v5318_v36, %v5317_v27  ;;  %v5320_v51 = vrot.slane %v5058_v45, 3  ;;  %v6632_v57 = vpop.f32.mrb[21].mxu1 }
 0x87d   : > { %v5321_v2 = vsel %vm4632_vm7, %v5320_v51, %v5319_v21 }
 0x8b8   : > { %v5128_v4 = vpop.f32.mrb[22].mxu0 }
 0x8b9   : > { %v5322_v63 = vrot.slane %v5128_v4, 2  ;;  %v6667_v34 = vpop.f32.mrb[23].mxu0 }
 0x8ba   : > { %v5198_v32 = vpop.f32.mrb[22].mxu1 }
 0x8bb   : > { %v5323_v19 = vsel %vm4635_vm8, %v5322_v63, %v5321_v2  ;;  %v5324_v31 = vrot.slane %v5198_v32, 1  ;;  %v6702_v35 = vpop.f32.mrb[23].mxu1 }
 0x8bd   : > { %v5325_v62 = vsel %vm4638_vm9, %v5324_v31, %v5323_v19 }
 0x8be   : > { %6771 = vmatmul.mubr.f32.vlgmr.msra.gmra.mrb[24].mxu1 %v5325_v62 }
 0x8d8   : > { %v5300_v46 = vpop.f32.mrb[24].mxu0 }
 0x8d9   : > { %v6737_v41 = vpop.f32.mrb[25].mxu0 }
 0x991   : > { %v5393_v0 = vpop.f32.mrb[24].mxu1 }
 0x992   : > { %v5394_v14 = vadd.f32 %v5393_v0, %v5300_v46  ;;  %v6772_v50 = vpop.f32.mrb[25].mxu1 }
 0x994   : > { %v5404_v24 = vadd.f32 %v5810_v1, %v5394_v14 }
 0x996   : > { %8473 = vtanh.f32 %v5404_v24 }
 0x9a0   : > { %v8474_v25 = vpop.eup %8473 }
 0x9a1   : > { %6806 = vmatmul.mubr.f32.vlgmr.msra.gmra.mrb[26].mxu0 %v8474_v25 }
 0x9a2   : > { %8800 = shalt.err (!%p8797_p12)
}
 0x9a3   : > { %s10369_s23 = sld [smem:[#allocation56_spill]]  ;;  %p10370_p2 = pmov %p10368_p0 }
 0x9a9   : > { %s8801_s17 = scalar_lea.hbm %s10369_s23, 512 }
 0x9aa   : > { %p8802_p6 = scmp.ne.s32.totalorder %s10369_s23, %s8801_s17  ;;  %p8807_p3 = scmp.lt.u32.totalorder %s8801_s17, %s10369_s23 }
 0x9ac   : > { %p8803_p9 = pnand %p8802_p6, %p10370_p2 }
 0x9ae   : > { %p8804_p7 = pneg %p8803_p9 }
 0x9b0   : > { %p8809_p11 = pnand %p8807_p3, %p8804_p7 }
 0x9b2   : > { %8812 = shalt.err (!%p8809_p11)
}
 0x9b3   : > { %s8969_s28 = smov 128   ;;  %s10371_s1 = sld [smem:[#allocation32_spill]]  ;;  %v5811_v39 = vld [vmem:[#allocation19] ss:$0 sm:$0xff] }
 0x9b4   : > { %s8970_s18 = smov 8   ;;  %p10372_p13 = pmov %p10368_p0 }
 0x9b5   : > { %s5500_s12 = sand.u32 1, %s10367_s11   ;;  %s10373_s17 = scalar_lea.vmem [#allocation20], %s9403_s15 }
 0x9b6   : > { %8260 = dma.vmem_to_hbm [thread:$0]  (%p10372_p13), %s5533_s24, 512, %s10369_s23, [#allocation22], %s8969_s28, %s8969_s28, %s8970_s18  }
 0x9b7   : > { %s5520_s22 = sshll.u32 %s10373_s17, 4  ;;  %s10374_s2 = scalar_lea.vmem [#allocation23], %s9403_s15  ;;  %s10162_s22 = int_to_ptr.vmem [resolvable:$true] %s5520_s22 }
 0x9b8   : > { %s5549_s3 = sshll.u32 %s10374_s2, 4  ;;  %s10375_s6 = sld [smem:[#allocation55_spill]]  ;;  %s10169_s3 = int_to_ptr.vmem [resolvable:$true] %s5549_s3 }
 0x9b9   : > { %s5814_s0 = sshll.u32 %s10371_s1, 7  ;;  %s10376_s28 = sld [smem:[#allocation57_spill]] }
 0x9ba   : > { %s10378_s2 = smov %s10373_s17  ;;  %s10173_s21 = scalar_lea.sflag [#allocation4], %s5500_s12 }
 0x9bb   : > { %s8813_s17 = scalar_lea.vmem %s10162_s22, 128  ;;  %p10379_p5 = scmp.ne.s32.totalorder %s10323_s19, 0 }
 0x9bc   : > { %p8814_p0 = scmp.ne.s32.totalorder %s10162_s22, %s8813_s17  ;;  %s8971_s4 = smov [#allocation20]  }
 0x9bd   : > { %s8817_s5 = sshll.u32 %s8971_s4, 4  ;;  %s8818_s5 = int_to_ptr.vmem [resolvable:$false] %s8817_s5 }
 0x9be   : > { %s10160_s7 = scalar_lea.hbm %s10375_s6, %s5814_s0  ;;  %p8815_p4 = pnand %p8814_p0, %p10379_p5 }
 0x9bf   : > { %s10377_s18 = smov %s10376_s28  ;;  %s10167_s1 = scalar_lea.hbm %s10376_s28, %s5814_s0 }
 0x9c0   : > { %p8816_p8 = pneg %p8815_p4  ;;  %s8819_s16 = scalar_lea.vmem %s8818_s5, 256 }
 0x9c1   : > { %p8820_p10 = scmp.lt.s32.totalorder %s10162_s22, %s8818_s5  ;;  %p8821_p1 = scmp.lt.s32.totalorder %s8819_s16, %s8813_s17 }
 0x9c3   : > { %p8822_p12 = por %p8821_p1, %p8820_p10 }
 0x9c5   : > { %p8823_p6 = pnand %p8822_p12, %p8816_p8 }
 0xa74   : > { %v5495_v59 = vpop.f32.mrb[26].mxu0 }
 0xa75   : > { %v5496_v29 = vadd.f32 %v5811_v39, %v5495_v59  ;;  %v6807_v40 = vpop.f32.mrb[27].mxu0 }
 0xa77   : > { %5499 = vst [vmem:[%s10378_s2] sm:$0xff] %v5496_v29 }
 0xa78   : > { %8826 = shalt.err (!%p8823_p6)
}
 0xa79   : > { %s8827_s15 = scalar_lea.hbm %s10160_s7, 128  ;;  %s8831_s24 = scalar_lea.hbm %s10375_s6, 512 }
 0xa7a   : > { %p8828_p2 = scmp.ne.s32.totalorder %s10160_s7, %s8827_s15  ;;  %p8832_p3 = scmp.lt.u32.totalorder %s10160_s7, %s10375_s6 }
 0xa7b   : > { %p8833_p11 = scmp.lt.u32.totalorder %s8831_s24, %s8827_s15  ;;  %p8835_p0 = scmp.lt.u32.totalorder %s8827_s15, %s10160_s7 }
 0xa7c   : > { %p8829_p9 = pnand %p8828_p2, %p10379_p5 }
 0xa7d   : > { %p8834_p13 = por %p8833_p11, %p8832_p3 }
 0xa7e   : > { %p8830_p7 = pneg %p8829_p9 }
 0xa7f   : > { %p8836_p4 = por %p8835_p0, %p8834_p13 }
 0xa81   : > { %p8837_p8 = pnand %p8836_p4, %p8830_p7 }
 0xa83   : > { %8840 = shalt.err (!%p8837_p8)
}
 0xa84   : > { %8258 = dma.vmem_to_hbm [thread:$0]  (%p10379_p5), %s10162_s22, 128, %s10160_s7, %s10173_s21  }
 0xa85   : > { %s8841_s17 = scalar_lea.vmem %s10169_s3, 128  ;;  %s8972_s4 = smov [#allocation23]  }
 0xa86   : > { %p8842_p10 = scmp.ne.s32.totalorder %s10169_s3, %s8841_s17  ;;  %s8845_s5 = sshll.u32 %s8972_s4, 4  ;;  %s8846_s5 = int_to_ptr.vmem [resolvable:$false] %s8845_s5 }
 0xa87   : > { %s8847_s16 = scalar_lea.vmem %s8846_s5, 256  ;;  %p8848_p6 = scmp.lt.s32.totalorder %s10169_s3, %s8846_s5 }
 0xa88   : > { %p8843_p1 = pnand %p8842_p10, %p10379_p5  ;;  %p8849_p2 = scmp.lt.s32.totalorder %s8847_s16, %s8841_s17 }
 0xa8a   : > { %p8844_p12 = pneg %p8843_p1  ;;  %p8850_p9 = por %p8849_p2, %p8848_p6 }
 0xa8c   : > { %p8851_p7 = pnand %p8850_p9, %p8844_p12 }
 0xa8e   : > { %8854 = shalt.err (!%p8851_p7)
}
 0xa8f   : > { %s8855_s7 = scalar_lea.hbm %s10167_s1, 128  ;;  %s8859_s12 = scalar_lea.hbm %s10377_s18, 512 }
 0xa90   : > { %p8856_p3 = scmp.ne.s32.totalorder %s10167_s1, %s8855_s7  ;;  %p8860_p0 = scmp.lt.u32.totalorder %s10167_s1, %s10377_s18 }
 0xa91   : > { %p8861_p4 = scmp.lt.u32.totalorder %s8859_s12, %s8855_s7  ;;  %p8863_p10 = scmp.lt.u32.totalorder %s8855_s7, %s10167_s1 }
 0xa92   : > { %p8857_p11 = pnand %p8856_p3, %p10379_p5 }
 0xa93   : > { %p8862_p8 = por %p8861_p4, %p8860_p0 }
 0xa94   : > { %p8858_p13 = pneg %p8857_p11 }
 0xa95   : > { %p8864_p1 = por %p8863_p10, %p8862_p8 }
 0xa97   : > { %p8865_p12 = pnand %p8864_p1, %p8858_p13 }
 0xa99   : > { %8868 = shalt.err (!%p8865_p12)
}
 0xa9a   : > { %8261 = dma.vmem_to_hbm [thread:$0]  (%p10379_p5), %s10169_s3, 128, %s10167_s1, %s10173_s21  }
 0xa9b   : > { %p10380_p6 = scmp.eq.s32.totalorder %s10367_s11, 3 }
 0xa9d   : > { %8918 = dma.done.wait (%p10380_p6), [#allocation22], 512   ;;  %p10381_p2 = pmov %p10380_p6 }
 0xa9f   : > { %8920 = vsyncadd (%p10381_p2), [#allocation22], 4294966784 }
 0xaa0 PF: > { %p8331_p9 = scmp.ge.s32.totalorder %s8947_s30, 2  ;;  %s10382_s28 = sadd.s32 4294967294, %s8947_s30  }
 0xaa1   : > { %s5565_s2 = sand.u32 1, %s10382_s28   ;;  %p10383_p7 = scmp.ne.s32.totalorder %s10324_s25, 0 }
 0xaa2   : > { %s5566_s19 = scalar_lea.sflag [#allocation4], %s5565_s2 }
 0xaa3   : > { %p8302_p3 = pnand %p8331_p9, %p10383_p7 }
 0xaa5   : > { %8922 = dma.done.wait (!%p8302_p3), %s5566_s19, 256  }
 0xaa6   : > { %8924 = vsyncadd (!%p8302_p3), %s5566_s19, 4294967040  ;;  %s36_s30 = sadd.s32 1, %s8947_s30   ;;  %s10384_s25 = smov %s8931_s26 }
 0xaa7   : > { %p33_p5 = scmp.ge.s32.totalorder %s36_s30, 6   ;;  %s10385_s26 = smov %s8935_s27 }
 0xaa8   : > { %s10386_s27 = smov %s9353_s20  ;;  %s10387_s28 = smov %s8943_s29 }
 0xaa9   : > { %s10388_s29 = smov %s10390_s13  ;;  %35 = sbr.rel (!%p33_p5) target bundleno = 24 (0x18), region = 182 }
 0xab0   :  { %5580 = vsyncpa [#allocation3], 1 }
 0xab1   :  { %5582 = vsyncpa [#allocation3 + $0x1], 1 }
 0xab2   :  { %5583 = vsyncpa [#allocation6], 1 }
 0xab3   :  { %5584 = vsyncpa [#allocation9], 1 }
 0xab4   :  { %5585 = vsyncpa [#allocation12], 1 }
 0xab5   :  { %5586 = vsyncpa [#allocation15], 1 }
 0xab6   :  { %5587 = vsyncpa [#allocation18], 1 }
 0xab7   :  { %5588 = vsyncpa [#allocation4], 1 }
 0xab8   :  { %5590 = vsyncpa [#allocation4 + $0x1], 1 }
 0xab9   :  { %5591 = vsyncpa [#allocation22], 1 }

</bundles_post_ra>
